<compile_context>
chip_gen: v7x
topology: tpu7x:2x2x1
jax: 0.10.0
libtpu: 0.0.40
codegen_flags: <defaults>
</compile_context>

<pallas_src>
import functools

import jax
import jax.numpy as jnp
import numpy as np
from jax.experimental import pallas as pl
from jax.experimental.pallas import tpu as pltpu

# Geometry is pinned by Linear(7*7*16, 256): 28 -> 14 -> 7 spatial.
H1, W1 = 28, 28
HW1 = H1 * W1            # 784 : conv1/conv2 grid, flattened
H2, W2 = 14, 14
HW2 = H2 * W2            # 196 : conv3 grid, flattened
H3, W3 = 7, 7
HW3 = H3 * W3            # 49  : per-channel flatten fed to fc1
PAD1 = 32                # >= W1 + 1 : flat zero pad for 3x3 shifts on 28-grid
PAD2 = 16                # >= W2 + 1 : flat zero pad for 3x3 shifts on 14-grid


# ----------------------------------------------------------------------------
# Activation (static dispatch, traced into the kernel body)
# ----------------------------------------------------------------------------
def _apply_act(x, a_type):
    if a_type is None:
        return x
    if a_type == "relu":
        return jnp.maximum(x, 0.0)
    if a_type == "tanh":
        return jnp.tanh(x)
    if a_type == "sigmoid":
        return jax.nn.sigmoid(x)
    if a_type == "leaky_relu":
        return jnp.where(x >= 0, x, 0.01 * x)
    raise NotImplementedError(a_type)


# ----------------------------------------------------------------------------
# Fused forward kernel (one batch tile of `bt` images per grid step)
# ----------------------------------------------------------------------------
def _fused_kernel(x_ref,
                  wk1_ref, bb1_ref, wk2_ref, bb2_ref, wk3_ref, bb3_ref,
                  s1_ref, s2_ref, perm_ref, w4_ref, b4_ref, w5_ref, b5_ref,
                  m28_ref, m14_ref,
                  *refs, bt, a_type, with_inter, cdt):
    f32 = jnp.float32
    if with_inter:
        l1_ref, l2_ref, l3_ref, l4_ref, l5_ref = refs[:5]
        scratch = refs[5:]
    else:
        l1_ref = l2_ref = l3_ref = None
        l4_ref, l5_ref = refs[:2]
        scratch = refs[2:]
    xp1, xs1, xp2, xs2, xq2, xp3, xs3, xq3, fcs = scratch

    def zero_pads(buf, rows, pad, hw):
        # Zero ONLY the pad column ranges; interiors are overwritten each step.
        z = jnp.zeros((rows, pad), f32)
        buf[:, 0:pad] = z
        buf[:, pad + hw:pad + hw + pad] = z

    def stack_taps(xp, xs, mask_ref, hw, w_img, pad, cin):
        """Write the 9 shifted (edge-masked) tap planes into the stacked-K slab."""
        rows = bt * cin
        m_left = mask_ref[0:1, :]      # zero where col == 0        (dx = -1)
        m_right = mask_ref[1:2, :]     # zero where col == w_img-1  (dx = +1)
        for ky in range(3):
            for kx in range(3):
                dy, dx = ky - 1, kx - 1
                off = pad + dy * w_img + dx
                plane = xp[:, off:off + hw]
                if dx == -1:
                    plane = plane * m_left
                elif dx == 1:
                    plane = plane * m_right
                k = ky * 3 + kx
                xs[k * rows:(k + 1) * rows, :] = plane.astype(cdt)

    def conv3x3(xp, xs, wk_ref, bb_ref, mask_ref, hw, w_img, pad, cin):
        # ONE MXU dot with the taps stacked along the contraction dim.
        stack_taps(xp, xs, mask_ref, hw, w_img, pad, cin)
        y = jnp.dot(wk_ref[...], xs[...], preferred_element_type=f32)
        return _apply_act(y + bb_ref[...], a_type)

    # ---- conv1: 1 -> 4 on the 28x28 grid ---------------------------------
    zero_pads(xp1, bt * 1, PAD1, HW1)
    xp1[:, PAD1:PAD1 + HW1] = x_ref[:, 0, :]
    a1 = conv3x3(xp1, xs1, wk1_ref, bb1_ref, m28_ref, HW1, W1, PAD1, 1)
    if with_inter:
        l1_ref[...] = a1                                        # (bt*4, 784)

    # ---- conv2: 4 -> 8 on the 28x28 grid ----------------------------------
    zero_pads(xp2, bt * 4, PAD1, HW1)
    xp2[:, PAD1:PAD1 + HW1] = a1
    a2 = conv3x3(xp2, xs2, wk2_ref, bb2_ref, m28_ref, HW1, W1, PAD1, 4)
    if with_inter:
        l2_ref[...] = a2                                        # (bt*8, 784)

    # ---- maxpool 2x2 (28 -> 14): shifted maxes + selection matmul ---------
    xq2[:, HW1:HW1 + PAD1] = jnp.zeros((bt * 8, PAD1), f32)
    xq2[:, 0:HW1] = a2
    m2 = jnp.maximum(jnp.maximum(a2, xq2[:, 1:1 + HW1]),
                     jnp.maximum(xq2[:, W1:W1 + HW1],
                                 xq2[:, W1 + 1:W1 + 1 + HW1]))
    zero_pads(xp3, bt * 8, PAD2, HW2)
    # S1 (784, 196) picks the even-row/even-col window maxima -> 14x14 flat.
    xp3[:, PAD2:PAD2 + HW2] = jnp.dot(m2.astype(cdt), s1_ref[...],
                                      preferred_element_type=f32)

    # ---- conv3: 8 -> 16 on the 14x14 grid ----------------------------------
    a3 = conv3x3(xp3, xs3, wk3_ref, bb3_ref, m14_ref, HW2, W2, PAD2, 8)
    if with_inter:
        l3_ref[...] = a3                                        # (bt*16, 196)

    # ---- maxpool 2x2 (14 -> 7) + channel-major permutation -----------------
    xq3[:, HW2:HW2 + PAD2] = jnp.zeros((bt * 16, PAD2), f32)
    xq3[:, 0:HW2] = a3
    m3 = jnp.maximum(jnp.maximum(a3, xq3[:, 1:1 + HW2]),
                     jnp.maximum(xq3[:, W2:W2 + HW2],
                                 xq3[:, W2 + 1:W2 + 1 + HW2]))
    p3_bm = jnp.dot(m3.astype(cdt), s2_ref[...],
                    preferred_element_type=f32)                 # (bt*16, 49) b-major
    p3_cm = jnp.dot(perm_ref[...], p3_bm.astype(cdt),
                    preferred_element_type=f32)                 # (bt*16, 49) c-major

    # ---- fc1: stage channel-contiguous slabs -> (bt, 784), one MXU dot -----
    for c in range(16):
        fcs[:, c * HW3:(c + 1) * HW3] = p3_cm[c * bt:(c + 1) * bt, :].astype(cdt)
    a4 = _apply_act(jnp.dot(fcs[...], w4_ref[...], preferred_element_type=f32)
                    + b4_ref[...], a_type)
    l4_ref[:, 0, :] = a4                                        # (bt, 256)

    # ---- fc2: 256 -> 10 (no activation) -------------------------------------
    l5_ref[:, 0, :] = (jnp.dot(a4.astype(cdt), w5_ref[...],
                               preferred_element_type=f32) + b5_ref[...])


# ----------------------------------------------------------------------------
# Static constants: pool-selection matrices, edge masks, row-permutation
# ----------------------------------------------------------------------------
def _static_constants():
    s1 = np.zeros((HW1, HW2), np.float32)          # 28x28-flat -> 14x14-flat
    for ho in range(H2):
        for wo in range(W2):
            s1[2 * ho * W1 + 2 * wo, ho * W2 + wo] = 1.0
    s2 = np.zeros((HW2, HW3), np.float32)          # 14x14-flat -> 7x7-flat
    for ho in range(H3):
        for wo in range(W3):
            s2[2 * ho * W2 + 2 * wo, ho * W3 + wo] = 1.0
    col1 = np.arange(HW1) % W1
    m28 = np.stack([(col1 != 0), (col1 != W1 - 1)]).astype(np.float32)
    col2 = np.arange(HW2) % W2
    m14 = np.stack([(col2 != 0), (col2 != W2 - 1)]).astype(np.float32)
    return jnp.asarray(s1), jnp.asarray(s2), jnp.asarray(m28), jnp.asarray(m14)


def _perm_matrix(bt):
    # Row permutation: batch-major rows (b*16 + c) -> channel-major rows (c*bt + b).
    p = np.zeros((16 * bt, 16 * bt), np.float32)
    for b in range(bt):
        for c in range(16):
            p[c * bt + b, b * 16 + c] = 1.0
    return p


# ----------------------------------------------------------------------------
# Forward wrapper (returns [layer5, layer4, layer3, layer2, layer1])
# ----------------------------------------------------------------------------
def cnn_hero_forward(x, params, a_type="relu", with_intermediates=True):
    N = x.shape[0]
    assert x.shape[1:] == (1, H1, W1), "Linear(7*7*16,256) pins input to 28x28"

    # Batch tiling: 16 images/step for big batches (>=2 grid iterations so v7x
    # megacore can shard), 8 for medium batches, 2 for tiny ones.
    if N >= 32:
        bt = 16
    elif N >= 8:
        bt = 8
    else:
        bt = 2
    npad = pl.cdiv(N, bt) * bt
    grid = (npad // bt,)

    # MXU operand dtype: bf16 when all stacked-slab plane offsets stay 16-row
    # aligned (bt % 16 == 0); f32 fallback for the tiny-batch path.
    cdt = jnp.bfloat16 if bt % 16 == 0 else jnp.float32

    xf = x.reshape(N, 1, HW1).astype(jnp.float32)       # free reshape (NCHW flat)
    if npad != N:
        xf = jnp.pad(xf, ((0, npad - N), (0, 0), (0, 0)))

    # --- one-time weight layout prep (tiny tensors, plain XLA) -------------
    eye_bt = jnp.eye(bt, dtype=jnp.float32)

    def conv_wstack(w):
        # torch (Cout, Cin, 3, 3) -> (bt*Cout, 9*bt*Cin) block-diag, taps stacked in K.
        co, ci = int(w.shape[0]), int(w.shape[1])
        taps = jnp.transpose(w, (2, 3, 0, 1)).reshape(9, co, ci)     # (9, co, ci)
        wk = jnp.einsum("pq,koi->pokqi", eye_bt, taps)               # (bt,co,9,bt,ci)
        return wk.reshape(bt * co, 9 * bt * ci).astype(cdt)

    def conv_bias(b):          # (Cout,) -> (bt*Cout, 1), batch-tiled
        co = int(b.shape[0])
        return jnp.tile(b.reshape(1, co), (bt, 1)).reshape(bt * co, 1)

    wk1, bb1 = conv_wstack(params["w1"]), conv_bias(params["b1"])
    wk2, bb2 = conv_wstack(params["w2"]), conv_bias(params["b2"])
    wk3, bb3 = conv_wstack(params["w3"]), conv_bias(params["b3"])
    w4t = params["w4"].T.astype(cdt)                 # (784, 256), torch c*49+hw order
    b4r = params["b4"].reshape(1, 256)
    w5t = params["w5"].T.astype(cdt)                 # (256, 10)
    b5r = params["b5"].reshape(1, 10)

    s1, s2, m28, m14 = _static_constants()
    s1, s2 = s1.astype(cdt), s2.astype(cdt)
    perm = jnp.asarray(_perm_matrix(bt), dtype=cdt)

    consts = (wk1, bb1, wk2, bb2, wk3, bb3, s1, s2, perm,
              w4t, b4r, w5t, b5r, m28, m14)

    def _const_spec(arr):
        nd = arr.ndim
        return pl.BlockSpec(arr.shape, lambda i, nd=nd: (0,) * nd)

    in_specs = [pl.BlockSpec((bt, 1, HW1), lambda i: (i, 0, 0))]
    in_specs += [_const_spec(a) for a in consts]

    out_shape, out_specs = [], []
    if with_intermediates:
        out_shape += [
            jax.ShapeDtypeStruct((npad * 4, HW1), jnp.float32),
            jax.ShapeDtypeStruct((npad * 8, HW1), jnp.float32),
            jax.ShapeDtypeStruct((npad * 16, HW2), jnp.float32),
        ]
        out_specs += [
            pl.BlockSpec((bt * 4, HW1), lambda i: (i, 0)),
            pl.BlockSpec((bt * 8, HW1), lambda i: (i, 0)),
            pl.BlockSpec((bt * 16, HW2), lambda i: (i, 0)),
        ]
    out_shape += [
        jax.ShapeDtypeStruct((npad, 1, 256), jnp.float32),
        jax.ShapeDtypeStruct((npad, 1, 10), jnp.float32),
    ]
    out_specs += [
        pl.BlockSpec((bt, 1, 256), lambda i: (i, 0, 0)),
        pl.BlockSpec((bt, 1, 10), lambda i: (i, 0, 0)),
    ]

    scratch_shapes = [
        pltpu.VMEM((bt * 1, HW1 + 2 * PAD1), jnp.float32),   # xp1: padded input
        pltpu.VMEM((9 * bt * 1, HW1), cdt),                  # xs1: stacked taps conv1
        pltpu.VMEM((bt * 4, HW1 + 2 * PAD1), jnp.float32),   # xp2: padded layer1
        pltpu.VMEM((9 * bt * 4, HW1), cdt),                  # xs2: stacked taps conv2
        pltpu.VMEM((bt * 8, HW1 + PAD1), jnp.float32),       # xq2: pool1 staging
        pltpu.VMEM((bt * 8, HW2 + 2 * PAD2), jnp.float32),   # xp3: padded pooled2
        pltpu.VMEM((9 * bt * 8, HW2), cdt),                  # xs3: stacked taps conv3
        pltpu.VMEM((bt * 16, HW2 + PAD2), jnp.float32),      # xq3: pool2 staging
        pltpu.VMEM((bt, 16 * HW3), cdt),                     # fcs: fc1 staging (bt,784)
    ]

    kernel = functools.partial(_fused_kernel, bt=bt, a_type=a_type,
                               with_inter=with_intermediates, cdt=cdt)
    outs = pl.pallas_call(
        kernel,
        out_shape=out_shape,
        grid_spec=pltpu.PrefetchScalarGridSpec(
            num_scalar_prefetch=0,
            grid=grid,
            in_specs=in_specs,
            out_specs=out_specs,
            scratch_shapes=scratch_shapes,
        ),
        compiler_params=pltpu.CompilerParams(
            dimension_semantics=("parallel",),
            # measured per-tile footprint at bt=16 is ~9-10 MiB; leave headroom
            # but stay well under v7x's 32 MiB scoped default / 64 MiB physical.
            vmem_limit_bytes=24 * 1024 * 1024,
        ),
    )(xf, *consts)

    if with_intermediates:
        l1f, l2f, l3f, l4f, l5f = outs
        layer1 = l1f.reshape(npad, 4, H1, W1)[:N]
        layer2 = l2f.reshape(npad, 8, H1, W1)[:N]
        layer3 = l3f.reshape(npad, 16, H2, W2)[:N]
        layer4 = l4f[:N, 0, :]
        layer5 = l5f[:N, 0, :]
        return [layer5, layer4, layer3, layer2, layer1]
    l4f, l5f = outs
    return [l5f[:N, 0, :], l4f[:N, 0, :]]


# ----------------------------------------------------------------------------
# Pure-JAX reference for verification
# ----------------------------------------------------------------------------
def _ref_forward(x, params, a_type="relu"):
    act = {"relu": jax.nn.relu, "tanh": jnp.tanh, "sigmoid": jax.nn.sigmoid,
           "leaky_relu": lambda v: jnp.where(v >= 0, v, 0.01 * v)}[a_type]

    def conv(xx, w, b):
        y = jax.lax.conv_general_dilated(
            xx, w, (1, 1), ((1, 1), (1, 1)),
            dimension_numbers=("NCHW", "OIHW", "NCHW"))
        return act(y + b[None, :, None, None])

    def pool(xx):
        return jax.lax.reduce_window(xx, -jnp.inf, jax.lax.max,
                                     (1, 1, 2, 2), (1, 1, 2, 2), "VALID")

    c1 = conv(x, params["w1"], params["b1"])
    c2 = conv(c1, params["w2"], params["b2"])
    p2 = pool(c2)
    c3 = conv(p2, params["w3"], params["b3"])
    p3 = pool(c3)
    flat = p3.reshape(x.shape[0], -1)
    l4 = act(flat @ params["w4"].T + params["b4"])
    l5 = l4 @ params["w5"].T + params["b5"]
    return [l5, l4, c3, c2, c1]


# ----------------------------------------------------------------------------
# Deterministic parameter init (torch-style shapes)
# ----------------------------------------------------------------------------
def init_params(key):
    ks = jax.random.split(key, 10)

    def conv_init(kw, kb, cout, cin):
        fan_in = cin * 9
        w = jax.random.normal(kw, (cout, cin, 3, 3), jnp.float32) / np.sqrt(fan_in)
        b = 0.01 * jax.random.normal(kb, (cout,), jnp.float32)
        return w, b

    def lin_init(kw, kb, cout, cin):
        w = jax.random.normal(kw, (cout, cin), jnp.float32) / np.sqrt(cin)
        b = 0.01 * jax.random.normal(kb, (cout,), jnp.float32)
        return w, b

    p = {}
    p["w1"], p["b1"] = conv_init(ks[0], ks[1], 4, 1)
    p["w2"], p["b2"] = conv_init(ks[2], ks[3], 8, 4)
    p["w3"], p["b3"] = conv_init(ks[4], ks[5], 16, 8)
    p["w4"], p["b4"] = lin_init(ks[6], ks[7], 256, 7 * 7 * 16)
    p["w5"], p["b5"] = lin_init(ks[8], ks[9], 10, 256)
    return p


if __name__ == "__main__":
    # NOTE: softmax / sigmas / MI / cost / score in the module are never used
    # in forward(), so they are omitted here.
    key = jax.random.PRNGKey(0)
    kx, kp = jax.random.split(key)
    params = init_params(kp)

    fwd = jax.jit(functools.partial(cnn_hero_forward, a_type="relu"))

    # ---- small-batch path (bt=2, f32 MXU operands) -------------------------
    x_small = jax.random.normal(kx, (2, 1, 28, 28), jnp.float32)
    outs = jax.block_until_ready(fwd(x_small, params))
    refs = _ref_forward(x_small, params, a_type="relu")
    for o, r in zip(outs, refs):
        np.testing.assert_allclose(np.asarray(o), np.asarray(r),
                                   rtol=2e-2, atol=2e-2)

    # ---- large-batch path (bt=16, bf16 MXU operands, 2-step grid) -----------
    # Looser tolerance: explicit bf16 operands through the 5-layer chain vs the
    # (higher-precision) XLA reference.
    x_big = jax.random.normal(jax.random.PRNGKey(1), (32, 1, 28, 28), jnp.float32)
    outs_big = jax.block_until_ready(fwd(x_big, params))
    refs_big = _ref_forward(x_big, params, a_type="relu")
    for o, r in zip(outs_big, refs_big):
        np.testing.assert_allclose(np.asarray(o), np.asarray(r),
                                   rtol=5e-2, atol=5e-2)

    # ---- logits-only path (skips layer1-3 HBM writebacks entirely) ----------
    fwd_lite = jax.jit(functools.partial(cnn_hero_forward, a_type="relu",
                                         with_intermediates=False))
    l5, l4 = jax.block_until_ready(fwd_lite(x_big, params))
    np.testing.assert_allclose(np.asarray(l5), np.asarray(refs_big[0]),
                               rtol=5e-2, atol=5e-2)
    np.testing.assert_allclose(np.asarray(l4), np.asarray(refs_big[1]),
                               rtol=5e-2, atol=5e-2)

    print("KERNEL_OK")
</pallas_src>

<mosaic_0001>
module attributes {stable_mosaic.version = 11 : i64} {
  func.func @_fused_kernel(%arg0: i32, %arg1: memref<2x1x784xf32, #tpu.memory_space<vmem>>, %arg2: memref<8x18xf32, #tpu.memory_space<vmem>>, %arg3: memref<8x1xf32, #tpu.memory_space<vmem>>, %arg4: memref<16x72xf32, #tpu.memory_space<vmem>>, %arg5: memref<16x1xf32, #tpu.memory_space<vmem>>, %arg6: memref<32x144xf32, #tpu.memory_space<vmem>>, %arg7: memref<32x1xf32, #tpu.memory_space<vmem>>, %arg8: memref<784x196xf32, #tpu.memory_space<vmem>>, %arg9: memref<196x49xf32, #tpu.memory_space<vmem>>, %arg10: memref<32x32xf32, #tpu.memory_space<vmem>>, %arg11: memref<784x256xf32, #tpu.memory_space<vmem>>, %arg12: memref<1x256xf32, #tpu.memory_space<vmem>>, %arg13: memref<256x10xf32, #tpu.memory_space<vmem>>, %arg14: memref<1x10xf32, #tpu.memory_space<vmem>>, %arg15: memref<2x784xf32, #tpu.memory_space<vmem>>, %arg16: memref<2x196xf32, #tpu.memory_space<vmem>>, %arg17: memref<8x784xf32, #tpu.memory_space<vmem>>, %arg18: memref<16x784xf32, #tpu.memory_space<vmem>>, %arg19: memref<32x196xf32, #tpu.memory_space<vmem>>, %arg20: memref<2x1x256xf32, #tpu.memory_space<vmem>>, %arg21: memref<2x1x10xf32, #tpu.memory_space<vmem>>, %arg22: memref<2x848xf32, #tpu.memory_space<vmem>>, %arg23: memref<18x784xf32, #tpu.memory_space<vmem>>, %arg24: memref<8x848xf32, #tpu.memory_space<vmem>>, %arg25: memref<72x784xf32, #tpu.memory_space<vmem>>, %arg26: memref<16x816xf32, #tpu.memory_space<vmem>>, %arg27: memref<16x228xf32, #tpu.memory_space<vmem>>, %arg28: memref<144x196xf32, #tpu.memory_space<vmem>>, %arg29: memref<32x212xf32, #tpu.memory_space<vmem>>, %arg30: memref<2x784xf32, #tpu.memory_space<vmem>>) attributes {dimension_semantics = [#tpu.dimension_semantics<parallel>], iteration_bounds = array<i64: 1>, scalar_prefetch = 0 : i64, scratch_operands = 9 : i64, tpu.core_type = #tpu.core_type<tc>, window_params = [{transform_indices = @transform_0, window_bounds = array<i64: 2, 1, 784>}, {pipeline_mode = #tpu.pipeline_mode<synchronous>, transform_indices = @transform_1, window_bounds = array<i64: 8, 18>}, {pipeline_mode = #tpu.pipeline_mode<synchronous>, transform_indices = @transform_2, window_bounds = array<i64: 8, 1>}, {pipeline_mode = #tpu.pipeline_mode<synchronous>, transform_indices = @transform_3, window_bounds = array<i64: 16, 72>}, {pipeline_mode = #tpu.pipeline_mode<synchronous>, transform_indices = @transform_4, window_bounds = array<i64: 16, 1>}, {pipeline_mode = #tpu.pipeline_mode<synchronous>, transform_indices = @transform_5, window_bounds = array<i64: 32, 144>}, {pipeline_mode = #tpu.pipeline_mode<synchronous>, transform_indices = @transform_6, window_bounds = array<i64: 32, 1>}, {pipeline_mode = #tpu.pipeline_mode<synchronous>, transform_indices = @transform_7, window_bounds = array<i64: 784, 196>}, {pipeline_mode = #tpu.pipeline_mode<synchronous>, transform_indices = @transform_8, window_bounds = array<i64: 196, 49>}, {pipeline_mode = #tpu.pipeline_mode<synchronous>, transform_indices = @transform_9, window_bounds = array<i64: 32, 32>}, {pipeline_mode = #tpu.pipeline_mode<synchronous>, transform_indices = @transform_10, window_bounds = array<i64: 784, 256>}, {pipeline_mode = #tpu.pipeline_mode<synchronous>, transform_indices = @transform_11, window_bounds = array<i64: 1, 256>}, {pipeline_mode = #tpu.pipeline_mode<synchronous>, transform_indices = @transform_12, window_bounds = array<i64: 256, 10>}, {pipeline_mode = #tpu.pipeline_mode<synchronous>, transform_indices = @transform_13, window_bounds = array<i64: 1, 10>}, {pipeline_mode = #tpu.pipeline_mode<synchronous>, transform_indices = @transform_14, window_bounds = array<i64: 2, 784>}, {pipeline_mode = #tpu.pipeline_mode<synchronous>, transform_indices = @transform_15, window_bounds = array<i64: 2, 196>}, {transform_indices = @transform_16, window_bounds = array<i64: 8, 784>}, {transform_indices = @transform_17, window_bounds = array<i64: 16, 784>}, {transform_indices = @transform_18, window_bounds = array<i64: 32, 196>}, {transform_indices = @transform_19, window_bounds = array<i64: 2, 1, 256>}, {transform_indices = @transform_20, window_bounds = array<i64: 2, 1, 10>}]} {
    %cst = arith.constant 0.000000e+00 : f32
    %0 = vector.broadcast %cst : f32 to vector<2x32xf32>
    %c0 = arith.constant 0 : index
    %c0_0 = arith.constant 0 : index
    %1 = vector.load %arg22[%c0, %c0_0] : memref<2x848xf32, #tpu.memory_space<vmem>>, vector<2x32xf32>
    tpu.vector_store %arg22[%c0, %c0_0], %0 {strides = array<i32>} : memref<2x848xf32, #tpu.memory_space<vmem>>, vector<2x32xf32>,
    %c0_1 = arith.constant 0 : index
    %c816 = arith.constant 816 : index
    %2 = vector.load %arg22[%c0_1, %c816] : memref<2x848xf32, #tpu.memory_space<vmem>>, vector<2x32xf32>
    tpu.vector_store %arg22[%c0_1, %c816], %0 {strides = array<i32>} : memref<2x848xf32, #tpu.memory_space<vmem>>, vector<2x32xf32>,
    %c0_2 = arith.constant 0 : index
    %c0_3 = arith.constant 0 : index
    %c0_4 = arith.constant 0 : index
    %3 = vector.load %arg1[%c0_2, %c0_3, %c0_4] : memref<2x1x784xf32, #tpu.memory_space<vmem>>, vector<2x1x784xf32>
    %4 = vector.shape_cast %3 : vector<2x1x784xf32> to vector<2x784xf32>
    %c0_5 = arith.constant 0 : index
    %c32 = arith.constant 32 : index
    %5 = vector.load %arg22[%c0_5, %c32] : memref<2x848xf32, #tpu.memory_space<vmem>>, vector<2x784xf32>
    tpu.vector_store %arg22[%c0_5, %c32], %4 {strides = array<i32>} : memref<2x848xf32, #tpu.memory_space<vmem>>, vector<2x784xf32>,
    %c0_6 = arith.constant 0 : index
    %c0_7 = arith.constant 0 : index
    %6 = vector.load %arg15[%c0_6, %c0_7] : memref<2x784xf32, #tpu.memory_space<vmem>>, vector<1x784xf32>
    %c1 = arith.constant 1 : index
    %c0_8 = arith.constant 0 : index
    %7 = vector.load %arg15[%c1, %c0_8] : memref<2x784xf32, #tpu.memory_space<vmem>>, vector<1x784xf32>
    %c0_9 = arith.constant 0 : index
    %c3 = arith.constant 3 : index
    %8 = vector.load %arg22[%c0_9, %c3] : memref<2x848xf32, #tpu.memory_space<vmem>>, vector<2x784xf32>
    %9 = vector.broadcast %6 : vector<1x784xf32> to vector<2x784xf32>
    %10 = arith.mulf %8, %9 : vector<2x784xf32>
    %c0_10 = arith.constant 0 : index
    %c0_11 = arith.constant 0 : index
    %11 = vector.load %arg23[%c0_10, %c0_11] : memref<18x784xf32, #tpu.memory_space<vmem>>, vector<2x784xf32>
    tpu.vector_store %arg23[%c0_10, %c0_11], %10 {strides = array<i32>} : memref<18x784xf32, #tpu.memory_space<vmem>>, vector<2x784xf32>,
    %c0_12 = arith.constant 0 : index
    %c4 = arith.constant 4 : index
    %12 = vector.load %arg22[%c0_12, %c4] : memref<2x848xf32, #tpu.memory_space<vmem>>, vector<2x784xf32>
    %c2 = arith.constant 2 : index
    %c0_13 = arith.constant 0 : index
    %13 = vector.load %arg23[%c2, %c0_13] : memref<18x784xf32, #tpu.memory_space<vmem>>, vector<2x784xf32>
    tpu.vector_store %arg23[%c2, %c0_13], %12 {strides = array<i32>} : memref<18x784xf32, #tpu.memory_space<vmem>>, vector<2x784xf32>,
    %c0_14 = arith.constant 0 : index
    %c5 = arith.constant 5 : index
    %14 = vector.load %arg22[%c0_14, %c5] : memref<2x848xf32, #tpu.memory_space<vmem>>, vector<2x784xf32>
    %15 = vector.broadcast %7 : vector<1x784xf32> to vector<2x784xf32>
    %16 = arith.mulf %14, %15 : vector<2x784xf32>
    %c4_15 = arith.constant 4 : index
    %c0_16 = arith.constant 0 : index
    %17 = vector.load %arg23[%c4_15, %c0_16] : memref<18x784xf32, #tpu.memory_space<vmem>>, vector<2x784xf32>
    tpu.vector_store %arg23[%c4_15, %c0_16], %16 {strides = array<i32>} : memref<18x784xf32, #tpu.memory_space<vmem>>, vector<2x784xf32>,
    %c0_17 = arith.constant 0 : index
    %c31 = arith.constant 31 : index
    %18 = vector.load %arg22[%c0_17, %c31] : memref<2x848xf32, #tpu.memory_space<vmem>>, vector<2x784xf32>
    %19 = vector.broadcast %6 : vector<1x784xf32> to vector<2x784xf32>
    %20 = arith.mulf %18, %19 : vector<2x784xf32>
    %c6 = arith.constant 6 : index
    %c0_18 = arith.constant 0 : index
    %21 = vector.load %arg23[%c6, %c0_18] : memref<18x784xf32, #tpu.memory_space<vmem>>, vector<2x784xf32>
    tpu.vector_store %arg23[%c6, %c0_18], %20 {strides = array<i32>} : memref<18x784xf32, #tpu.memory_space<vmem>>, vector<2x784xf32>,
    %c0_19 = arith.constant 0 : index
    %c32_20 = arith.constant 32 : index
    %22 = vector.load %arg22[%c0_19, %c32_20] : memref<2x848xf32, #tpu.memory_space<vmem>>, vector<2x784xf32>
    %c8 = arith.constant 8 : index
    %c0_21 = arith.constant 0 : index
    %23 = vector.load %arg23[%c8, %c0_21] : memref<18x784xf32, #tpu.memory_space<vmem>>, vector<2x784xf32>
    tpu.vector_store %arg23[%c8, %c0_21], %22 {strides = array<i32>} : memref<18x784xf32, #tpu.memory_space<vmem>>, vector<2x784xf32>,
    %c0_22 = arith.constant 0 : index
    %c33 = arith.constant 33 : index
    %24 = vector.load %arg22[%c0_22, %c33] : memref<2x848xf32, #tpu.memory_space<vmem>>, vector<2x784xf32>
    %25 = vector.broadcast %7 : vector<1x784xf32> to vector<2x784xf32>
    %26 = arith.mulf %24, %25 : vector<2x784xf32>
    %c10 = arith.constant 10 : index
    %c0_23 = arith.constant 0 : index
    %27 = vector.load %arg23[%c10, %c0_23] : memref<18x784xf32, #tpu.memory_space<vmem>>, vector<2x784xf32>
    tpu.vector_store %arg23[%c10, %c0_23], %26 {strides = array<i32>} : memref<18x784xf32, #tpu.memory_space<vmem>>, vector<2x784xf32>,
    %c0_24 = arith.constant 0 : index
    %c59 = arith.constant 59 : index
    %28 = vector.load %arg22[%c0_24, %c59] : memref<2x848xf32, #tpu.memory_space<vmem>>, vector<2x784xf32>
    %29 = vector.broadcast %6 : vector<1x784xf32> to vector<2x784xf32>
    %30 = arith.mulf %28, %29 : vector<2x784xf32>
    %c12 = arith.constant 12 : index
    %c0_25 = arith.constant 0 : index
    %31 = vector.load %arg23[%c12, %c0_25] : memref<18x784xf32, #tpu.memory_space<vmem>>, vector<2x784xf32>
    tpu.vector_store %arg23[%c12, %c0_25], %30 {strides = array<i32>} : memref<18x784xf32, #tpu.memory_space<vmem>>, vector<2x784xf32>,
    %c0_26 = arith.constant 0 : index
    %c60 = arith.constant 60 : index
    %32 = vector.load %arg22[%c0_26, %c60] : memref<2x848xf32, #tpu.memory_space<vmem>>, vector<2x784xf32>
    %c14 = arith.constant 14 : index
    %c0_27 = arith.constant 0 : index
    %33 = vector.load %arg23[%c14, %c0_27] : memref<18x784xf32, #tpu.memory_space<vmem>>, vector<2x784xf32>
    tpu.vector_store %arg23[%c14, %c0_27], %32 {strides = array<i32>} : memref<18x784xf32, #tpu.memory_space<vmem>>, vector<2x784xf32>,
    %c0_28 = arith.constant 0 : index
    %c61 = arith.constant 61 : index
    %34 = vector.load %arg22[%c0_28, %c61] : memref<2x848xf32, #tpu.memory_space<vmem>>, vector<2x784xf32>
    %35 = vector.broadcast %7 : vector<1x784xf32> to vector<2x784xf32>
    %36 = arith.mulf %34, %35 : vector<2x784xf32>
    %c16 = arith.constant 16 : index
    %c0_29 = arith.constant 0 : index
    %37 = vector.load %arg23[%c16, %c0_29] : memref<18x784xf32, #tpu.memory_space<vmem>>, vector<2x784xf32>
    tpu.vector_store %arg23[%c16, %c0_29], %36 {strides = array<i32>} : memref<18x784xf32, #tpu.memory_space<vmem>>, vector<2x784xf32>,
    %c0_30 = arith.constant 0 : index
    %c0_31 = arith.constant 0 : index
    %38 = vector.load %arg2[%c0_30, %c0_31] : memref<8x18xf32, #tpu.memory_space<vmem>>, vector<8x18xf32>
    %c0_32 = arith.constant 0 : index
    %c0_33 = arith.constant 0 : index
    %39 = vector.load %arg23[%c0_32, %c0_33] : memref<18x784xf32, #tpu.memory_space<vmem>>, vector<18x784xf32>
    %cst_34 = arith.constant dense<0.000000e+00> : vector<8x784xf32>
    %40 = tpu.matmul %38, %39, %cst_34 {dimension_numbers = #tpu.dot_dimension_numbers<[1], [0], [0], [1], [0, 0, 1, 1], [], []>} : vector<8x18xf32>, vector<18x784xf32>, vector<8x784xf32> -> vector<8x784xf32>
    %c0_35 = arith.constant 0 : index
    %c0_36 = arith.constant 0 : index
    %41 = vector.load %arg3[%c0_35, %c0_36] : memref<8x1xf32, #tpu.memory_space<vmem>>, vector<8x1xf32>
    %42 = vector.broadcast %41 : vector<8x1xf32> to vector<8x784xf32>
    %43 = arith.addf %40, %42 : vector<8x784xf32>
    %cst_37 = arith.constant 0.000000e+00 : f32
    %44 = vector.broadcast %cst_37 : f32 to vector<8x784xf32>
    %45 = arith.maximumf %43, %44 : vector<8x784xf32>
    %c0_38 = arith.constant 0 : index
    %c0_39 = arith.constant 0 : index
    %46 = vector.load %arg17[%c0_38, %c0_39] : memref<8x784xf32, #tpu.memory_space<vmem>>, vector<8x784xf32>
    tpu.vector_store %arg17[%c0_38, %c0_39], %45 {strides = array<i32>} : memref<8x784xf32, #tpu.memory_space<vmem>>, vector<8x784xf32>,
    %cst_40 = arith.constant 0.000000e+00 : f32
    %47 = vector.broadcast %cst_40 : f32 to vector<8x32xf32>
    %c0_41 = arith.constant 0 : index
    %c0_42 = arith.constant 0 : index
    %48 = vector.load %arg24[%c0_41, %c0_42] : memref<8x848xf32, #tpu.memory_space<vmem>>, vector<8x32xf32>
    tpu.vector_store %arg24[%c0_41, %c0_42], %47 {strides = array<i32>} : memref<8x848xf32, #tpu.memory_space<vmem>>, vector<8x32xf32>,
    %c0_43 = arith.constant 0 : index
    %c816_44 = arith.constant 816 : index
    %49 = vector.load %arg24[%c0_43, %c816_44] : memref<8x848xf32, #tpu.memory_space<vmem>>, vector<8x32xf32>
    tpu.vector_store %arg24[%c0_43, %c816_44], %47 {strides = array<i32>} : memref<8x848xf32, #tpu.memory_space<vmem>>, vector<8x32xf32>,
    %c0_45 = arith.constant 0 : index
    %c32_46 = arith.constant 32 : index
    %50 = vector.load %arg24[%c0_45, %c32_46] : memref<8x848xf32, #tpu.memory_space<vmem>>, vector<8x784xf32>
    tpu.vector_store %arg24[%c0_45, %c32_46], %45 {strides = array<i32>} : memref<8x848xf32, #tpu.memory_space<vmem>>, vector<8x784xf32>,
    %c0_47 = arith.constant 0 : index
    %c0_48 = arith.constant 0 : index
    %51 = vector.load %arg15[%c0_47, %c0_48] : memref<2x784xf32, #tpu.memory_space<vmem>>, vector<1x784xf32>
    %c1_49 = arith.constant 1 : index
    %c0_50 = arith.constant 0 : index
    %52 = vector.load %arg15[%c1_49, %c0_50] : memref<2x784xf32, #tpu.memory_space<vmem>>, vector<1x784xf32>
    %c0_51 = arith.constant 0 : index
    %c3_52 = arith.constant 3 : index
    %53 = vector.load %arg24[%c0_51, %c3_52] : memref<8x848xf32, #tpu.memory_space<vmem>>, vector<8x784xf32>
    %54 = vector.broadcast %51 : vector<1x784xf32> to vector<8x784xf32>
    %55 = arith.mulf %53, %54 : vector<8x784xf32>
    %c0_53 = arith.constant 0 : index
    %c0_54 = arith.constant 0 : index
    %56 = vector.load %arg25[%c0_53, %c0_54] : memref<72x784xf32, #tpu.memory_space<vmem>>, vector<8x784xf32>
    tpu.vector_store %arg25[%c0_53, %c0_54], %55 {strides = array<i32>} : memref<72x784xf32, #tpu.memory_space<vmem>>, vector<8x784xf32>,
    %c0_55 = arith.constant 0 : index
    %c4_56 = arith.constant 4 : index
    %57 = vector.load %arg24[%c0_55, %c4_56] : memref<8x848xf32, #tpu.memory_space<vmem>>, vector<8x784xf32>
    %c8_57 = arith.constant 8 : index
    %c0_58 = arith.constant 0 : index
    %58 = vector.load %arg25[%c8_57, %c0_58] : memref<72x784xf32, #tpu.memory_space<vmem>>, vector<8x784xf32>
    tpu.vector_store %arg25[%c8_57, %c0_58], %57 {strides = array<i32>} : memref<72x784xf32, #tpu.memory_space<vmem>>, vector<8x784xf32>,
    %c0_59 = arith.constant 0 : index
    %c5_60 = arith.constant 5 : index
    %59 = vector.load %arg24[%c0_59, %c5_60] : memref<8x848xf32, #tpu.memory_space<vmem>>, vector<8x784xf32>
    %60 = vector.broadcast %52 : vector<1x784xf32> to vector<8x784xf32>
    %61 = arith.mulf %59, %60 : vector<8x784xf32>
    %c16_61 = arith.constant 16 : index
    %c0_62 = arith.constant 0 : index
    %62 = vector.load %arg25[%c16_61, %c0_62] : memref<72x784xf32, #tpu.memory_space<vmem>>, vector<8x784xf32>
    tpu.vector_store %arg25[%c16_61, %c0_62], %61 {strides = array<i32>} : memref<72x784xf32, #tpu.memory_space<vmem>>, vector<8x784xf32>,
    %c0_63 = arith.constant 0 : index
    %c31_64 = arith.constant 31 : index
    %63 = vector.load %arg24[%c0_63, %c31_64] : memref<8x848xf32, #tpu.memory_space<vmem>>, vector<8x784xf32>
    %64 = vector.broadcast %51 : vector<1x784xf32> to vector<8x784xf32>
    %65 = arith.mulf %63, %64 : vector<8x784xf32>
    %c24 = arith.constant 24 : index
    %c0_65 = arith.constant 0 : index
    %66 = vector.load %arg25[%c24, %c0_65] : memref<72x784xf32, #tpu.memory_space<vmem>>, vector<8x784xf32>
    tpu.vector_store %arg25[%c24, %c0_65], %65 {strides = array<i32>} : memref<72x784xf32, #tpu.memory_space<vmem>>, vector<8x784xf32>,
    %c0_66 = arith.constant 0 : index
    %c32_67 = arith.constant 32 : index
    %67 = vector.load %arg24[%c0_66, %c32_67] : memref<8x848xf32, #tpu.memory_space<vmem>>, vector<8x784xf32>
    %c32_68 = arith.constant 32 : index
    %c0_69 = arith.constant 0 : index
    %68 = vector.load %arg25[%c32_68, %c0_69] : memref<72x784xf32, #tpu.memory_space<vmem>>, vector<8x784xf32>
    tpu.vector_store %arg25[%c32_68, %c0_69], %67 {strides = array<i32>} : memref<72x784xf32, #tpu.memory_space<vmem>>, vector<8x784xf32>,
    %c0_70 = arith.constant 0 : index
    %c33_71 = arith.constant 33 : index
    %69 = vector.load %arg24[%c0_70, %c33_71] : memref<8x848xf32, #tpu.memory_space<vmem>>, vector<8x784xf32>
    %70 = vector.broadcast %52 : vector<1x784xf32> to vector<8x784xf32>
    %71 = arith.mulf %69, %70 : vector<8x784xf32>
    %c40 = arith.constant 40 : index
    %c0_72 = arith.constant 0 : index
    %72 = vector.load %arg25[%c40, %c0_72] : memref<72x784xf32, #tpu.memory_space<vmem>>, vector<8x784xf32>
    tpu.vector_store %arg25[%c40, %c0_72], %71 {strides = array<i32>} : memref<72x784xf32, #tpu.memory_space<vmem>>, vector<8x784xf32>,
    %c0_73 = arith.constant 0 : index
    %c59_74 = arith.constant 59 : index
    %73 = vector.load %arg24[%c0_73, %c59_74] : memref<8x848xf32, #tpu.memory_space<vmem>>, vector<8x784xf32>
    %74 = vector.broadcast %51 : vector<1x784xf32> to vector<8x784xf32>
    %75 = arith.mulf %73, %74 : vector<8x784xf32>
    %c48 = arith.constant 48 : index
    %c0_75 = arith.constant 0 : index
    %76 = vector.load %arg25[%c48, %c0_75] : memref<72x784xf32, #tpu.memory_space<vmem>>, vector<8x784xf32>
    tpu.vector_store %arg25[%c48, %c0_75], %75 {strides = array<i32>} : memref<72x784xf32, #tpu.memory_space<vmem>>, vector<8x784xf32>,
    %c0_76 = arith.constant 0 : index
    %c60_77 = arith.constant 60 : index
    %77 = vector.load %arg24[%c0_76, %c60_77] : memref<8x848xf32, #tpu.memory_space<vmem>>, vector<8x784xf32>
    %c56 = arith.constant 56 : index
    %c0_78 = arith.constant 0 : index
    %78 = vector.load %arg25[%c56, %c0_78] : memref<72x784xf32, #tpu.memory_space<vmem>>, vector<8x784xf32>
    tpu.vector_store %arg25[%c56, %c0_78], %77 {strides = array<i32>} : memref<72x784xf32, #tpu.memory_space<vmem>>, vector<8x784xf32>,
    %c0_79 = arith.constant 0 : index
    %c61_80 = arith.constant 61 : index
    %79 = vector.load %arg24[%c0_79, %c61_80] : memref<8x848xf32, #tpu.memory_space<vmem>>, vector<8x784xf32>
    %80 = vector.broadcast %52 : vector<1x784xf32> to vector<8x784xf32>
    %81 = arith.mulf %79, %80 : vector<8x784xf32>
    %c64 = arith.constant 64 : index
    %c0_81 = arith.constant 0 : index
    %82 = vector.load %arg25[%c64, %c0_81] : memref<72x784xf32, #tpu.memory_space<vmem>>, vector<8x784xf32>
    tpu.vector_store %arg25[%c64, %c0_81], %81 {strides = array<i32>} : memref<72x784xf32, #tpu.memory_space<vmem>>, vector<8x784xf32>,
    %c0_82 = arith.constant 0 : index
    %c0_83 = arith.constant 0 : index
    %83 = vector.load %arg4[%c0_82, %c0_83] : memref<16x72xf32, #tpu.memory_space<vmem>>, vector<16x72xf32>
    %c0_84 = arith.constant 0 : index
    %c0_85 = arith.constant 0 : index
    %84 = vector.load %arg25[%c0_84, %c0_85] : memref<72x784xf32, #tpu.memory_space<vmem>>, vector<72x784xf32>
    %cst_86 = arith.constant dense<0.000000e+00> : vector<16x784xf32>
    %85 = tpu.matmul %83, %84, %cst_86 {dimension_numbers = #tpu.dot_dimension_numbers<[1], [0], [0], [1], [0, 0, 1, 1], [], []>} : vector<16x72xf32>, vector<72x784xf32>, vector<16x784xf32> -> vector<16x784xf32>
    %c0_87 = arith.constant 0 : index
    %c0_88 = arith.constant 0 : index
    %86 = vector.load %arg5[%c0_87, %c0_88] : memref<16x1xf32, #tpu.memory_space<vmem>>, vector<16x1xf32>
    %87 = vector.broadcast %86 : vector<16x1xf32> to vector<16x784xf32>
    %88 = arith.addf %85, %87 : vector<16x784xf32>
    %cst_89 = arith.constant 0.000000e+00 : f32
    %89 = vector.broadcast %cst_89 : f32 to vector<16x784xf32>
    %90 = arith.maximumf %88, %89 : vector<16x784xf32>
    %c0_90 = arith.constant 0 : index
    %c0_91 = arith.constant 0 : index
    %91 = vector.load %arg18[%c0_90, %c0_91] : memref<16x784xf32, #tpu.memory_space<vmem>>, vector<16x784xf32>
    tpu.vector_store %arg18[%c0_90, %c0_91], %90 {strides = array<i32>} : memref<16x784xf32, #tpu.memory_space<vmem>>, vector<16x784xf32>,
    %cst_92 = arith.constant 0.000000e+00 : f32
    %92 = vector.broadcast %cst_92 : f32 to vector<16x32xf32>
    %c0_93 = arith.constant 0 : index
    %c784 = arith.constant 784 : index
    %93 = vector.load %arg26[%c0_93, %c784] : memref<16x816xf32, #tpu.memory_space<vmem>>, vector<16x32xf32>
    tpu.vector_store %arg26[%c0_93, %c784], %92 {strides = array<i32>} : memref<16x816xf32, #tpu.memory_space<vmem>>, vector<16x32xf32>,
    %c0_94 = arith.constant 0 : index
    %c0_95 = arith.constant 0 : index
    %94 = vector.load %arg26[%c0_94, %c0_95] : memref<16x816xf32, #tpu.memory_space<vmem>>, vector<16x784xf32>
    tpu.vector_store %arg26[%c0_94, %c0_95], %90 {strides = array<i32>} : memref<16x816xf32, #tpu.memory_space<vmem>>, vector<16x784xf32>,
    %c0_96 = arith.constant 0 : index
    %c1_97 = arith.constant 1 : index
    %95 = vector.load %arg26[%c0_96, %c1_97] : memref<16x816xf32, #tpu.memory_space<vmem>>, vector<16x784xf32>
    %96 = arith.maximumf %90, %95 : vector<16x784xf32>
    %c0_98 = arith.constant 0 : index
    %c28 = arith.constant 28 : index
    %97 = vector.load %arg26[%c0_98, %c28] : memref<16x816xf32, #tpu.memory_space<vmem>>, vector<16x784xf32>
    %c0_99 = arith.constant 0 : index
    %c29 = arith.constant 29 : index
    %98 = vector.load %arg26[%c0_99, %c29] : memref<16x816xf32, #tpu.memory_space<vmem>>, vector<16x784xf32>
    %99 = arith.maximumf %97, %98 : vector<16x784xf32>
    %100 = arith.maximumf %96, %99 : vector<16x784xf32>
    %cst_100 = arith.constant 0.000000e+00 : f32
    %101 = vector.broadcast %cst_100 : f32 to vector<16x16xf32>
    %c0_101 = arith.constant 0 : index
    %c0_102 = arith.constant 0 : index
    %102 = vector.load %arg27[%c0_101, %c0_102] : memref<16x228xf32, #tpu.memory_space<vmem>>, vector<16x16xf32>
    tpu.vector_store %arg27[%c0_101, %c0_102], %101 {strides = array<i32>} : memref<16x228xf32, #tpu.memory_space<vmem>>, vector<16x16xf32>,
    %c0_103 = arith.constant 0 : index
    %c212 = arith.constant 212 : index
    %103 = vector.load %arg27[%c0_103, %c212] : memref<16x228xf32, #tpu.memory_space<vmem>>, vector<16x16xf32>
    tpu.vector_store %arg27[%c0_103, %c212], %101 {strides = array<i32>} : memref<16x228xf32, #tpu.memory_space<vmem>>, vector<16x16xf32>,
    %c0_104 = arith.constant 0 : index
    %c0_105 = arith.constant 0 : index
    %104 = vector.load %arg8[%c0_104, %c0_105] : memref<784x196xf32, #tpu.memory_space<vmem>>, vector<784x196xf32>
    %cst_106 = arith.constant dense<0.000000e+00> : vector<16x196xf32>
    %105 = tpu.matmul %100, %104, %cst_106 {dimension_numbers = #tpu.dot_dimension_numbers<[1], [0], [0], [1], [0, 0, 1, 1], [], []>} : vector<16x784xf32>, vector<784x196xf32>, vector<16x196xf32> -> vector<16x196xf32>
    %c0_107 = arith.constant 0 : index
    %c16_108 = arith.constant 16 : index
    %106 = vector.load %arg27[%c0_107, %c16_108] : memref<16x228xf32, #tpu.memory_space<vmem>>, vector<16x196xf32>
    tpu.vector_store %arg27[%c0_107, %c16_108], %105 {strides = array<i32>} : memref<16x228xf32, #tpu.memory_space<vmem>>, vector<16x196xf32>,
    %c0_109 = arith.constant 0 : index
    %c0_110 = arith.constant 0 : index
    %107 = vector.load %arg16[%c0_109, %c0_110] : memref<2x196xf32, #tpu.memory_space<vmem>>, vector<1x196xf32>
    %c1_111 = arith.constant 1 : index
    %c0_112 = arith.constant 0 : index
    %108 = vector.load %arg16[%c1_111, %c0_112] : memref<2x196xf32, #tpu.memory_space<vmem>>, vector<1x196xf32>
    %c0_113 = arith.constant 0 : index
    %c1_114 = arith.constant 1 : index
    %109 = vector.load %arg27[%c0_113, %c1_114] : memref<16x228xf32, #tpu.memory_space<vmem>>, vector<16x196xf32>
    %110 = vector.broadcast %107 : vector<1x196xf32> to vector<16x196xf32>
    %111 = arith.mulf %109, %110 : vector<16x196xf32>
    %c0_115 = arith.constant 0 : index
    %c0_116 = arith.constant 0 : index
    %112 = vector.load %arg28[%c0_115, %c0_116] : memref<144x196xf32, #tpu.memory_space<vmem>>, vector<16x196xf32>
    tpu.vector_store %arg28[%c0_115, %c0_116], %111 {strides = array<i32>} : memref<144x196xf32, #tpu.memory_space<vmem>>, vector<16x196xf32>,
    %c0_117 = arith.constant 0 : index
    %c2_118 = arith.constant 2 : index
    %113 = vector.load %arg27[%c0_117, %c2_118] : memref<16x228xf32, #tpu.memory_space<vmem>>, vector<16x196xf32>
    %c16_119 = arith.constant 16 : index
    %c0_120 = arith.constant 0 : index
    %114 = vector.load %arg28[%c16_119, %c0_120] : memref<144x196xf32, #tpu.memory_space<vmem>>, vector<16x196xf32>
    tpu.vector_store %arg28[%c16_119, %c0_120], %113 {strides = array<i32>} : memref<144x196xf32, #tpu.memory_space<vmem>>, vector<16x196xf32>,
    %c0_121 = arith.constant 0 : index
    %c3_122 = arith.constant 3 : index
    %115 = vector.load %arg27[%c0_121, %c3_122] : memref<16x228xf32, #tpu.memory_space<vmem>>, vector<16x196xf32>
    %116 = vector.broadcast %108 : vector<1x196xf32> to vector<16x196xf32>
    %117 = arith.mulf %115, %116 : vector<16x196xf32>
    %c32_123 = arith.constant 32 : index
    %c0_124 = arith.constant 0 : index
    %118 = vector.load %arg28[%c32_123, %c0_124] : memref<144x196xf32, #tpu.memory_space<vmem>>, vector<16x196xf32>
    tpu.vector_store %arg28[%c32_123, %c0_124], %117 {strides = array<i32>} : memref<144x196xf32, #tpu.memory_space<vmem>>, vector<16x196xf32>,
    %c0_125 = arith.constant 0 : index
    %c15 = arith.constant 15 : index
    %119 = vector.load %arg27[%c0_125, %c15] : memref<16x228xf32, #tpu.memory_space<vmem>>, vector<16x196xf32>
    %120 = vector.broadcast %107 : vector<1x196xf32> to vector<16x196xf32>
    %121 = arith.mulf %119, %120 : vector<16x196xf32>
    %c48_126 = arith.constant 48 : index
    %c0_127 = arith.constant 0 : index
    %122 = vector.load %arg28[%c48_126, %c0_127] : memref<144x196xf32, #tpu.memory_space<vmem>>, vector<16x196xf32>
    tpu.vector_store %arg28[%c48_126, %c0_127], %121 {strides = array<i32>} : memref<144x196xf32, #tpu.memory_space<vmem>>, vector<16x196xf32>,
    %c0_128 = arith.constant 0 : index
    %c16_129 = arith.constant 16 : index
    %123 = vector.load %arg27[%c0_128, %c16_129] : memref<16x228xf32, #tpu.memory_space<vmem>>, vector<16x196xf32>
    %c64_130 = arith.constant 64 : index
    %c0_131 = arith.constant 0 : index
    %124 = vector.load %arg28[%c64_130, %c0_131] : memref<144x196xf32, #tpu.memory_space<vmem>>, vector<16x196xf32>
    tpu.vector_store %arg28[%c64_130, %c0_131], %123 {strides = array<i32>} : memref<144x196xf32, #tpu.memory_space<vmem>>, vector<16x196xf32>,
    %c0_132 = arith.constant 0 : index
    %c17 = arith.constant 17 : index
    %125 = vector.load %arg27[%c0_132, %c17] : memref<16x228xf32, #tpu.memory_space<vmem>>, vector<16x196xf32>
    %126 = vector.broadcast %108 : vector<1x196xf32> to vector<16x196xf32>
    %127 = arith.mulf %125, %126 : vector<16x196xf32>
    %c80 = arith.constant 80 : index
    %c0_133 = arith.constant 0 : index
    %128 = vector.load %arg28[%c80, %c0_133] : memref<144x196xf32, #tpu.memory_space<vmem>>, vector<16x196xf32>
    tpu.vector_store %arg28[%c80, %c0_133], %127 {strides = array<i32>} : memref<144x196xf32, #tpu.memory_space<vmem>>, vector<16x196xf32>,
    %c0_134 = arith.constant 0 : index
    %c29_135 = arith.constant 29 : index
    %129 = vector.load %arg27[%c0_134, %c29_135] : memref<16x228xf32, #tpu.memory_space<vmem>>, vector<16x196xf32>
    %130 = vector.broadcast %107 : vector<1x196xf32> to vector<16x196xf32>
    %131 = arith.mulf %129, %130 : vector<16x196xf32>
    %c96 = arith.constant 96 : index
    %c0_136 = arith.constant 0 : index
    %132 = vector.load %arg28[%c96, %c0_136] : memref<144x196xf32, #tpu.memory_space<vmem>>, vector<16x196xf32>
    tpu.vector_store %arg28[%c96, %c0_136], %131 {strides = array<i32>} : memref<144x196xf32, #tpu.memory_space<vmem>>, vector<16x196xf32>,
    %c0_137 = arith.constant 0 : index
    %c30 = arith.constant 30 : index
    %133 = vector.load %arg27[%c0_137, %c30] : memref<16x228xf32, #tpu.memory_space<vmem>>, vector<16x196xf32>
    %c112 = arith.constant 112 : index
    %c0_138 = arith.constant 0 : index
    %134 = vector.load %arg28[%c112, %c0_138] : memref<144x196xf32, #tpu.memory_space<vmem>>, vector<16x196xf32>
    tpu.vector_store %arg28[%c112, %c0_138], %133 {strides = array<i32>} : memref<144x196xf32, #tpu.memory_space<vmem>>, vector<16x196xf32>,
    %c0_139 = arith.constant 0 : index
    %c31_140 = arith.constant 31 : index
    %135 = vector.load %arg27[%c0_139, %c31_140] : memref<16x228xf32, #tpu.memory_space<vmem>>, vector<16x196xf32>
    %136 = vector.broadcast %108 : vector<1x196xf32> to vector<16x196xf32>
    %137 = arith.mulf %135, %136 : vector<16x196xf32>
    %c128 = arith.constant 128 : index
    %c0_141 = arith.constant 0 : index
    %138 = vector.load %arg28[%c128, %c0_141] : memref<144x196xf32, #tpu.memory_space<vmem>>, vector<16x196xf32>
    tpu.vector_store %arg28[%c128, %c0_141], %137 {strides = array<i32>} : memref<144x196xf32, #tpu.memory_space<vmem>>, vector<16x196xf32>,
    %c0_142 = arith.constant 0 : index
    %c0_143 = arith.constant 0 : index
    %139 = vector.load %arg6[%c0_142, %c0_143] : memref<32x144xf32, #tpu.memory_space<vmem>>, vector<32x144xf32>
    %c0_144 = arith.constant 0 : index
    %c0_145 = arith.constant 0 : index
    %140 = vector.load %arg28[%c0_144, %c0_145] : memref<144x196xf32, #tpu.memory_space<vmem>>, vector<144x196xf32>
    %cst_146 = arith.constant dense<0.000000e+00> : vector<32x196xf32>
    %141 = tpu.matmul %139, %140, %cst_146 {dimension_numbers = #tpu.dot_dimension_numbers<[1], [0], [0], [1], [0, 0, 1, 1], [], []>} : vector<32x144xf32>, vector<144x196xf32>, vector<32x196xf32> -> vector<32x196xf32>
    %c0_147 = arith.constant 0 : index
    %c0_148 = arith.constant 0 : index
    %142 = vector.load %arg7[%c0_147, %c0_148] : memref<32x1xf32, #tpu.memory_space<vmem>>, vector<32x1xf32>
    %143 = vector.broadcast %142 : vector<32x1xf32> to vector<32x196xf32>
    %144 = arith.addf %141, %143 : vector<32x196xf32>
    %cst_149 = arith.constant 0.000000e+00 : f32
    %145 = vector.broadcast %cst_149 : f32 to vector<32x196xf32>
    %146 = arith.maximumf %144, %145 : vector<32x196xf32>
    %c0_150 = arith.constant 0 : index
    %c0_151 = arith.constant 0 : index
    %147 = vector.load %arg19[%c0_150, %c0_151] : memref<32x196xf32, #tpu.memory_space<vmem>>, vector<32x196xf32>
    tpu.vector_store %arg19[%c0_150, %c0_151], %146 {strides = array<i32>} : memref<32x196xf32, #tpu.memory_space<vmem>>, vector<32x196xf32>,
    %cst_152 = arith.constant 0.000000e+00 : f32
    %148 = vector.broadcast %cst_152 : f32 to vector<32x16xf32>
    %c0_153 = arith.constant 0 : index
    %c196 = arith.constant 196 : index
    %149 = vector.load %arg29[%c0_153, %c196] : memref<32x212xf32, #tpu.memory_space<vmem>>, vector<32x16xf32>
    tpu.vector_store %arg29[%c0_153, %c196], %148 {strides = array<i32>} : memref<32x212xf32, #tpu.memory_space<vmem>>, vector<32x16xf32>,
    %c0_154 = arith.constant 0 : index
    %c0_155 = arith.constant 0 : index
    %150 = vector.load %arg29[%c0_154, %c0_155] : memref<32x212xf32, #tpu.memory_space<vmem>>, vector<32x196xf32>
    tpu.vector_store %arg29[%c0_154, %c0_155], %146 {strides = array<i32>} : memref<32x212xf32, #tpu.memory_space<vmem>>, vector<32x196xf32>,
    %c0_156 = arith.constant 0 : index
    %c1_157 = arith.constant 1 : index
    %151 = vector.load %arg29[%c0_156, %c1_157] : memref<32x212xf32, #tpu.memory_space<vmem>>, vector<32x196xf32>
    %152 = arith.maximumf %146, %151 : vector<32x196xf32>
    %c0_158 = arith.constant 0 : index
    %c14_159 = arith.constant 14 : index
    %153 = vector.load %arg29[%c0_158, %c14_159] : memref<32x212xf32, #tpu.memory_space<vmem>>, vector<32x196xf32>
    %c0_160 = arith.constant 0 : index
    %c15_161 = arith.constant 15 : index
    %154 = vector.load %arg29[%c0_160, %c15_161] : memref<32x212xf32, #tpu.memory_space<vmem>>, vector<32x196xf32>
    %155 = arith.maximumf %153, %154 : vector<32x196xf32>
    %156 = arith.maximumf %152, %155 : vector<32x196xf32>
    %c0_162 = arith.constant 0 : index
    %c0_163 = arith.constant 0 : index
    %157 = vector.load %arg9[%c0_162, %c0_163] : memref<196x49xf32, #tpu.memory_space<vmem>>, vector<196x49xf32>
    %cst_164 = arith.constant dense<0.000000e+00> : vector<32x49xf32>
    %158 = tpu.matmul %156, %157, %cst_164 {dimension_numbers = #tpu.dot_dimension_numbers<[1], [0], [0], [1], [0, 0, 1, 1], [], []>} : vector<32x196xf32>, vector<196x49xf32>, vector<32x49xf32> -> vector<32x49xf32>
    %c0_165 = arith.constant 0 : index
    %c0_166 = arith.constant 0 : index
    %159 = vector.load %arg10[%c0_165, %c0_166] : memref<32x32xf32, #tpu.memory_space<vmem>>, vector<32x32xf32>
    %cst_167 = arith.constant dense<0.000000e+00> : vector<32x49xf32>
    %160 = tpu.matmul %159, %158, %cst_167 {dimension_numbers = #tpu.dot_dimension_numbers<[1], [0], [0], [1], [0, 0, 1, 1], [], []>} : vector<32x32xf32>, vector<32x49xf32>, vector<32x49xf32> -> vector<32x49xf32>
    %161 = vector.extract_strided_slice %160 {offsets = [0, 0], sizes = [2, 49], strides = [1, 1]} : vector<32x49xf32> to vector<2x49xf32>
    %c0_168 = arith.constant 0 : index
    %c0_169 = arith.constant 0 : index
    %162 = vector.load %arg30[%c0_168, %c0_169] : memref<2x784xf32, #tpu.memory_space<vmem>>, vector<2x49xf32>
    tpu.vector_store %arg30[%c0_168, %c0_169], %161 {strides = array<i32>} : memref<2x784xf32, #tpu.memory_space<vmem>>, vector<2x49xf32>,
    %163 = vector.extract_strided_slice %160 {offsets = [2, 0], sizes = [2, 49], strides = [1, 1]} : vector<32x49xf32> to vector<2x49xf32>
    %c0_170 = arith.constant 0 : index
    %c49 = arith.constant 49 : index
    %164 = vector.load %arg30[%c0_170, %c49] : memref<2x784xf32, #tpu.memory_space<vmem>>, vector<2x49xf32>
    tpu.vector_store %arg30[%c0_170, %c49], %163 {strides = array<i32>} : memref<2x784xf32, #tpu.memory_space<vmem>>, vector<2x49xf32>,
    %165 = vector.extract_strided_slice %160 {offsets = [4, 0], sizes = [2, 49], strides = [1, 1]} : vector<32x49xf32> to vector<2x49xf32>
    %c0_171 = arith.constant 0 : index
    %c98 = arith.constant 98 : index
    %166 = vector.load %arg30[%c0_171, %c98] : memref<2x784xf32, #tpu.memory_space<vmem>>, vector<2x49xf32>
    tpu.vector_store %arg30[%c0_171, %c98], %165 {strides = array<i32>} : memref<2x784xf32, #tpu.memory_space<vmem>>, vector<2x49xf32>,
    %167 = vector.extract_strided_slice %160 {offsets = [6, 0], sizes = [2, 49], strides = [1, 1]} : vector<32x49xf32> to vector<2x49xf32>
    %c0_172 = arith.constant 0 : index
    %c147 = arith.constant 147 : index
    %168 = vector.load %arg30[%c0_172, %c147] : memref<2x784xf32, #tpu.memory_space<vmem>>, vector<2x49xf32>
    tpu.vector_store %arg30[%c0_172, %c147], %167 {strides = array<i32>} : memref<2x784xf32, #tpu.memory_space<vmem>>, vector<2x49xf32>,
    %169 = vector.extract_strided_slice %160 {offsets = [8, 0], sizes = [2, 49], strides = [1, 1]} : vector<32x49xf32> to vector<2x49xf32>
    %c0_173 = arith.constant 0 : index
    %c196_174 = arith.constant 196 : index
    %170 = vector.load %arg30[%c0_173, %c196_174] : memref<2x784xf32, #tpu.memory_space<vmem>>, vector<2x49xf32>
    tpu.vector_store %arg30[%c0_173, %c196_174], %169 {strides = array<i32>} : memref<2x784xf32, #tpu.memory_space<vmem>>, vector<2x49xf32>,
    %171 = vector.extract_strided_slice %160 {offsets = [10, 0], sizes = [2, 49], strides = [1, 1]} : vector<32x49xf32> to vector<2x49xf32>
    %c0_175 = arith.constant 0 : index
    %c245 = arith.constant 245 : index
    %172 = vector.load %arg30[%c0_175, %c245] : memref<2x784xf32, #tpu.memory_space<vmem>>, vector<2x49xf32>
    tpu.vector_store %arg30[%c0_175, %c245], %171 {strides = array<i32>} : memref<2x784xf32, #tpu.memory_space<vmem>>, vector<2x49xf32>,
    %173 = vector.extract_strided_slice %160 {offsets = [12, 0], sizes = [2, 49], strides = [1, 1]} : vector<32x49xf32> to vector<2x49xf32>
    %c0_176 = arith.constant 0 : index
    %c294 = arith.constant 294 : index
    %174 = vector.load %arg30[%c0_176, %c294] : memref<2x784xf32, #tpu.memory_space<vmem>>, vector<2x49xf32>
    tpu.vector_store %arg30[%c0_176, %c294], %173 {strides = array<i32>} : memref<2x784xf32, #tpu.memory_space<vmem>>, vector<2x49xf32>,
    %175 = vector.extract_strided_slice %160 {offsets = [14, 0], sizes = [2, 49], strides = [1, 1]} : vector<32x49xf32> to vector<2x49xf32>
    %c0_177 = arith.constant 0 : index
    %c343 = arith.constant 343 : index
    %176 = vector.load %arg30[%c0_177, %c343] : memref<2x784xf32, #tpu.memory_space<vmem>>, vector<2x49xf32>
    tpu.vector_store %arg30[%c0_177, %c343], %175 {strides = array<i32>} : memref<2x784xf32, #tpu.memory_space<vmem>>, vector<2x49xf32>,
    %177 = vector.extract_strided_slice %160 {offsets = [16, 0], sizes = [2, 49], strides = [1, 1]} : vector<32x49xf32> to vector<2x49xf32>
    %c0_178 = arith.constant 0 : index
    %c392 = arith.constant 392 : index
    %178 = vector.load %arg30[%c0_178, %c392] : memref<2x784xf32, #tpu.memory_space<vmem>>, vector<2x49xf32>
    tpu.vector_store %arg30[%c0_178, %c392], %177 {strides = array<i32>} : memref<2x784xf32, #tpu.memory_space<vmem>>, vector<2x49xf32>,
    %179 = vector.extract_strided_slice %160 {offsets = [18, 0], sizes = [2, 49], strides = [1, 1]} : vector<32x49xf32> to vector<2x49xf32>
    %c0_179 = arith.constant 0 : index
    %c441 = arith.constant 441 : index
    %180 = vector.load %arg30[%c0_179, %c441] : memref<2x784xf32, #tpu.memory_space<vmem>>, vector<2x49xf32>
    tpu.vector_store %arg30[%c0_179, %c441], %179 {strides = array<i32>} : memref<2x784xf32, #tpu.memory_space<vmem>>, vector<2x49xf32>,
    %181 = vector.extract_strided_slice %160 {offsets = [20, 0], sizes = [2, 49], strides = [1, 1]} : vector<32x49xf32> to vector<2x49xf32>
    %c0_180 = arith.constant 0 : index
    %c490 = arith.constant 490 : index
    %182 = vector.load %arg30[%c0_180, %c490] : memref<2x784xf32, #tpu.memory_space<vmem>>, vector<2x49xf32>
    tpu.vector_store %arg30[%c0_180, %c490], %181 {strides = array<i32>} : memref<2x784xf32, #tpu.memory_space<vmem>>, vector<2x49xf32>,
    %183 = vector.extract_strided_slice %160 {offsets = [22, 0], sizes = [2, 49], strides = [1, 1]} : vector<32x49xf32> to vector<2x49xf32>
    %c0_181 = arith.constant 0 : index
    %c539 = arith.constant 539 : index
    %184 = vector.load %arg30[%c0_181, %c539] : memref<2x784xf32, #tpu.memory_space<vmem>>, vector<2x49xf32>
    tpu.vector_store %arg30[%c0_181, %c539], %183 {strides = array<i32>} : memref<2x784xf32, #tpu.memory_space<vmem>>, vector<2x49xf32>,
    %185 = vector.extract_strided_slice %160 {offsets = [24, 0], sizes = [2, 49], strides = [1, 1]} : vector<32x49xf32> to vector<2x49xf32>
    %c0_182 = arith.constant 0 : index
    %c588 = arith.constant 588 : index
    %186 = vector.load %arg30[%c0_182, %c588] : memref<2x784xf32, #tpu.memory_space<vmem>>, vector<2x49xf32>
    tpu.vector_store %arg30[%c0_182, %c588], %185 {strides = array<i32>} : memref<2x784xf32, #tpu.memory_space<vmem>>, vector<2x49xf32>,
    %187 = vector.extract_strided_slice %160 {offsets = [26, 0], sizes = [2, 49], strides = [1, 1]} : vector<32x49xf32> to vector<2x49xf32>
    %c0_183 = arith.constant 0 : index
    %c637 = arith.constant 637 : index
    %188 = vector.load %arg30[%c0_183, %c637] : memref<2x784xf32, #tpu.memory_space<vmem>>, vector<2x49xf32>
    tpu.vector_store %arg30[%c0_183, %c637], %187 {strides = array<i32>} : memref<2x784xf32, #tpu.memory_space<vmem>>, vector<2x49xf32>,
    %189 = vector.extract_strided_slice %160 {offsets = [28, 0], sizes = [2, 49], strides = [1, 1]} : vector<32x49xf32> to vector<2x49xf32>
    %c0_184 = arith.constant 0 : index
    %c686 = arith.constant 686 : index
    %190 = vector.load %arg30[%c0_184, %c686] : memref<2x784xf32, #tpu.memory_space<vmem>>, vector<2x49xf32>
    tpu.vector_store %arg30[%c0_184, %c686], %189 {strides = array<i32>} : memref<2x784xf32, #tpu.memory_space<vmem>>, vector<2x49xf32>,
    %191 = vector.extract_strided_slice %160 {offsets = [30, 0], sizes = [2, 49], strides = [1, 1]} : vector<32x49xf32> to vector<2x49xf32>
    %c0_185 = arith.constant 0 : index
    %c735 = arith.constant 735 : index
    %192 = vector.load %arg30[%c0_185, %c735] : memref<2x784xf32, #tpu.memory_space<vmem>>, vector<2x49xf32>
    tpu.vector_store %arg30[%c0_185, %c735], %191 {strides = array<i32>} : memref<2x784xf32, #tpu.memory_space<vmem>>, vector<2x49xf32>,
    %c0_186 = arith.constant 0 : index
    %c0_187 = arith.constant 0 : index
    %193 = vector.load %arg30[%c0_186, %c0_187] : memref<2x784xf32, #tpu.memory_space<vmem>>, vector<2x784xf32>
    %c0_188 = arith.constant 0 : index
    %c0_189 = arith.constant 0 : index
    %194 = vector.load %arg11[%c0_188, %c0_189] : memref<784x256xf32, #tpu.memory_space<vmem>>, vector<784x256xf32>
    %cst_190 = arith.constant dense<0.000000e+00> : vector<2x256xf32>
    %195 = tpu.matmul %193, %194, %cst_190 {dimension_numbers = #tpu.dot_dimension_numbers<[1], [0], [0], [1], [0, 0, 1, 1], [], []>} : vector<2x784xf32>, vector<784x256xf32>, vector<2x256xf32> -> vector<2x256xf32>
    %c0_191 = arith.constant 0 : index
    %c0_192 = arith.constant 0 : index
    %196 = vector.load %arg12[%c0_191, %c0_192] : memref<1x256xf32, #tpu.memory_space<vmem>>, vector<1x256xf32>
    %197 = vector.broadcast %196 : vector<1x256xf32> to vector<2x256xf32>
    %198 = arith.addf %195, %197 : vector<2x256xf32>
    %cst_193 = arith.constant 0.000000e+00 : f32
    %199 = vector.broadcast %cst_193 : f32 to vector<2x256xf32>
    %200 = arith.maximumf %198, %199 : vector<2x256xf32>
    %c0_194 = arith.constant 0 : index
    %c0_195 = arith.constant 0 : index
    %c0_196 = arith.constant 0 : index
    %201 = vector.load %arg20[%c0_194, %c0_195, %c0_196] : memref<2x1x256xf32, #tpu.memory_space<vmem>>, vector<2x1x256xf32>
    %202 = vector.shape_cast %201 : vector<2x1x256xf32> to vector<2x256xf32>
    %203 = vector.shape_cast %200 : vector<2x256xf32> to vector<2x1x256xf32>
    tpu.vector_store %arg20[%c0_194, %c0_195, %c0_196], %203 {strides = array<i32>} : memref<2x1x256xf32, #tpu.memory_space<vmem>>, vector<2x1x256xf32>,
    %c0_197 = arith.constant 0 : index
    %c0_198 = arith.constant 0 : index
    %204 = vector.load %arg13[%c0_197, %c0_198] : memref<256x10xf32, #tpu.memory_space<vmem>>, vector<256x10xf32>
    %cst_199 = arith.constant dense<0.000000e+00> : vector<2x10xf32>
    %205 = tpu.matmul %200, %204, %cst_199 {dimension_numbers = #tpu.dot_dimension_numbers<[1], [0], [0], [1], [0, 0, 1, 1], [], []>} : vector<2x256xf32>, vector<256x10xf32>, vector<2x10xf32> -> vector<2x10xf32>
    %c0_200 = arith.constant 0 : index
    %c0_201 = arith.constant 0 : index
    %206 = vector.load %arg14[%c0_200, %c0_201] : memref<1x10xf32, #tpu.memory_space<vmem>>, vector<1x10xf32>
    %207 = vector.broadcast %206 : vector<1x10xf32> to vector<2x10xf32>
    %208 = arith.addf %205, %207 : vector<2x10xf32>
    %c0_202 = arith.constant 0 : index
    %c0_203 = arith.constant 0 : index
    %c0_204 = arith.constant 0 : index
    %209 = vector.load %arg21[%c0_202, %c0_203, %c0_204] : memref<2x1x10xf32, #tpu.memory_space<vmem>>, vector<2x1x10xf32>
    %210 = vector.shape_cast %209 : vector<2x1x10xf32> to vector<2x10xf32>
    %211 = vector.shape_cast %208 : vector<2x10xf32> to vector<2x1x10xf32>
    tpu.vector_store %arg21[%c0_202, %c0_203, %c0_204], %211 {strides = array<i32>} : memref<2x1x10xf32, #tpu.memory_space<vmem>>, vector<2x1x10xf32>,
    return
  }
  func.func @transform_0(%arg0: i32) -> (i32, i32, i32) {
    %c0_i32 = arith.constant 0 : i32
    %c0_i32_0 = arith.constant 0 : i32
    %c0_i32_1 = arith.constant 0 : i32
    return %arg0, %c0_i32, %c0_i32_0 : i32, i32, i32
  }
  func.func @transform_1(%arg0: i32) -> (i32, i32) {
    %c0_i32 = arith.constant 0 : i32
    %c0_i32_0 = arith.constant 0 : i32
    %c0_i32_1 = arith.constant 0 : i32
    return %c0_i32, %c0_i32_0 : i32, i32
  }
  func.func @transform_2(%arg0: i32) -> (i32, i32) {
    %c0_i32 = arith.constant 0 : i32
    %c0_i32_0 = arith.constant 0 : i32
    %c0_i32_1 = arith.constant 0 : i32
    return %c0_i32, %c0_i32_0 : i32, i32
  }
  func.func @transform_3(%arg0: i32) -> (i32, i32) {
    %c0_i32 = arith.constant 0 : i32
    %c0_i32_0 = arith.constant 0 : i32
    %c0_i32_1 = arith.constant 0 : i32
    return %c0_i32, %c0_i32_0 : i32, i32
  }
  func.func @transform_4(%arg0: i32) -> (i32, i32) {
    %c0_i32 = arith.constant 0 : i32
    %c0_i32_0 = arith.constant 0 : i32
    %c0_i32_1 = arith.constant 0 : i32
    return %c0_i32, %c0_i32_0 : i32, i32
  }
  func.func @transform_5(%arg0: i32) -> (i32, i32) {
    %c0_i32 = arith.constant 0 : i32
    %c0_i32_0 = arith.constant 0 : i32
    %c0_i32_1 = arith.constant 0 : i32
    return %c0_i32, %c0_i32_0 : i32, i32
  }
  func.func @transform_6(%arg0: i32) -> (i32, i32) {
    %c0_i32 = arith.constant 0 : i32
    %c0_i32_0 = arith.constant 0 : i32
    %c0_i32_1 = arith.constant 0 : i32
    return %c0_i32, %c0_i32_0 : i32, i32
  }
  func.func @transform_7(%arg0: i32) -> (i32, i32) {
    %c0_i32 = arith.constant 0 : i32
    %c0_i32_0 = arith.constant 0 : i32
    %c0_i32_1 = arith.constant 0 : i32
    return %c0_i32, %c0_i32_0 : i32, i32
  }
  func.func @transform_8(%arg0: i32) -> (i32, i32) {
    %c0_i32 = arith.constant 0 : i32
    %c0_i32_0 = arith.constant 0 : i32
    %c0_i32_1 = arith.constant 0 : i32
    return %c0_i32, %c0_i32_0 : i32, i32
  }
  func.func @transform_9(%arg0: i32) -> (i32, i32) {
    %c0_i32 = arith.constant 0 : i32
    %c0_i32_0 = arith.constant 0 : i32
    %c0_i32_1 = arith.constant 0 : i32
    return %c0_i32, %c0_i32_0 : i32, i32
  }
  func.func @transform_10(%arg0: i32) -> (i32, i32) {
    %c0_i32 = arith.constant 0 : i32
    %c0_i32_0 = arith.constant 0 : i32
    %c0_i32_1 = arith.constant 0 : i32
    return %c0_i32, %c0_i32_0 : i32, i32
  }
  func.func @transform_11(%arg0: i32) -> (i32, i32) {
    %c0_i32 = arith.constant 0 : i32
    %c0_i32_0 = arith.constant 0 : i32
    %c0_i32_1 = arith.constant 0 : i32
    return %c0_i32, %c0_i32_0 : i32, i32
  }
  func.func @transform_12(%arg0: i32) -> (i32, i32) {
    %c0_i32 = arith.constant 0 : i32
    %c0_i32_0 = arith.constant 0 : i32
    %c0_i32_1 = arith.constant 0 : i32
    return %c0_i32, %c0_i32_0 : i32, i32
  }
  func.func @transform_13(%arg0: i32) -> (i32, i32) {
    %c0_i32 = arith.constant 0 : i32
    %c0_i32_0 = arith.constant 0 : i32
    %c0_i32_1 = arith.constant 0 : i32
    return %c0_i32, %c0_i32_0 : i32, i32
  }
  func.func @transform_14(%arg0: i32) -> (i32, i32) {
    %c0_i32 = arith.constant 0 : i32
    %c0_i32_0 = arith.constant 0 : i32
    %c0_i32_1 = arith.constant 0 : i32
    return %c0_i32, %c0_i32_0 : i32, i32
  }
  func.func @transform_15(%arg0: i32) -> (i32, i32) {
    %c0_i32 = arith.constant 0 : i32
    %c0_i32_0 = arith.constant 0 : i32
    %c0_i32_1 = arith.constant 0 : i32
    return %c0_i32, %c0_i32_0 : i32, i32
  }
  func.func @transform_16(%arg0: i32) -> (i32, i32) {
    %c0_i32 = arith.constant 0 : i32
    %c0_i32_0 = arith.constant 0 : i32
    return %arg0, %c0_i32 : i32, i32
  }
  func.func @transform_17(%arg0: i32) -> (i32, i32) {
    %c0_i32 = arith.constant 0 : i32
    %c0_i32_0 = arith.constant 0 : i32
    return %arg0, %c0_i32 : i32, i32
  }
  func.func @transform_18(%arg0: i32) -> (i32, i32) {
    %c0_i32 = arith.constant 0 : i32
    %c0_i32_0 = arith.constant 0 : i32
    return %arg0, %c0_i32 : i32, i32
  }
  func.func @transform_19(%arg0: i32) -> (i32, i32, i32) {
    %c0_i32 = arith.constant 0 : i32
    %c0_i32_0 = arith.constant 0 : i32
    %c0_i32_1 = arith.constant 0 : i32
    return %arg0, %c0_i32, %c0_i32_0 : i32, i32, i32
  }
  func.func @transform_20(%arg0: i32) -> (i32, i32, i32) {
    %c0_i32 = arith.constant 0 : i32
    %c0_i32_0 = arith.constant 0 : i32
    %c0_i32_1 = arith.constant 0 : i32
    return %arg0, %c0_i32, %c0_i32_0 : i32, i32, i32
  }
}

</mosaic_0001>

<bundles_post_ra>
// kernel: tile.22
= control target key start
LH: loop header
LB: loop body
LE: loop exit
PB: predicated region body
PF: predicated region fallthrough
CT: control target
= control target key end

     0   :  { %s22_s0 = inlined_call_operand.vmem [shape: f32[16], index: 0, kind: input, shape index: {}]   ;;  %s23_s1 = inlined_call_operand.vmem [shape: f32[2,1,1,16], index: 1, kind: output, shape index: {}]  }
   0x1   :  { %v4_v0 = vld [vmem:[%s22_s0] ss:$0 sm:$0xff] }
   0x2   :  { %5 = vst [vmem:[%s23_s1] sm:$0x3] %v4_v0 }

// kernel: tile.2
= control target key start
LH: loop header
LB: loop body
LE: loop exit
PB: predicated region body
PF: predicated region fallthrough
CT: control target
= control target key end

     0   :  { %s130_s8 = smov 125   ;;  %s131_s9 = smov 126   ;;  %vm7_vm0 = vcmask 7168   ;;  %s221_s0 = inlined_call_operand.vmem [shape: f32[2,1,1,16], index: 0, kind: input, shape index: {}]   ;;  %s222_s1 = inlined_call_operand.vmem [shape: f32[32,1], index: 1, kind: output, shape index: {}]  }
   0x1   :  { %v4_v0 = vld [vmem:[%s221_s0] sm:$0x3]  ;;  %s129_s0 = smov 127   ;;  %s132_s10 = smov 124  }
   0x2   :  { %5 = vst [vmem:[#allocation0] sm:$0x3] %v4_v0  ;;  %s133_s11 = smov 123   ;;  %s134_s12 = smov 122  }
   0x3   :  { %s135_s13 = smov 121   ;;  %s136_s14 = smov 120  }
   0x4   :  { %s137_s17 = smov 119   ;;  %s138_s18 = smov 118  }
   0x5   :  { %s139_s19 = smov 117   ;;  %s140_s20 = smov 116  }
   0x6   :  { %s141_s21 = smov 115   ;;  %s142_s22 = smov 114  }
   0x7   :  { %s143_s23 = smov 113  }
   0x9   :  { %v9_v1 = vld [vmem:[#allocation0] sm:$0x3]  }
   0xa   :  { %v21_v2 = vld [vmem:[#allocation0] sm:$0x3]   ;;  %10 = vrot.lane.b32.xlu0 %v9_v1, %s129_s0 }
   0xb   :  { %22 = vrot.lane.b32.xlu1 %v21_v2, %s130_s8  ;;  %v15_v3 = vld [vmem:[#allocation0] sm:$0x3]  }
   0xc   :  { %v27_v4 = vld [vmem:[#allocation0] sm:$0x3]  }
   0xd   :  { %v33_v5 = vld [vmem:[#allocation0] sm:$0x3]  }
   0xe   :  { %16 = vrot.lane.b32.xlu0 %v15_v3, %s131_s9  ;;  %v39_v6 = vld [vmem:[#allocation0] sm:$0x3]  }
   0xf   :  { %28 = vrot.lane.b32.xlu1 %v27_v4, %s132_s10  ;;  %v45_v7 = vld [vmem:[#allocation0] sm:$0x3]  }
  0x10   :  { %v51_v8 = vld [vmem:[#allocation0] sm:$0x3]  }
  0x11   :  { %v57_v9 = vld [vmem:[#allocation0] sm:$0x3]  }
  0x12   :  { %34 = vrot.lane.b32.xlu0 %v33_v5, %s133_s11  ;;  %v63_v10 = vld [vmem:[#allocation0] sm:$0x3]  }
  0x13   :  { %40 = vrot.lane.b32.xlu1 %v39_v6, %s134_s12  ;;  %v6_v11 = vld [vmem:[#allocation0] sm:$0x3]  }
  0x14   :  { %8 = vst.msk [vmem:[%s222_s1] ss:$16 sm:$0x3] %vm7_vm0, %v6_v11   ;;  %v69_v12 = vld [vmem:[#allocation0] sm:$0x3]  }
  0x15   :  { %v75_v13 = vld [vmem:[#allocation0] sm:$0x3]  }
  0x16   :  { %46 = vrot.lane.b32.xlu0 %v45_v7, %s135_s13  ;;  %v81_v14 = vld [vmem:[#allocation0] sm:$0x3]  }
  0x17   :  { %52 = vrot.lane.b32.xlu1 %v51_v8, %s136_s14  ;;  %v87_v15 = vld [vmem:[#allocation0] sm:$0x3]  }
  0x18   :  { %v93_v16 = vld [vmem:[#allocation0] sm:$0x3]  }
  0x1a   :  { %58 = vrot.lane.b32.xlu0 %v57_v9, %s137_s17 }
  0x1b   :  { %64 = vrot.lane.b32.xlu1 %v63_v10, %s138_s18 }
  0x1e   :  { %70 = vrot.lane.b32.xlu0 %v69_v12, %s139_s19 }
  0x1f   :  { %76 = vrot.lane.b32.xlu1 %v75_v13, %s140_s20 }
  0x22   :  { %82 = vrot.lane.b32.xlu0 %v81_v14, %s141_s21 }
  0x23   :  { %88 = vrot.lane.b32.xlu1 %v87_v15, %s142_s22 }
  0x26   :  { %94 = vrot.lane.b32.xlu0 %v93_v16, %s143_s23 }
  0x7c   :  { %v11_v17 = vpop.permute.xlu0 %10  }
  0x7d   :  { %v23_v18 = vpop.permute.xlu1 %22   ;;  %99 = vst.msk [vmem:[%s222_s1 + $0x1] ss:$16 sm:$0x3] %vm7_vm0, %v11_v17  }
  0x7e   :  { %101 = vst.msk [vmem:[%s222_s1 + $0x3] ss:$16 sm:$0x3] %vm7_vm0, %v23_v18  }
  0x80   :  { %v17_v19 = vpop.permute.xlu0 %16  }
  0x81   :  { %v29_v20 = vpop.permute.xlu1 %28   ;;  %100 = vst.msk [vmem:[%s222_s1 + $0x2] ss:$16 sm:$0x3] %vm7_vm0, %v17_v19  }
  0x82   :  { %102 = vst.msk [vmem:[%s222_s1 + $0x4] ss:$16 sm:$0x3] %vm7_vm0, %v29_v20  }
  0x84   :  { %v35_v21 = vpop.permute.xlu0 %34  }
  0x85   :  { %v41_v22 = vpop.permute.xlu1 %40   ;;  %103 = vst.msk [vmem:[%s222_s1 + $0x5] ss:$16 sm:$0x3] %vm7_vm0, %v35_v21  }
  0x86   :  { %104 = vst.msk [vmem:[%s222_s1 + $0x6] ss:$16 sm:$0x3] %vm7_vm0, %v41_v22  }
  0x88   :  { %v47_v23 = vpop.permute.xlu0 %46  }
  0x89   :  { %v53_v24 = vpop.permute.xlu1 %52   ;;  %105 = vst.msk [vmem:[%s222_s1 + $0x7] ss:$16 sm:$0x3] %vm7_vm0, %v47_v23  }
  0x8a   :  { %106 = vst.msk [vmem:[%s222_s1 + $0x8] ss:$16 sm:$0x3] %vm7_vm0, %v53_v24  }
  0x8c   :  { %v59_v25 = vpop.permute.xlu0 %58  }
  0x8d   :  { %v65_v26 = vpop.permute.xlu1 %64   ;;  %107 = vst.msk [vmem:[%s222_s1 + $0x9] ss:$16 sm:$0x3] %vm7_vm0, %v59_v25  }
  0x8e   :  { %108 = vst.msk [vmem:[%s222_s1 + $0xa] ss:$16 sm:$0x3] %vm7_vm0, %v65_v26  }
  0x90   :  { %v71_v27 = vpop.permute.xlu0 %70  }
  0x91   :  { %v77_v28 = vpop.permute.xlu1 %76   ;;  %109 = vst.msk [vmem:[%s222_s1 + $0xb] ss:$16 sm:$0x3] %vm7_vm0, %v71_v27  }
  0x92   :  { %110 = vst.msk [vmem:[%s222_s1 + $0xc] ss:$16 sm:$0x3] %vm7_vm0, %v77_v28  }
  0x94   :  { %v83_v29 = vpop.permute.xlu0 %82  }
  0x95   :  { %v89_v30 = vpop.permute.xlu1 %88   ;;  %111 = vst.msk [vmem:[%s222_s1 + $0xd] ss:$16 sm:$0x3] %vm7_vm0, %v83_v29  }
  0x96   :  { %112 = vst.msk [vmem:[%s222_s1 + $0xe] ss:$16 sm:$0x3] %vm7_vm0, %v89_v30  }
  0x98   :  { %v95_v31 = vpop.permute.xlu0 %94  }
  0x99   :  { %113 = vst.msk [vmem:[%s222_s1 + $0xf] ss:$16 sm:$0x3] %vm7_vm0, %v95_v31  }

// kernel: tile.18
= control target key start
LH: loop header
LB: loop body
LE: loop exit
PB: predicated region body
PF: predicated region fallthrough
CT: control target
= control target key end

     0   :  { %s22_s0 = inlined_call_operand.vmem [shape: f32[8], index: 0, kind: input, shape index: {}]   ;;  %s23_s1 = inlined_call_operand.vmem [shape: f32[2,1,1,8], index: 1, kind: output, shape index: {}]  }
   0x1   :  { %v4_v0 = vld [vmem:[%s22_s0] ss:$0 sm:$0xff] }
   0x2   :  { %5 = vst [vmem:[%s23_s1] sm:$0x3] %v4_v0 }

// kernel: tile.1
= control target key start
LH: loop header
LB: loop body
LE: loop exit
PB: predicated region body
PF: predicated region fallthrough
CT: control target
= control target key end

     0   :  { %s66_s8 = smov 125   ;;  %vm7_vm0 = vcmask 7168   ;;  %s67_s11 = smov 126   ;;  %s117_s0 = inlined_call_operand.vmem [shape: f32[2,1,1,8], index: 0, kind: input, shape index: {}]   ;;  %s118_s1 = inlined_call_operand.vmem [shape: f32[16,1], index: 1, kind: output, shape index: {}]  }
   0x1   :  { %v4_v0 = vld [vmem:[%s117_s0] sm:$0x3]  ;;  %s65_s0 = smov 127   ;;  %s68_s12 = smov 124  }
   0x2   :  { %5 = vst [vmem:[#allocation0] sm:$0x3] %v4_v0  ;;  %s69_s13 = smov 123   ;;  %s70_s14 = smov 122  }
   0x3   :  { %s71_s15 = smov 121  }
   0x9   :  { %v9_v1 = vld [vmem:[#allocation0] sm:$0x3]  }
   0xa   :  { %v21_v2 = vld [vmem:[#allocation0] sm:$0x3]   ;;  %10 = vrot.lane.b32.xlu0 %v9_v1, %s65_s0 }
   0xb   :  { %22 = vrot.lane.b32.xlu1 %v21_v2, %s66_s8  ;;  %v15_v3 = vld [vmem:[#allocation0] sm:$0x3]  }
   0xc   :  { %v27_v4 = vld [vmem:[#allocation0] sm:$0x3]  }
   0xd   :  { %v6_v5 = vld [vmem:[#allocation0] sm:$0x3]  }
   0xe   :  { %8 = vst.msk [vmem:[%s118_s1] ss:$8 sm:$0x3] %vm7_vm0, %v6_v5   ;;  %16 = vrot.lane.b32.xlu0 %v15_v3, %s67_s11  ;;  %v33_v6 = vld [vmem:[#allocation0] sm:$0x3]  }
   0xf   :  { %28 = vrot.lane.b32.xlu1 %v27_v4, %s68_s12  ;;  %v39_v7 = vld [vmem:[#allocation0] sm:$0x3]  }
  0x10   :  { %v45_v8 = vld [vmem:[#allocation0] sm:$0x3]  }
  0x12   :  { %34 = vrot.lane.b32.xlu0 %v33_v6, %s69_s13 }
  0x13   :  { %40 = vrot.lane.b32.xlu1 %v39_v7, %s70_s14 }
  0x16   :  { %46 = vrot.lane.b32.xlu0 %v45_v8, %s71_s15 }
  0x7c   :  { %v11_v9 = vpop.permute.xlu0 %10  }
  0x7d   :  { %v23_v10 = vpop.permute.xlu1 %22   ;;  %51 = vst.msk [vmem:[%s118_s1 + $0x1] ss:$8 sm:$0x3] %vm7_vm0, %v11_v9  }
  0x7e   :  { %53 = vst.msk [vmem:[%s118_s1 + $0x3] ss:$8 sm:$0x3] %vm7_vm0, %v23_v10  }
  0x80   :  { %v17_v11 = vpop.permute.xlu0 %16  }
  0x81   :  { %v29_v12 = vpop.permute.xlu1 %28   ;;  %52 = vst.msk [vmem:[%s118_s1 + $0x2] ss:$8 sm:$0x3] %vm7_vm0, %v17_v11  }
  0x82   :  { %54 = vst.msk [vmem:[%s118_s1 + $0x4] ss:$8 sm:$0x3] %vm7_vm0, %v29_v12  }
  0x84   :  { %v35_v13 = vpop.permute.xlu0 %34  }
  0x85   :  { %v41_v14 = vpop.permute.xlu1 %40   ;;  %55 = vst.msk [vmem:[%s118_s1 + $0x5] ss:$8 sm:$0x3] %vm7_vm0, %v35_v13  }
  0x86   :  { %56 = vst.msk [vmem:[%s118_s1 + $0x6] ss:$8 sm:$0x3] %vm7_vm0, %v41_v14  }
  0x88   :  { %v47_v15 = vpop.permute.xlu0 %46  }
  0x89   :  { %57 = vst.msk [vmem:[%s118_s1 + $0x7] ss:$8 sm:$0x3] %vm7_vm0, %v47_v15  }

// kernel: tile.14
= control target key start
LH: loop header
LB: loop body
LE: loop exit
PB: predicated region body
PF: predicated region fallthrough
CT: control target
= control target key end

     0   :  { %s22_s0 = inlined_call_operand.vmem [shape: f32[4], index: 0, kind: input, shape index: {}]   ;;  %s23_s1 = inlined_call_operand.vmem [shape: f32[2,1,1,4], index: 1, kind: output, shape index: {}]  }
   0x1   :  { %v4_v0 = vld [vmem:[%s22_s0] ss:$0 sm:$0xff] }
   0x2   :  { %5 = vst [vmem:[%s23_s1] sm:$0x3] %v4_v0 }

// kernel: tile.0
= control target key start
LH: loop header
LB: loop body
LE: loop exit
PB: predicated region body
PF: predicated region fallthrough
CT: control target
= control target key end

     0   :  { %s34_s8 = smov 125   ;;  %vm7_vm0 = vcmask 7168   ;;  %s35_s11 = smov 126   ;;  %s61_s0 = inlined_call_operand.vmem [shape: f32[2,1,1,4], index: 0, kind: input, shape index: {}]   ;;  %s62_s1 = inlined_call_operand.vmem [shape: f32[8,1], index: 1, kind: output, shape index: {}]  }
   0x1   :  { %v4_v0 = vld [vmem:[%s61_s0] sm:$0x3]  ;;  %s33_s0 = smov 127  }
   0x2   :  { %5 = vst [vmem:[#allocation0] sm:$0x3] %v4_v0 }
   0x9   :  { %v9_v1 = vld [vmem:[#allocation0] sm:$0x3]  }
   0xa   :  { %v21_v2 = vld [vmem:[#allocation0] sm:$0x3]   ;;  %10 = vrot.lane.b32.xlu0 %v9_v1, %s33_s0 }
   0xb   :  { %22 = vrot.lane.b32.xlu1 %v21_v2, %s34_s8  ;;  %v6_v3 = vld [vmem:[#allocation0] sm:$0x3]  }
   0xc   :  { %v15_v4 = vld [vmem:[#allocation0] sm:$0x3]   ;;  %8 = vst.msk [vmem:[%s62_s1] ss:$4 sm:$0x3] %vm7_vm0, %v6_v3  }
   0xe   :  { %16 = vrot.lane.b32.xlu0 %v15_v4, %s35_s11 }
  0x7c   :  { %v11_v5 = vpop.permute.xlu0 %10  }
  0x7d   :  { %v23_v6 = vpop.permute.xlu1 %22   ;;  %27 = vst.msk [vmem:[%s62_s1 + $0x1] ss:$4 sm:$0x3] %vm7_vm0, %v11_v5  }
  0x7e   :  { %29 = vst.msk [vmem:[%s62_s1 + $0x3] ss:$4 sm:$0x3] %vm7_vm0, %v23_v6  }
  0x80   :  { %v17_v7 = vpop.permute.xlu0 %16  }
  0x81   :  { %28 = vst.msk [vmem:[%s62_s1 + $0x2] ss:$4 sm:$0x3] %vm7_vm0, %v17_v7  }

// kernel: cnn_hero_forward.1
= control target key start
LH: loop header
LB: loop body
LE: loop exit
PB: predicated region body
PF: predicated region fallthrough
CT: control target
= control target key end

     0   :  { %s8781_s0 = inlined_call_operand.vmem [shape: f32[2,1,784], index: 0, kind: input, shape index: {}]   ;;  %s8782_s1 = inlined_call_operand.vmem [shape: f32[8,18], index: 1, kind: input, shape index: {}]   ;;  %s8783_s2 = inlined_call_operand.vmem [shape: f32[8,1], index: 2, kind: input, shape index: {}]   ;;  %s8784_s3 = inlined_call_operand.vmem [shape: f32[16,72], index: 3, kind: input, shape index: {}]   ;;  %s8785_s4 = inlined_call_operand.vmem [shape: f32[16,1], index: 4, kind: input, shape index: {}]   ;;  %s8786_s5 = inlined_call_operand.vmem [shape: f32[32,144], index: 5, kind: input, shape index: {}]   ;;  %s8787_s6 = inlined_call_operand.vmem [shape: f32[32,1], index: 6, kind: input, shape index: {}]   ;;  %s8788_s7 = inlined_call_operand.hbm [shape: f32[784,196], index: 7, kind: input, shape index: {}]   ;;  %s8789_s8 = inlined_call_operand.vmem [shape: f32[196,49], index: 8, kind: input, shape index: {}]   ;;  %s8790_s9 = inlined_call_operand.vmem [shape: f32[32,32], index: 9, kind: input, shape index: {}]   ;;  %s8791_s10 = inlined_call_operand.vmem [shape: f32[784,256], index: 10, kind: input, shape index: {}]   ;;  %s8792_s11 = inlined_call_operand.vmem [shape: f32[1,256], index: 11, kind: input, shape index: {}]   ;;  %s8793_s12 = inlined_call_operand.vmem [shape: f32[256,10], index: 12, kind: input, shape index: {}]   ;;  %s8794_s13 = inlined_call_operand.vmem [shape: f32[1,10], index: 13, kind: input, shape index: {}]   ;;  %s8795_s14 = inlined_call_operand.vmem [shape: f32[2,784], index: 14, kind: input, shape index: {}]   ;;  %s8796_s15 = inlined_call_operand.vmem [shape: f32[2,196], index: 15, kind: input, shape index: {}]   ;;  %s8797_s16 = inlined_call_operand.vmem [shape: f32[8,784], index: 16, kind: output, shape index: {0}]   ;;  %s8798_s17 = inlined_call_operand.vmem [shape: f32[16,784], index: 17, kind: output, shape index: {1}]   ;;  %s8799_s18 = inlined_call_operand.vmem [shape: f32[32,196], index: 18, kind: output, shape index: {2}]   ;;  %s8800_s19 = inlined_call_operand.vmem [shape: f32[2,1,256], index: 19, kind: output, shape index: {3}]   ;;  %s8801_s20 = inlined_call_operand.hbm [shape: f32[2,1,10], index: 20, kind: output, shape index: {4}]  }
   0x1   :  { %8826 = sst [smem:[#allocation17_spill]] %s8781_s0 }
   0x2   :  { %8827 = sst [smem:[#allocation18_spill]] %s8782_s1 }
   0x3   :  { %8828 = sst [smem:[#allocation19_spill]] %s8783_s2 }
   0x4   :  { %8829 = sst [smem:[#allocation20_spill]] %s8784_s3 }
   0x5   :  { %8830 = sst [smem:[#allocation21_spill]] %s8785_s4 }
   0x6   :  { %26 = vsyncpa [#allocation12], 0 }
   0x7   :  { %27 = vsyncpa [#allocation13], 0  ;;  %s5931_s1 = smov [#allocation11]   ;;  %s5883_s2 = scalar_lea.hbm %s8788_s7, 25088 }
   0x8   :  { %s47_s22 = sshll.u32 %s5931_s1, 4  ;;  %p5884_p0 = scmp.ne.s32.totalorder %s8788_s7, %s5883_s2  ;;  %s48_s22 = int_to_ptr.vmem [resolvable:$true] %s47_s22 }
   0x9   :  { %p5887_p1 = scmp.lt.u32.totalorder %s5883_s2, %s8788_s7 }
   0xb   :  { %p5889_p2 = pnand %p5887_p1, %p5884_p0 }
   0xd   :  { %5892 = shalt.err (!%p5889_p2)
}
   0xe   :  { %s5893_s28 = scalar_lea.vmem %s48_s22, 25088  ;;  %p5898_p4 = scmp.lt.s32.totalorder %s48_s22, %s48_s22 }
   0xf   :  { %p5894_p3 = scmp.ne.s32.totalorder %s48_s22, %s5893_s28  ;;  %p5899_p5 = scmp.lt.s32.totalorder %s5893_s28, %s5893_s28 }
  0x11   :  { %p5900_p6 = por %p5899_p5, %p5898_p4 }
  0x13   :  { %p5901_p7 = pnand %p5900_p6, %p5894_p3 }
  0x15   :  { %5904 = shalt.err (!%p5901_p7)
}
  0x16   :  { %s5932_s4 = smov 256   ;;  %s8805_s29 = smov 16  }
  0x17   :  { %53 = dma.hbm_to_vmem [thread:$0]  %s8788_s7, 25088, %s48_s22, [#allocation12], %s5932_s4, %s5932_s4, %s8805_s29  }
  0x18   :  { %5927 = dma.done.wait [#allocation12], 25088  }
  0x19   :  { %5928 = vsyncadd [#allocation12], 4294942208  ;;  %v86_v0 = vlaneseq  ;;  %v5934_v1 = vmov 1935823168   ;;  %vm73_vm0 = vcmask 254976   ;;  %vm8822_vm1 = vcmask 261120  }
  0x1a   :  { %v84_v2 = vunpack.c.l.s4 %v5934_v1  ;;  %v5935_v4 = vmov 1983009808   ;;  %v5936_v6 = vmov 0.0   ;;  %vm75_vm2 = vcmask 648576   ;;  %s8831_s1 = sld [smem:[#allocation17_spill]]  ;;  %s5937_s26 = smov 32  }
  0x1b   :  { %v6101_v3 = vshrl.u32 %v86_v0, 7  ;;  %v159_v5 = vunpack.c.l.s4 %v5935_v4  ;;  %74 = vst.msk [vmem:[#allocation2] sm:$0x3] %vm73_vm0, %v5936_v6  ;;  %1106 = vmatprep.mubr.f32.mxu0 %v5936_v6  ;;  %1177 = vmatprep.mubr.f32.mxu1 %v5936_v6  ;;  %v5028_v19 = vld [vmem:[%s8795_s14 + $0x1] ss:$2 sm:$0x7f] }
  0x1c   :  { %v85_v7 = vunpack.c.0.s8 %v84_v2  ;;  %1340 = vst.msk [vmem:[#allocation4] sm:$0xff] %vm8822_vm1, %v5936_v6  ;;  %v122_v24 = vld [vmem:[%s8795_s14] ss:$2 sm:$0x7f]  ;;  %s5938_s27 = smov 5   ;;  %s5939_s28 = smov 59  }
  0x1d   :  { %v160_v8 = vunpack.c.0.s8 %v159_v5  ;;  %v6110_v10 = vsub.s32 0, %v6101_v3  ;;  %v6113_v11 = vsub.s32 1, %v6101_v3  ;;  %v6116_v12 = vsub.s32 2, %v6101_v3  ;;  %76 = vst.msk [vmem:[#allocation2 + $0xc] sm:$0x3] %vm75_vm2, %v5936_v6  ;;  %s5940_s4 = smov 33  }
  0x1e   :  { %v88_v9 = vsub.s32 %v85_v7, %v6101_v3  ;;  %v6119_v13 = vsub.s32 3, %v6101_v3  ;;  %v6122_v14 = vsub.s32 4, %v6101_v3  ;;  %v6125_v15 = vsub.s32 5, %v6101_v3  ;;  %s5941_s30 = smov 3   ;;  %s5942_s0 = smov 31  }
  0x1f   :  { %v6135_v18 = vsub.s32 %v160_v8, %v6101_v3  ;;  %v353_v21 = vrot.slane %v5028_v19, %v6110_v10  ;;  %v357_v22 = vrot.slane %v5028_v19, %v6113_v11  ;;  %v361_v23 = vrot.slane %v5028_v19, %v6116_v12  ;;  %s5943_s7 = smov 61   ;;  %s5944_s21 = smov 96  }
  0x20   :  { %v5875_v16 = vld [vmem:[%s8831_s1] ss:$7 sps:$4 sm:$0xff]   ;;  %v5877_v17 = vld [vmem:[%s8831_s1 + $0x4] ss:$7 sps:$4 sm:$0x77]   ;;  %v365_v25 = vrot.slane %v5028_v19, %v6119_v13  ;;  %v131_v26 = vrot.slane %v122_v24, %v6110_v10  ;;  %v135_v27 = vrot.slane %v122_v24, %v6113_v11  ;;  %v6150_v28 = vsub.s32 6, %v6101_v3 }
  0x21   :  { %v89_v20 = vrot.slane %v5875_v16, %v88_v9  ;;  %v378_v29 = vcombine.low %v353_v21, %v357_v22  ;;  %v96_v30 = vrot.slane %v5877_v17, %v88_v9  ;;  %v139_v31 = vrot.slane %v122_v24, %v6116_v12  ;;  %s5945_s1 = smov 124   ;;  %s5946_s22 = smov 68  }
  0x22   :  { %v143_v32 = vrot.slane %v122_v24, %v6119_v13  ;;  %v379_v33 = vcombine.low %v361_v23, %v365_v25  ;;  %v156_v34 = vcombine.low %v131_v26, %v135_v27  ;;  %v369_v37 = vrot.slane %v5028_v19, %v6122_v14  ;;  %s8813_s23 = smov 123   ;;  %s8807_s24 = smov 69  }
  0x23   :  { %97 = vrot.lane.b32.xlu0 %v89_v20, %s5937_s26  ;;  %v386_v35 = vrot.slane %v378_v29, %v6135_v18  ;;  %v373_v38 = vrot.slane %v5028_v19, %v6125_v15  ;;  %v147_v41 = vrot.slane %v122_v24, %v6122_v14  ;;  %v151_v42 = vrot.slane %v122_v24, %v6125_v15  ;;  %s8809_s2 = smov 95   ;;  %s8815_s25 = smov 125  }
  0x24   :  { %v157_v36 = vcombine.low %v139_v31, %v143_v32  ;;  %v393_v39 = vrot.slane %v379_v33, %v6135_v18  ;;  %v164_v40 = vrot.slane %v156_v34, %v6135_v18  ;;  %v377_v44 = vrot.slane %v5028_v19, %v6150_v28  ;;  %s8811_s3 = smov 97   ;;  %s5952_s29 = smov 67  }
  0x25   :  { %v395_v45 = vcombine.low %v369_v37, %v373_v38  ;;  %v155_v48 = vrot.slane %v122_v24, %v6150_v28  ;;  %v173_v49 = vcombine.low %v147_v41, %v151_v42  ;;  %vm110_vm3 = vcmask 1041664  }
  0x26   :  { %v171_v43 = vrot.slane %v157_v36, %v6135_v18  ;;  %v394_v46 = vcombine.low %v386_v35, %v393_v39  ;;  %v409_v51 = vrot.slane %v377_v44, %v6135_v18  ;;  %vm111_vm4 = vcmask 1043458  }
  0x27   :  { %99 = vrot.lane.b32.xlu0 %v96_v30, %s5937_s26  ;;  %v402_v50 = vrot.slane %v395_v45, %v6135_v18  ;;  %v180_v52 = vrot.slane %v173_v49, %v6135_v18  ;;  %v187_v53 = vrot.slane %v155_v48, %v6135_v18  ;;  %vm112_vm5 = vmor %vm111_vm4, %vm110_vm3  ;;  %vm113_vm6 = vcmask 1045508  }
  0x28   :  { %v172_v47 = vcombine.low %v164_v40, %v171_v43  ;;  %411 = vrot.lane.b32.xlu1 %v394_v46, %s5938_s27  ;;  %vm114_vm7 = vmor %vm113_vm6, %vm112_vm5  ;;  %vm115_vm8 = vcmask 1047558   ;;  %vm105_vm9 = vcmask 1041408   ;;  %vm119_vm12 = vcmask 390148  }
  0x29   :  { %v410_v54 = vcombine.low %v402_v50, %v409_v51  ;;  %v188_v55 = vcombine.low %v180_v52, %v187_v53  ;;  %vm116_vm10 = vmor %vm115_vm8, %vm114_vm7  ;;  %vm417_vm14 = vcmask 39936   ;;  %vm8819_vm15 = vcmask 482304  }
  0x2a   :  { %vm118_vm11 = vmor %vm111_vm4, %vm105_vm9  ;;  %vm665_vm0 = vcmask 269312   ;;  %vm195_vm2 = vcmask 23552   ;;  %vm505_vm3 = vcmask 252928   ;;  %vm8818_vm4 = vcmask 498688  }
  0x2b   :  { %745 = vrot.lane.b32.xlu0 %v172_v47, %s5939_s28  ;;  %vm120_vm13 = vmor %vm119_vm12, %vm118_vm11  ;;  %vm8817_vm5 = vcmask 125954   ;;  %vm636_vm6 = vcmask 785408   ;;  %vm8820_vm7 = vcmask 556032   ;;  %vm325_vm8 = vcmask 1014784  }
  0x2c   :  { %659 = vrot.lane.b32.xlu1 %v394_v46, %s5940_s4  ;;  %vm583_vm11 = vcmask 130054   ;;  %vm563_vm12 = vcmask 793600  }
  0x2f   :  { %189 = vrot.lane.b32.xlu0 %v172_v47, %s5941_s30 }
  0x30   :  { %499 = vrot.lane.b32.xlu1 %v172_v47, %s5942_s0 }
  0x33   :  { %413 = vrot.lane.b32.xlu0 %v410_v54, %s5938_s27 }
  0x34   :  { %501 = vrot.lane.b32.xlu1 %v188_v55, %s5942_s0 }
  0x37   :  { %747 = vrot.lane.b32.xlu0 %v188_v55, %s5939_s28 }
  0x38   :  { %661 = vrot.lane.b32.xlu1 %v410_v54, %s5940_s4 }
  0x3b   :  { %905 = vrot.lane.b32.xlu0 %v394_v46, %s5943_s7 }
  0x3c   :  { %191 = vrot.lane.b32.xlu1 %v188_v55, %s5941_s30 }
  0x40   :  { %907 = vrot.lane.b32.xlu1 %v410_v54, %s5943_s7 }
  0x95   :  { %v98_v56 = vpop.permute.xlu0 %97 }
  0x96   :  { %v101_v57 = vrot.slane %v98_v56, 6 }
  0x98   :  { %v104_v58 = vsel %vm8822_vm1, %v101_v57, %v98_v56 }
  0x99   :  { %117 = vst.msk [vmem:[#allocation2] sm:$0xff] %vm116_vm10, %v104_v58  ;;  %v100_v59 = vpop.permute.xlu0 %99  ;;  %vm272_vm10 = vcmask 123904  }
  0x9a   :  { %v102_v60 = vrot.slane %v100_v59, 6  ;;  %v6184_v61 = vpop.permute.xlu1 %411 }
  0x9b   :  { %v415_v1 = vrot.slane %v6184_v61, 6 }
  0x9c   :  { %v106_v62 = vsel %vm105_vm9, %v101_v57, %v102_v60 }
  0x9d   :  { %v107_v63 = vsel %vm8822_vm1, %v106_v62, %v100_v59  ;;  %v6189_v2 = vpop.permute.xlu0 %745  ;;  %v418_v8 = vsel %vm417_vm14, %v415_v1, %v6184_v61 }
  0x9e   :  { %121 = vst.msk [vmem:[#allocation2 + $0x8] sm:$0x3f] %vm120_vm13, %v107_v63  ;;  %v6193_v5 = vpop.permute.xlu1 %659  ;;  %v749_v19 = vrot.slane %v6189_v2, 6  ;;  %vm8825_vm13 = vcmask 1022976  }
  0x9f   :  { %v663_v22 = vrot.slane %v6193_v5, 6 }
  0xa0   :  { %v6191_v4 = vld [vmem:[#allocation2] sm:$0xff]  ;;  %v752_v26 = vsel %vm8819_vm15, %v749_v19, %v6189_v2 }
  0xa1   :  { %v596_v7 = vrot.slane %v6191_v4, %v6135_v18  ;;  %v6206_v16 = vmul.f32 %v418_v8, %v6191_v4  ;;  %v190_v17 = vpop.permute.xlu0 %189  ;;  %v589_v30 = vcombine.high %v6191_v4, %v6191_v4  ;;  %v666_v31 = vsel %vm665_vm0, %v663_v22, %v6193_v5 }
  0xa2   :  { %v6203_v9 = vpop.permute.xlu1 %499  ;;  %v6240_v33 = vmul.f32 %v752_v26, %v6191_v4  ;;  %v193_v35 = vrot.slane %v190_v17, 6  ;;  %v6244_v36 = vmul.f32 %v666_v31, %v6191_v4  ;;  %v834_v42 = vcombine.low %v6191_v4, %v6191_v4 }
  0xa3   :  { %622 = vrot.lane.b32.xlu0 %v596_v7, %s5944_s21  ;;  %315 = vrot.lane.b32.xlu1 %v596_v7, %s5945_s1  ;;  %v6225_v25 = vrot.slane %v6206_v16, %v6135_v18  ;;  %v604_v34 = vcombine.high %v596_v7, %v596_v7  ;;  %v6248_v37 = vrot.slane %v589_v30, %v6135_v18  ;;  %v503_v48 = vrot.slane %v6203_v9, 6 }
  0xa4   :  { %v6256_v41 = vrot.slane %v6240_v33, %v6135_v18  ;;  %v196_v43 = vsel %vm195_vm2, %v193_v35, %v190_v17  ;;  %v6265_v44 = vrot.slane %v6244_v36, %v6135_v18  ;;  %v6274_v47 = vrot.slane %v834_v42, %v6135_v18 }
  0xa5   :  { %v6209_v20 = vld [vmem:[#allocation2 + $0x8] sm:$0x3f]  ;;  %v414_v27 = vpop.permute.xlu0 %413  ;;  %v6268_v45 = vmul.f32 %v6191_v4, %v196_v43  ;;  %v850_v50 = vcombine.low %v596_v7, %v596_v7  ;;  %v506_v53 = vsel %vm505_vm3, %v503_v48, %v6203_v9 }
  0xa6   :  { %v6214_v21 = vrot.slane %v6209_v20, %v6135_v18  ;;  %v6217_v23 = vpop.permute.xlu1 %501  ;;  %v6219_v24 = vld [vmem:[#allocation2 + $0x8] sm:$0x3f]  ;;  %v416_v56 = vrot.slane %v414_v27, 6  ;;  %v6297_v58 = vmul.f32 %v506_v53, %v6191_v4 }
  0xa7   :  { %874 = vrot.lane.b32.xlu0 %v596_v7, %s5946_s22  ;;  %v309_v29 = vrot.slane %v6219_v24, %v6135_v18  ;;  %v6285_v52 = vrot.slane %v6268_v45, %v6135_v18  ;;  %v126_v54 = vld [vmem:[#allocation2 + $0x8] sm:$0x3f]  ;;  %v295_v5 = vcombine.low %v6219_v24, %v6219_v24 }
  0xa8   :  { %630 = vrot.lane.b32.xlu1 %v6214_v21, %s5944_s21  ;;  %v419_v62 = vsel %vm105_vm9, %v415_v1, %v416_v56  ;;  %v529_v61 = vrot.slane %v6297_v58, %v6135_v18  ;;  %v658_v30 = vld [vmem:[#allocation2 + $0x8] sm:$0x3f]  ;;  %v621_v43 = vcombine.high %v6214_v21, %v6214_v21 }
  0xa9   :  { %v6250_v39 = vpop.permute.xlu0 %747  ;;  %v420_v1 = vsel %vm417_vm14, %v419_v62, %v414_v27  ;;  %v6325_v26 = vrot.slane %v295_v5, %v6135_v18  ;;  %v220_v56 = vcombine.high %v6285_v52, %v6285_v52  ;;  %v515_v62 = vcombine.low %v6297_v58, %v6297_v58 }
  0xaa   :  { %v662_v32 = vpop.permute.xlu1 %661  ;;  %v750_v17 = vrot.slane %v6250_v39, 6  ;;  %v442_v58 = vcombine.low %v6225_v25, %v6225_v25 }
  0xab   :  { %463 = vrot.lane.b32.xlu0 %v6225_v25, %s8813_s23  ;;  %v664_v59 = vrot.slane %v662_v32, 6  ;;  %v522_v5 = vrot.slane %v515_v62, %v6135_v18 }
  0xac   :  { %323 = vrot.lane.b32.xlu1 %v309_v29, %s5945_s1 }
  0xad   :  { %v6277_v49 = vpop.permute.xlu0 %905  ;;  %v667_v7 = vsel %vm105_vm9, %v663_v22, %v664_v59  ;;  %v606_v22 = vcombine.high %v6209_v20, %v6209_v20 }
  0xae   :  { %v192_v38 = vpop.permute.xlu1 %191  ;;  %v909_v55 = vrot.slane %v6277_v49, 6  ;;  %v668_v24 = vsel %vm665_vm0, %v667_v7, %v662_v32  ;;  %v831_v32 = vld [vmem:[#allocation2 + $0x8] sm:$0x3f] }
  0xaf   :  { %624 = vrot.lane.b32.xlu0 %v604_v34, %s5944_s21  ;;  %v194_v40 = vrot.slane %v192_v38, 6  ;;  %v672_v31 = vmul.f32 %v668_v24, %v658_v30  ;;  %v620_v20 = vrot.slane %v606_v22, %v6135_v18  ;;  %v605_v24 = vcombine.high %v6248_v37, %v6248_v37  ;;  %v498_v30 = vld [vmem:[#allocation2 + $0x8] sm:$0x3f] }
  0xb0   :  { %626 = vrot.lane.b32.xlu1 %v6248_v37, %s5944_s21  ;;  %v912_v60 = vsel %vm8818_vm4, %v909_v55, %v6277_v49  ;;  %v904_v49 = vld [vmem:[#allocation2 + $0x8] sm:$0x3f] }
  0xb1   :  { %v197_v46 = vsel %vm105_vm9, %v193_v35, %v194_v40  ;;  %v917_v8 = vmul.f32 %v912_v60, %v6191_v4  ;;  %v348_v4 = vld [vmem:[#allocation2 + $0x8] sm:$0x3f]  ;;  %v706_v2 = vrot.slane %v672_v31, %v6135_v18  ;;  %v293_v60 = vcombine.high %v6274_v47, %v6274_v47 }
  0xb2   :  { %v198_v51 = vsel %vm195_vm2, %v197_v46, %v192_v38  ;;  %v6330_v29 = vmul.f32 %v420_v1, %v348_v4  ;;  %v744_v40 = vld [vmem:[#allocation2 + $0x8] sm:$0x3f]  ;;  %v776_v1 = vcombine.low %v6256_v41, %v6256_v41 }
  0xb3   :  { %797 = vrot.lane.b32.xlu0 %v6256_v41, %s8807_s24  ;;  %v6292_v57 = vmul.f32 %v198_v51, %v126_v54  ;;  %v6335_v27 = vrot.slane %v917_v8, %v6135_v18  ;;  %v851_v51 = vcombine.low %v831_v32, %v831_v32  ;;  %v531_v54 = vcombine.low %v529_v61, %v529_v61 }
  0xb4   :  { %712 = vrot.lane.b32.xlu1 %v6265_v44, %s8809_s2  ;;  %v451_v35 = vrot.slane %v6330_v29, %v6135_v18 }
  0xb5   :  { %v6311_v63 = vrot.slane %v6292_v57, %v6135_v18  ;;  %v858_v21 = vrot.slane %v851_v51, %v6135_v18 }
  0xb7   :  { %870 = vrot.lane.b32.xlu0 %v6274_v47, %s5946_s22 }
  0xb8   :  { %872 = vrot.lane.b32.xlu1 %v850_v50, %s5946_s22 }
  0xbb   :  { %238 = vrot.lane.b32.xlu0 %v6285_v52, %s8815_s25  ;;  %v921_v52 = vcombine.high %v917_v8, %v917_v8  ;;  %v504_v8 = vrot.slane %v6217_v23, 6 }
  0xbc   :  { %311 = vrot.lane.b32.xlu1 %v6274_v47, %s5945_s1 }
  0xbd   :  { %v6392_v7 = vrot.slane %v921_v52, %v6135_v18  ;;  %v507_v25 = vsel %vm105_vm9, %v503_v48, %v504_v8  ;;  %v866_v48 = vcombine.low %v858_v21, %v858_v21 }
  0xbf   :  { %317 = vrot.lane.b32.xlu0 %v604_v34, %s5945_s1  ;;  %v753_v34 = vsel %vm105_vm9, %v749_v19, %v750_v17  ;;  %v865_v19 = vrot.slane %v831_v32, %v6135_v18  ;;  %v427_v17 = vcombine.high %v6206_v16, %v6206_v16  ;;  %v508_v16 = vsel %vm505_vm3, %v507_v25, %v6217_v23 }
  0xc0   :  { %246 = vrot.lane.b32.xlu1 %v6311_v63, %s8815_s25  ;;  %v754_v38 = vsel %vm8819_vm15, %v753_v34, %v6250_v39  ;;  %v205_v39 = vcombine.high %v6268_v45, %v6268_v45  ;;  %v675_v45 = vcombine.low %v6244_v36, %v6244_v36  ;;  %v849_v36 = vcombine.low %v6274_v47, %v6274_v47 }
  0xc1   :  { %v6351_v42 = vmul.f32 %v754_v38, %v744_v40  ;;  %v867_v46 = vcombine.low %v865_v19, %v865_v19  ;;  %v692_v47 = vcombine.low %v672_v31, %v672_v31  ;;  %v441_v4 = vrot.slane %v427_v17, %v6135_v18  ;;  %v908_v40 = vpop.permute.xlu1 %907  ;;  %v6496_v17 = vld [vmem:[%s8795_s14] ss:$2 sm:$0x7f] }
  0xc2   :  { %v6364_v53 = vrot.slane %v205_v39, %v6135_v18  ;;  %v6377_v59 = vrot.slane %v675_v45, %v6135_v18  ;;  %v512_v9 = vmul.f32 %v508_v16, %v498_v30  ;;  %v222_v31 = vcombine.high %v6292_v57, %v6292_v57 }
  0xc3   :  { %555 = vrot.lane.b32.xlu0 %v529_v61, %s8811_s3  ;;  %v785_v50 = vrot.slane %v6351_v42, %v6135_v18  ;;  %v459_v61 = vcombine.low %v451_v35, %v451_v35  ;;  %v6407_v22 = vrot.slane %v692_v47, %v6135_v18  ;;  %v691_v34 = vcombine.high %v6265_v44, %v6265_v44 }
  0xc4   :  { %319 = vrot.lane.b32.xlu1 %v6325_v26, %s5945_s1  ;;  %v761_v23 = vcombine.high %v6240_v33, %v6240_v33  ;;  %v236_v37 = vrot.slane %v222_v31, %v6135_v18  ;;  %v936_v44 = vcombine.high %v6335_v27, %v6335_v27  ;;  %v443_v33 = vcombine.low %v441_v4, %v441_v4 }
  0xc5   :  { %v793_v41 = vcombine.low %v785_v50, %v785_v50  ;;  %v310_v19 = vcombine.high %v6325_v26, %v6325_v26  ;;  %v910_v39 = vrot.slane %v908_v40, 6  ;;  %v778_v26 = vcombine.high %v6351_v42, %v6351_v42 }
  0xc6   :  { %v775_v32 = vrot.slane %v761_v23, %v6135_v18  ;;  %v221_v42 = vcombine.high %v6364_v53, %v6364_v53  ;;  %v707_v62 = vcombine.high %v6407_v22, %v6407_v22  ;;  %v6502_v25 = vrot.slane %v6496_v17, %v6113_v11 }
  0xc7   :  { %954 = vrot.lane.b32.xlu0 %v6335_v27, %s5952_s29  ;;  %v530_v27 = vcombine.low %v522_v5, %v522_v5  ;;  %v913_v51 = vsel %vm105_vm9, %v909_v55, %v910_v39  ;;  %v6515_v30 = vrot.slane %v6496_v17, %v6119_v13  ;;  %v6525_v31 = vrot.slane %v6496_v17, %v6116_v12 }
  0xc8   :  { %634 = vrot.lane.b32.xlu1 %v620_v20, %s5944_s21  ;;  %v546_v20 = vrot.slane %v512_v9, %v6135_v18  ;;  %v777_v38 = vcombine.low %v775_v32, %v775_v32  ;;  %v914_v45 = vsel %vm8818_vm4, %v913_v51, %v908_v40  ;;  %vm809_vm4 = vcmask 564224  }
  0xc9   :  { %vm8824_vm15 = vcmask 777216  }
  0xca   :  { %v548_v57 = vcombine.low %v546_v20, %v546_v20 }
  0xcb   :  { %471 = vrot.lane.b32.xlu0 %v451_v35, %s8813_s23  ;;  %v237_v35 = vcombine.high %v6311_v63, %v6311_v63 }
  0xcc   :  { %720 = vrot.lane.b32.xlu1 %v706_v2, %s8809_s2  ;;  %v532_v2 = vcombine.low %v512_v9, %v512_v9 }
  0xcf   :  { %632 = vrot.lane.b32.xlu0 %v621_v43, %s5944_s21  ;;  %v539_v43 = vrot.slane %v532_v2, %v6135_v18 }
  0xd0   :  { %880 = vrot.lane.b32.xlu1 %v867_v46, %s5946_s22  ;;  %v444_v46 = vcombine.high %v6330_v29, %v6330_v29  ;;  %v690_v29 = vcombine.high %v6377_v59, %v6377_v59 }
  0xd1   :  { %v547_v63 = vcombine.low %v539_v43, %v539_v43 }
  0xd3   :  { %805 = vrot.lane.b32.xlu0 %v785_v50, %s8807_s24  ;;  %v458_v50 = vrot.slane %v444_v46, %v6135_v18 }
  0xd4   :  { %242 = vrot.lane.b32.xlu1 %v6364_v53, %s8815_s25 }
  0xd7   :  { %878 = vrot.lane.b32.xlu0 %v858_v21, %s5946_s22  ;;  %v460_v21 = vcombine.low %v458_v50, %v458_v50 }
  0xd8   :  { %553 = vrot.lane.b32.xlu1 %v531_v54, %s8811_s3  ;;  %v792_v54 = vrot.slane %v778_v26, %v6135_v18 }
  0xda   :  { %v794_v55 = vcombine.low %v792_v54, %v792_v54 }
  0xdb   :  { %240 = vrot.lane.b32.xlu0 %v220_v56, %s8815_s25  ;;  %v918_v56 = vmul.f32 %v914_v45, %v904_v49 }
  0xdc   :  { %708 = vrot.lane.b32.xlu1 %v6377_v59, %s8809_s2 }
  0xdd   :  { %v945_v53 = vrot.slane %v918_v56, %v6135_v18 }
  0xdf   :  { %313 = vrot.lane.b32.xlu0 %v293_v60, %s5945_s1 }
  0xe0   :  { %868 = vrot.lane.b32.xlu1 %v849_v36, %s5946_s22  ;;  %v937_v36 = vcombine.high %v6392_v7, %v6392_v7 }
  0xe3   :  { %551 = vrot.lane.b32.xlu0 %v522_v5, %s8811_s3  ;;  %v938_v5 = vcombine.high %v918_v56, %v918_v56 }
  0xe4   :  { %958 = vrot.lane.b32.xlu1 %v6392_v7, %s5952_s29 }
  0xe5   :  { %v952_v8 = vrot.slane %v938_v5, %v6135_v18 }
  0xe7   :  { %461 = vrot.lane.b32.xlu0 %v442_v58, %s8813_s23 }
  0xe8   :  { %469 = vrot.lane.b32.xlu1 %v459_v61, %s8813_s23  ;;  %v953_v61 = vcombine.high %v945_v53, %v945_v53 }
  0xeb   :  { %795 = vrot.lane.b32.xlu0 %v776_v1, %s8807_s24 }
  0xec   :  { %716 = vrot.lane.b32.xlu1 %v6407_v22, %s8809_s2  ;;  %v5953_v22 = vmov 0  }
  0xed   :  { %5823 = vset.pattern.permute.xlu1 %v5953_v22  ;;  %5824 = vset.pattern.permute.xlu0 %v5953_v22 }
  0xef   :  { %467 = vrot.lane.b32.xlu0 %v441_v4, %s8813_s23 }
  0xf0   :  { %803 = vrot.lane.b32.xlu1 %v793_v41, %s8807_s24  ;;  %v6506_v41 = vrot.slane %v6496_v17, %v6110_v10 }
  0xf3   :  { %628 = vrot.lane.b32.xlu0 %v605_v24, %s5944_s21 }
  0xf4   :  { %876 = vrot.lane.b32.xlu1 %v866_v48, %s5946_s22 }
  0xf7   :  { %714 = vrot.lane.b32.xlu0 %v691_v34, %s8809_s2  ;;  %v6530_v34 = vld [vmem:[%s8795_s14 + $0x1] ss:$2 sm:$0x7f]  ;;  %s8837_s14 = smov 95  }
  0xf8   :  { %250 = vrot.lane.b32.xlu1 %v236_v37, %s8815_s25  ;;  %v6538_v37 = vrot.slane %v6530_v34, %v6110_v10  ;;  %v6562_v2 = vrot.slane %v6530_v34, %v6113_v11 }
  0xfb   :  { %801 = vrot.lane.b32.xlu0 %v775_v32, %s8807_s24  ;;  %v6546_v32 = vrot.slane %v6496_v17, %v6122_v14 }
  0xfc   :  { %561 = vrot.lane.b32.xlu1 %v548_v57, %s8811_s3 }
  0xff   :  { %956 = vrot.lane.b32.xlu0 %v936_v44, %s5952_s29  ;;  %v6552_v44 = vrot.slane %v6530_v34, %v6116_v12  ;;  %v6570_v12 = vrot.slane %v6530_v34, %v6122_v14 }
 0x100   :  { %465 = vrot.lane.b32.xlu1 %v443_v33, %s8813_s23 }
 0x103   :  { %248 = vrot.lane.b32.xlu0 %v237_v35, %s8815_s25 }
 0x104   :  { %799 = vrot.lane.b32.xlu1 %v777_v38, %s8807_s24 }
 0x107   :  { %321 = vrot.lane.b32.xlu0 %v310_v19, %s5945_s1 }
 0x108   :  { %549 = vrot.lane.b32.xlu1 %v530_v27, %s8811_s3  ;;  %v6576_v27 = vrot.slane %v6530_v34, %v6119_v13 }
 0x10b   :  { %559 = vrot.lane.b32.xlu0 %v539_v43, %s8811_s3 }
 0x10c   :  { %557 = vrot.lane.b32.xlu1 %v547_v63, %s8811_s3  ;;  %s8832_s3 = sld [smem:[#allocation19_spill]] }
 0x10f   :  { %710 = vrot.lane.b32.xlu0 %v690_v29, %s8809_s2 }
 0x110   :  { %473 = vrot.lane.b32.xlu1 %v460_v21, %s8813_s23  ;;  %s5975_s23 = smov 8  }
 0x112   :  { %v1011_v1 = vld [vmem:[%s8832_s3] sm:$0xff]  ;;  %s8858_s3 = sld [smem:[#allocation21_spill]] }
 0x113   :  { %244 = vrot.lane.b32.xlu0 %v221_v42, %s8815_s25  ;;  %s5956_s25 = smov 127  }
 0x114   :  { %807 = vrot.lane.b32.xlu1 %v794_v55, %s8807_s24  ;;  %s8836_s24 = smov 97  }
 0x115   :  { %v623_v59 = vpop.permute.xlu0 %622  ;;  %v6469_v60 = vpop.permute.xlu1 %315 }
 0x117   :  { %718 = vrot.lane.b32.xlu0 %v707_v62, %s8809_s2  ;;  %s5957_s2 = smov 100  }
 0x118   :  { %960 = vrot.lane.b32.xlu1 %v937_v36, %s5952_s29 }
 0x119   :  { %v6478_v52 = vpop.permute.xlu0 %874 }
 0x11a   :  { %v6480_v58 = vpop.permute.xlu1 %630 }
 0x11b   :  { %962 = vrot.lane.b32.xlu0 %v945_v53, %s5952_s29 }
 0x11c   :  { %964 = vrot.lane.b32.xlu1 %v953_v61, %s5952_s29 }
 0x11d   :  { %v6484_v47 = vpop.permute.xlu0 %463 }
 0x11e   :  { %v6487_v7 = vpop.permute.xlu1 %323 }
 0x11f   :  { %966 = vrot.lane.b32.xlu0 %v952_v8, %s5952_s29  ;;  %346 = vst.msk [vmem:[#allocation3 + $0x30] sm:$0xc] %vm8817_vm5, %v6487_v7 }
 0x120   :  { %1014 = vperm.xlu1 %5823, %v1011_v1  }
 0x121   :  { %v625_v4 = vpop.permute.xlu0 %624 }
 0x122   :  { %v637_v16 = vsel %vm636_vm6, %v623_v59, %v625_v4  ;;  %v6509_v24 = vpop.permute.xlu1 %626 }
 0x123   :  { %650 = vst [vmem:[#allocation3 + $0x38] sm:$0x3] %v637_v16  ;;  %1426 = vrot.lane.b32.xlu0 %v6502_v25, %s5941_s30  ;;  %v638_v9 = vsel %vm636_vm6, %v625_v4, %v6509_v24 }
 0x124   :  { %651 = vst [vmem:[#allocation3 + $0x40] sm:$0x3] %v638_v9  ;;  %1424 = vrot.lane.b32.xlu1 %v6506_v41, %s5941_s30 }
 0x125   :  { %v6519_v48 = vpop.permute.xlu0 %797 }
 0x126   :  { %v6532_v23 = vpop.permute.xlu1 %712 }
 0x127   :  { %1430 = vrot.lane.b32.xlu0 %v6515_v30, %s5941_s30 }
 0x128   :  { %1428 = vrot.lane.b32.xlu1 %v6525_v31, %s5941_s30 }
 0x129   :  { %v6540_v20 = vpop.permute.xlu0 %870 }
 0x12a   :  { %v873_v57 = vpop.permute.xlu1 %872 }
 0x12b   :  { %1583 = vrot.lane.b32.xlu0 %v6538_v37, %s5938_s27  ;;  %v884_v33 = vsel %vm8820_vm7, %v6540_v20, %v873_v57  ;;  %v885_v35 = vsel %vm8820_vm7, %v873_v57, %v6478_v52  ;;  %v1419_v57 = vrot.slane %v6496_v17, %v6125_v15 }
 0x12c   :  { %897 = vst [vmem:[#allocation3 + $0x40] sm:$0xc0] %v884_v33  ;;  %898 = vst [vmem:[#allocation3 + $0x48] sm:$0xc0] %v885_v35  ;;  %1432 = vrot.lane.b32.xlu1 %v6546_v32, %s5941_s30  ;;  %v6687_v35 = vrot.slane %v6530_v34, %v6150_v28 }
 0x12d   :  { %v239_v38 = vpop.permute.xlu0 %238 }
 0x12e   :  { %v6564_v19 = vpop.permute.xlu1 %311 }
 0x12f   :  { %1587 = vrot.lane.b32.xlu0 %v6552_v44, %s5938_s27 }
 0x130   :  { %1585 = vrot.lane.b32.xlu1 %v6562_v2, %s5938_s27 }
 0x131   :  { %v318_v40 = vpop.permute.xlu0 %317 }
 0x132   :  { %v328_v43 = vsel %vm325_vm8, %v6469_v60, %v318_v40  ;;  %v6580_v46 = vpop.permute.xlu1 %246 }
 0x133   :  { %341 = vst [vmem:[#allocation3 + $0x10] sm:$0xc] %v328_v43  ;;  %1591 = vrot.lane.b32.xlu0 %v6570_v12, %s5938_s27 }
 0x134   :  { %1589 = vrot.lane.b32.xlu1 %v6576_v27, %s5938_s27 }
 0x135   :  { %v6584_v39 = vpop.permute.xlu0 %555 }
 0x136   :  { %v6588_v14 = vpop.permute.xlu1 %319 }
 0x137   :  { %1667 = vrot.lane.b32.xlu0 %v6502_v25, %s5942_s0  ;;  %v329_v13 = vsel %vm325_vm8, %v318_v40, %v6588_v14 }
 0x138   :  { %342 = vst [vmem:[#allocation3 + $0x18] sm:$0xc] %v329_v13  ;;  %1665 = vrot.lane.b32.xlu1 %v6506_v41, %s5942_s0 }
 0x139   :  { %v6594_v63 = vpop.permute.xlu0 %954 }
 0x13a   :  { %v635_v50 = vpop.permute.xlu1 %634 }
 0x13b   :  { %1671 = vrot.lane.b32.xlu0 %v6515_v30, %s5942_s0  ;;  %656 = vst.msk [vmem:[#allocation3 + $0x68] sm:$0x3] %vm272_vm10, %v635_v50 }
 0x13c   :  { %1669 = vrot.lane.b32.xlu1 %v6525_v31, %s5942_s0 }
 0x13d   :  { %v6601_v26 = vpop.permute.xlu0 %471 }
 0x13e   :  { %v6605_v51 = vpop.permute.xlu1 %720 }
 0x13f   :  { %1795 = vrot.lane.b32.xlu0 %v6538_v37, %s5940_s4  ;;  %742 = vst.msk [vmem:[#allocation3 + $0x68] sm:$0xc] %vm8817_vm5, %v6605_v51  ;;  %vm475_vm5 = vcmask 1006592  }
 0x140   :  { %1673 = vrot.lane.b32.xlu1 %v6546_v32, %s5942_s0 }
 0x141   :  { %v633_v29 = vpop.permute.xlu0 %632 }
 0x142   :  { %v641_v21 = vsel %vm636_vm6, %v6480_v58, %v633_v29  ;;  %v642_v54 = vsel %vm636_vm6, %v633_v29, %v635_v50  ;;  %v881_v45 = vpop.permute.xlu1 %880 }
 0x143   :  { %654 = vst [vmem:[#allocation3 + $0x58] sm:$0x3] %v641_v21  ;;  %655 = vst [vmem:[#allocation3 + $0x60] sm:$0x3] %v642_v54  ;;  %1799 = vrot.lane.b32.xlu0 %v6552_v44, %s5940_s4 }
 0x144   :  { %902 = vst.msk [vmem:[#allocation3 + $0x68] sm:$0xc0] %vm583_vm11, %v881_v45  ;;  %1797 = vrot.lane.b32.xlu1 %v6562_v2, %s5940_s4 }
 0x145   :  { %v6619_v42 = vpop.permute.xlu0 %805 }
 0x146   :  { %v6623_v49 = vpop.permute.xlu1 %242 }
 0x147   :  { %1803 = vrot.lane.b32.xlu0 %v6570_v12, %s5940_s4 }
 0x148   :  { %1801 = vrot.lane.b32.xlu1 %v6576_v27, %s5940_s4 }
 0x149   :  { %v6627_v56 = vpop.permute.xlu0 %878 }
 0x14a   :  { %v888_v55 = vsel %vm8820_vm7, %v6627_v56, %v881_v45  ;;  %v554_v59 = vpop.permute.xlu1 %553 }
 0x14b   :  { %901 = vst [vmem:[#allocation3 + $0x60] sm:$0xc0] %v888_v55  ;;  %1879 = vrot.lane.b32.xlu0 %v6502_v25, %s5939_s28  ;;  %v566_v62 = vsel %vm563_vm12, %v554_v59, %v6584_v39 }
 0x14c   :  { %579 = vst [vmem:[#allocation3 + $0x10] sm:$0xc0] %v566_v62  ;;  %1877 = vrot.lane.b32.xlu1 %v6506_v41, %s5939_s28 }
 0x14d   :  { %v241_v36 = vpop.permute.xlu0 %240 }
 0x14e   :  { %v253_v53 = vsel %vm8825_vm13, %v239_v38, %v241_v36  ;;  %v254_v5 = vsel %vm8825_vm13, %v241_v36, %v6623_v49  ;;  %v6642_v61 = vpop.permute.xlu1 %708 }
 0x14f   :  { %266 = vst [vmem:[#allocation3] sm:$0x3] %v253_v53  ;;  %267 = vst [vmem:[#allocation3 + $0x8] sm:$0x3] %v254_v5  ;;  %1883 = vrot.lane.b32.xlu0 %v6515_v30, %s5939_s28 }
 0x150   :  { %1881 = vrot.lane.b32.xlu1 %v6525_v31, %s5939_s28 }
 0x151   :  { %v314_v8 = vpop.permute.xlu0 %313 }
 0x152   :  { %v326_v1 = vsel %vm325_vm8, %v6564_v19, %v314_v8  ;;  %v327_v22 = vsel %vm325_vm8, %v314_v8, %v6469_v60  ;;  %v869_v25 = vpop.permute.xlu1 %868 }
 0x153   :  { %339 = vst [vmem:[#allocation3] sm:$0xc] %v326_v1  ;;  %340 = vst [vmem:[#allocation3 + $0x8] sm:$0xc] %v327_v22  ;;  %2007 = vrot.lane.b32.xlu0 %v6538_v37, %s5943_s7  ;;  %v883_v4 = vsel %vm8820_vm7, %v869_v25, %v6540_v20  ;;  %v1423_v37 = vrot.slane %v6496_v17, %v6150_v28 }
 0x154   :  { %896 = vst [vmem:[#allocation3 + $0x38] sm:$0xc0] %v883_v4  ;;  %1885 = vrot.lane.b32.xlu1 %v6546_v32, %s5939_s28 }
 0x155   :  { %v6656_v41 = vpop.permute.xlu0 %551 }
 0x156   :  { %v565_v16 = vsel %vm563_vm12, %v6656_v41, %v554_v59  ;;  %v6662_v60 = vpop.permute.xlu1 %958 }
 0x157   :  { %578 = vst [vmem:[#allocation3 + $0x8] sm:$0xc0] %v565_v16  ;;  %2011 = vrot.lane.b32.xlu0 %v6552_v44, %s5943_s7 }
 0x158   :  { %2009 = vrot.lane.b32.xlu1 %v6562_v2, %s5943_s7  ;;  %v6692_v2 = vrot.slane %v6530_v34, %v6125_v15 }
 0x159   :  { %v462_v30 = vpop.permute.xlu0 %461 }
 0x15a   :  { %v476_v9 = vsel %vm475_vm5, %v462_v30, %v6484_v47  ;;  %v470_v31 = vpop.permute.xlu1 %469 }
 0x15b   :  { %489 = vst [vmem:[#allocation3] sm:$0x30] %v476_v9  ;;  %2015 = vrot.lane.b32.xlu0 %v6570_v12, %s5943_s7  ;;  %v480_v20 = vsel %vm475_vm5, %v470_v31, %v6601_v26 }
 0x15c   :  { %493 = vst [vmem:[#allocation3 + $0x20] sm:$0x30] %v480_v20  ;;  %2013 = vrot.lane.b32.xlu1 %v6576_v27, %s5943_s7 }
 0x15d   :  { %v796_v32 = vpop.permute.xlu0 %795 }
 0x15e   :  { %v810_v44 = vsel %vm809_vm4, %v796_v32, %v6519_v48  ;;  %v6682_v33 = vpop.permute.xlu1 %716 }
 0x15f   :  { %823 = vst [vmem:[#allocation3 + $0x38] sm:$0x30] %v810_v44  ;;  %1436 = vrot.lane.b32.xlu0 %v1423_v37, %s5941_s30 }
 0x160   :  { %1434 = vrot.lane.b32.xlu1 %v1419_v57, %s5941_s30 }
 0x161   :  { %v468_v38 = vpop.permute.xlu0 %467 }
 0x162   :  { %v479_v17 = vsel %vm475_vm5, %v468_v38, %v470_v31  ;;  %v804_v19 = vpop.permute.xlu1 %803 }
 0x163   :  { %492 = vst [vmem:[#allocation3 + $0x18] sm:$0x30] %v479_v17  ;;  %1595 = vrot.lane.b32.xlu0 %v6687_v35, %s5938_s27  ;;  %v814_v12 = vsel %vm809_vm4, %v804_v19, %v6619_v42 }
 0x164   :  { %827 = vst [vmem:[#allocation3 + $0x58] sm:$0x30] %v814_v12  ;;  %1593 = vrot.lane.b32.xlu1 %v6692_v2, %s5938_s27  ;;  %s8838_s27 = smov 69  }
 0x165   :  { %v629_v28 = vpop.permute.xlu0 %628 }
 0x166   :  { %v639_v40 = vsel %vm636_vm6, %v6509_v24, %v629_v28  ;;  %v640_v15 = vsel %vm636_vm6, %v629_v28, %v6480_v58  ;;  %v877_v34 = vpop.permute.xlu1 %876 }
 0x167   :  { %652 = vst [vmem:[#allocation3 + $0x48] sm:$0x3] %v639_v40  ;;  %653 = vst [vmem:[#allocation3 + $0x50] sm:$0x3] %v640_v15  ;;  %1677 = vrot.lane.b32.xlu0 %v1423_v37, %s5942_s0  ;;  %v886_v27 = vsel %vm8820_vm7, %v6478_v52, %v877_v34  ;;  %v887_v43 = vsel %vm8820_vm7, %v877_v34, %v6627_v56  ;;  %vm8821_vm7 = vcmask 547840  }
 0x168   :  { %899 = vst [vmem:[#allocation3 + $0x50] sm:$0xc0] %v886_v27  ;;  %900 = vst [vmem:[#allocation3 + $0x58] sm:$0xc0] %v887_v43  ;;  %1675 = vrot.lane.b32.xlu1 %v1419_v57, %s5942_s0 }
 0x169   :  { %v715_v13 = vpop.permute.xlu0 %714 }
 0x16a   :  { %v725_v58 = vsel %vm8824_vm15, %v6532_v23, %v715_v13  ;;  %v726_v24 = vsel %vm8824_vm15, %v715_v13, %v6682_v33  ;;  %v251_v50 = vpop.permute.xlu1 %250 }
 0x16b   :  { %738 = vst [vmem:[#allocation3 + $0x48] sm:$0xc] %v725_v58  ;;  %739 = vst [vmem:[#allocation3 + $0x50] sm:$0xc] %v726_v24  ;;  %1807 = vrot.lane.b32.xlu0 %v6687_v35, %s5940_s4 }
 0x16c   :  { %273 = vst.msk [vmem:[#allocation3 + $0x30] sm:$0x3] %vm272_vm10, %v251_v50  ;;  %1805 = vrot.lane.b32.xlu1 %v6692_v2, %s5940_s4  ;;  %s5967_s4 = smov 98  }
 0x16d   :  { %v802_v52 = vpop.permute.xlu0 %801 }
 0x16e   :  { %v813_v29 = vsel %vm809_vm4, %v802_v52, %v804_v19  ;;  %v562_v21 = vpop.permute.xlu1 %561 }
 0x16f   :  { %826 = vst [vmem:[#allocation3 + $0x50] sm:$0x30] %v813_v29  ;;  %1889 = vrot.lane.b32.xlu0 %v1423_v37, %s5939_s28  ;;  %584 = vst.msk [vmem:[#allocation3 + $0x30] sm:$0xc0] %vm583_vm11, %v562_v21  ;;  %vm495_vm11 = vcmask 128004  }
 0x170   :  { %1887 = vrot.lane.b32.xlu1 %v1419_v57, %s5939_s28  ;;  %s8833_s28 = sld [smem:[#allocation18_spill]] }
 0x171   :  { %v957_v54 = vpop.permute.xlu0 %956 }
 0x172   :  { %v969_v45 = vsel %vm8821_vm7, %v6594_v63, %v957_v54  ;;  %v970_v56 = vsel %vm8821_vm7, %v957_v54, %v6662_v60  ;;  %v466_v55 = vpop.permute.xlu1 %465 }
 0x173   :  { %982 = vst [vmem:[#allocation3 + $0x70] sm:$0x3] %v969_v45  ;;  %983 = vst [vmem:[#allocation3 + $0x78] sm:$0x3] %v970_v56  ;;  %v477_v59 = vsel %vm475_vm5, %v6484_v47, %v466_v55  ;;  %v478_v62 = vsel %vm475_vm5, %v466_v55, %v468_v38 }
 0x174   :  { %490 = vst [vmem:[#allocation3 + $0x8] sm:$0x30] %v477_v59  ;;  %491 = vst [vmem:[#allocation3 + $0x10] sm:$0x30] %v478_v62 }
 0x175   :  { %v249_v36 = vpop.permute.xlu0 %248 }
 0x176   :  { %v257_v53 = vsel %vm8825_vm13, %v6580_v46, %v249_v36  ;;  %v258_v5 = vsel %vm8825_vm13, %v249_v36, %v251_v50  ;;  %v800_v63 = vpop.permute.xlu1 %799  ;;  %v1000_v43 = vld [vmem:[#allocation3 + $0x50] sm:$0xff] }
 0x177   :  { %270 = vst [vmem:[#allocation3 + $0x20] sm:$0x3] %v257_v53  ;;  %271 = vst [vmem:[#allocation3 + $0x28] sm:$0x3] %v258_v5  ;;  %v811_v8 = vsel %vm809_vm4, %v6519_v48, %v800_v63  ;;  %v812_v1 = vsel %vm809_vm4, %v800_v63, %v802_v52 }
 0x178   :  { %824 = vst [vmem:[#allocation3 + $0x40] sm:$0x30] %v811_v8  ;;  %825 = vst [vmem:[#allocation3 + $0x48] sm:$0x30] %v812_v1 }
 0x179   :  { %v322_v47 = vpop.permute.xlu0 %321 }
 0x17a   :  { %v330_v22 = vsel %vm325_vm8, %v6588_v14, %v322_v47  ;;  %v331_v25 = vsel %vm325_vm8, %v322_v47, %v6487_v7  ;;  %v550_v4 = vpop.permute.xlu1 %549  ;;  %v1005_v27 = vld [vmem:[#allocation3 + $0x78] sm:$0x3]  ;;  %v1004_v54 = vld [vmem:[#allocation3 + $0x70] sm:$0x3] }
 0x17b   :  { %343 = vst [vmem:[#allocation3 + $0x20] sm:$0xc] %v330_v22  ;;  %344 = vst [vmem:[#allocation3 + $0x28] sm:$0xc] %v331_v25  ;;  %v564_v16 = vsel %vm563_vm12, %v550_v4, %v6656_v41  ;;  %v991_v38 = vld [vmem:[#allocation3 + $0x8] sm:$0xff]  ;;  %v5954_v22 = vmov 0.0|0.0  }
 0x17c   :  { %577 = vst [vmem:[#allocation3] sm:$0xc0] %v564_v16 }
 0x17d   :  { %v560_v30 = vpop.permute.xlu0 %559 }
 0x17e   :  { %v569_v48 = vsel %vm563_vm12, %v560_v30, %v562_v21  ;;  %v558_v9 = vpop.permute.xlu1 %557 }
 0x17f   :  { %582 = vst [vmem:[#allocation3 + $0x28] sm:$0xc0] %v569_v48  ;;  %v567_v31 = vsel %vm563_vm12, %v6584_v39, %v558_v9  ;;  %v568_v14 = vsel %vm563_vm12, %v558_v9, %v560_v30  ;;  %v999_v58 = vld [vmem:[#allocation3 + $0x48] sm:$0xff] }
 0x180   :  { %580 = vst [vmem:[#allocation3 + $0x18] sm:$0xc0] %v567_v31  ;;  %581 = vst [vmem:[#allocation3 + $0x20] sm:$0xc0] %v568_v14 }
 0x181   :  { %v711_v7 = vpop.permute.xlu0 %710 }
 0x182   :  { %v723_v37 = vsel %vm8824_vm15, %v6642_v61, %v711_v7  ;;  %v724_v41 = vsel %vm8824_vm15, %v711_v7, %v6532_v23  ;;  %v474_v20 = vpop.permute.xlu1 %473 }
 0x183   :  { %736 = vst [vmem:[#allocation3 + $0x38] sm:$0xc] %v723_v37  ;;  %737 = vst [vmem:[#allocation3 + $0x40] sm:$0xc] %v724_v41  ;;  %v481_v32 = vsel %vm475_vm5, %v6601_v26, %v474_v20  ;;  %v990_v12 = vld [vmem:[#allocation3] sm:$0xff] }
 0x184   :  { %496 = vst.msk [vmem:[#allocation3 + $0x30] sm:$0x30] %vm495_vm11, %v474_v20  ;;  %494 = vst [vmem:[#allocation3 + $0x28] sm:$0x30] %v481_v32 }
 0x185   :  { %v245_v39 = vpop.permute.xlu0 %244 }
 0x186   :  { %v255_v57 = vsel %vm8825_vm13, %v6623_v49, %v245_v39  ;;  %v256_v44 = vsel %vm8825_vm13, %v245_v39, %v6580_v46  ;;  %v808_v61 = vpop.permute.xlu1 %807 }
 0x187   :  { %268 = vst [vmem:[#allocation3 + $0x10] sm:$0x3] %v255_v57  ;;  %269 = vst [vmem:[#allocation3 + $0x18] sm:$0x3] %v256_v44  ;;  %v815_v23 = vsel %vm809_vm4, %v6619_v42, %v808_v61  ;;  %v994_v45 = vld [vmem:[#allocation3 + $0x20] sm:$0xff] }
 0x188   :  { %829 = vst.msk [vmem:[#allocation3 + $0x68] sm:$0x30] %vm495_vm11, %v808_v61  ;;  %828 = vst [vmem:[#allocation3 + $0x60] sm:$0x30] %v815_v23  ;;  %vm1017_vm11 = vcmask 146432  }
 0x189   :  { %v719_v26 = vpop.permute.xlu0 %718 }
 0x18a   :  { %v727_v17 = vsel %vm8824_vm15, %v6682_v33, %v719_v26  ;;  %v728_v49 = vsel %vm8824_vm15, %v719_v26, %v6605_v51  ;;  %v998_v19 = vld [vmem:[#allocation3 + $0x40] sm:$0xff]  ;;  %v997_v46 = vld [vmem:[#allocation3 + $0x38] sm:$0xff]  ;;  %v961_v28 = vpop.permute.xlu1 %960 }
 0x18b   :  { %740 = vst [vmem:[#allocation3 + $0x58] sm:$0xc] %v727_v17  ;;  %741 = vst [vmem:[#allocation3 + $0x60] sm:$0xc] %v728_v49  ;;  %v5169_v40 = vpack.c.bf16 %v998_v19, %v991_v38  ;;  %v5171_v15 = vpack.c.bf16 %v997_v46, %v990_v12  ;;  %v971_v42 = vsel %vm8821_vm7, %v6662_v60, %v961_v28  ;;  %v989_v60 = vld [vmem:[%s8833_s28] sm:$0xff]  ;;  %v995_v55 = vld [vmem:[#allocation3 + $0x28] sm:$0xff] }
 0x18c   :  { %984 = vst [vmem:[#allocation3 + $0x80] sm:$0x3] %v971_v42  ;;  %v996_v1 = vld [vmem:[#allocation3 + $0x30] sm:$0xff]  ;;  %s5966_s28 = smov 99  }
 0x18d   :  { %5170 = vmatprep.subr.bf16.mxu0 %v5169_v40  ;;  %v963_v34 = vpop.permute.xlu0 %962 }
 0x18e   :  { %v972_v33 = vsel %vm8821_vm7, %v961_v28, %v963_v34  ;;  %5172 = vmatpush1.bf16.msra.mxu0 %v5171_v15  ;;  %v993_v51 = vld [vmem:[#allocation3 + $0x18] sm:$0xff]  ;;  %v992_v13 = vld [vmem:[#allocation3 + $0x10] sm:$0xff]  ;;  %v965_v24 = vpop.permute.xlu1 %964 }
 0x18f   :  { %985 = vst [vmem:[#allocation3 + $0x88] sm:$0x3] %v972_v33  ;;  %5029 = vmatprep.subr.msk.mxu0 %vm105_vm9, %v1005_v27  ;;  %v5173_v50 = vpack.c.bf16 %v1000_v43, %v993_v51  ;;  %v5175_v52 = vpack.c.bf16 %v999_v58, %v992_v13  ;;  %v973_v29 = vsel %vm8821_vm7, %v963_v34, %v965_v24  ;;  %v1003_v5 = vld [vmem:[#allocation3 + $0x68] sm:$0xff] }
 0x190   :  { %986 = vst [vmem:[#allocation3 + $0x90] sm:$0x3] %v973_v29  ;;  %v5182_v47 = vpack.c.bf16 %v1003_v5, %v996_v1 }
 0x191   :  { %5174 = vmatprep.subr.bf16.mxu1 %v5173_v50  ;;  %v967_v21 = vpop.permute.xlu0 %966 }
 0x192   :  { %v974_v56 = vsel %vm8821_vm7, %v965_v24, %v967_v21  ;;  %988 = vst.msk [vmem:[#allocation3 + $0xa0] sm:$0x3] %vm272_vm10, %v967_v21  ;;  %5030 = vmatpush1.msk.msra.mxu0 %vm105_vm9, %v1004_v54  ;;  %5176 = vmatpush1.bf16.msra.mxu1 %v5175_v52  ;;  %v1002_v59 = vld [vmem:[#allocation3 + $0x60] sm:$0xff]  ;;  %v1001_v62 = vld [vmem:[#allocation3 + $0x58] sm:$0xff]  ;;  %vm5955_vm10 = vmmov 0   ;;  %vm8823_vm7 = vcmask 130048  }
 0x193   :  { %987 = vst [vmem:[#allocation3 + $0x98] sm:$0x3] %v974_v56  ;;  %5031 = vmatmul.mubr.msk.f32.vlgmr.msra.gmra.mrb[0].mxu0 %vm1017_vm11, %v989_v60  ;;  %v5177_v36 = vpack.c.bf16 %v1002_v59, %v995_v55  ;;  %v5179_v53 = vpack.c.bf16 %v1001_v62, %v994_v45  ;;  %v1006_v8 = vld [vmem:[#allocation3 + $0x80] sm:$0x3]  ;;  %2711 = vst.msk [vmem:[#allocation7] sm:$0xff] %vm8823_vm7, %v5936_v6 }
 0x194   :  { %1248 = vmatprep.mubr.f32.mxu0 %v5936_v6  ;;  %2712 = vst.msk [vmem:[#allocation7 + $0x10] sm:$0xff] %vm8823_vm7, %v5936_v6 }
 0x195   :  { %5178 = vmatprep.subr.bf16.mxu0 %v5177_v36  ;;  %v6795_v30 = vpop.permute.xlu0 %1426 }
 0x196   :  { %5180 = vmatpush1.bf16.msra.mxu0 %v5179_v53  ;;  %v1007_v63 = vld [vmem:[#allocation3 + $0x88] sm:$0x3] }
 0x197   :  { %5032 = vmatprep.subr.msk.mxu1 %vm105_vm9, %v1007_v63  ;;  %v1008_v4 = vld [vmem:[#allocation3 + $0x90] sm:$0x3] }
 0x198   :  { %5033 = vmatpush1.msk.msra.mxu1 %vm105_vm9, %v1006_v8 }
 0x199   :  { %5034 = vmatmul.mubr.msk.f32.vlgmr.msra.gmra.mrb[0].mxu1 %vm1017_vm11, %v989_v60  ;;  %5181 = vmatprep.subr.bf16.mxu1 %v5954_v22  ;;  %v1010_v16 = vld [vmem:[#allocation3 + $0xa0] sm:$0x3]  ;;  %v6801_v20 = vpop.permute.xlu0 %1430 }
 0x19a   :  { %5183 = vmatpush3.bf16.msra.mxu1 %v5182_v47  ;;  %v1009_v25 = vld [vmem:[#allocation3 + $0x98] sm:$0x3]  ;;  %5131 = vmatprep.mubr.msk.f32.mxu1 %vm5955_vm10, %v5936_v6  ;;  %vm1384_vm10 = vcmask 392192  }
 0x19b   :  { %5035 = vmatprep.subr.msk.mxu0 %vm105_vm9, %v1009_v25  ;;  %5129 = vmatprep.subr.mxu1 %v5936_v6 }
 0x19c   :  { %5036 = vmatpush1.msk.msra.mxu0 %vm105_vm9, %v1008_v4 }
 0x19d   :  { %5037 = vmatmul.mubr.msk.f32.vlgmr.msra.gmra.mrb[2].mxu0 %vm1017_vm11, %v989_v60  ;;  %v6814_v19 = vpop.permute.xlu0 %1583 }
 0x19e   :  { %5130 = vmatpush3.msk.msra.mxu1 %vm105_vm9, %v1010_v16  ;;  %2230 = vmatprep.mubr.f32.mxu0 %v5936_v6  ;;  %vm1341_vm9 = vcmask 654720  }
 0x19f   :  { %5132 = vmatmul.mubr.msk.f32.vlgmr.msra.gmra.mrb[2].mxu1 %vm1017_vm11, %v989_v60  ;;  %v1015_v48 = vpop.permute.xlu1 %1014  ;;  %1342 = vst.msk [vmem:[#allocation4 + $0x30] sm:$0xff] %vm1341_vm9, %v5936_v6  ;;  %vm1377_vm11 = vcmask 1047808   ;;  %vm8839_vm9 = vcmask 482304  }
 0x1a0   :  { %2307 = vmatprep.mubr.f32.mxu1 %v5936_v6 }
 0x1a1   :  { %v6834_v43 = vpop.permute.xlu0 %1587 }
 0x1a3   :  { %v6804_v32 = vpop.permute.xlu1 %1424 }
 0x1a5   :  { %v6839_v51 = vpop.permute.xlu0 %1591 }
 0x1a7   :  { %v6816_v12 = vpop.permute.xlu1 %1428 }
 0x1a9   :  { %v6843_v58 = vpop.permute.xlu0 %1667 }
 0x1ab   :  { %v6836_v33 = vpop.permute.xlu1 %1432 }
 0x1ad   :  { %v6847_v50 = vpop.permute.xlu0 %1671 }
 0x1af   :  { %v6841_v13 = vpop.permute.xlu1 %1585 }
 0x1b1   :  { %v6851_v29 = vpop.permute.xlu0 %1795 }
 0x1b3   :  { %v6845_v24 = vpop.permute.xlu1 %1589 }
 0x1b5   :  { %v6855_v21 = vpop.permute.xlu0 %1799 }
 0x1b7   :  { %v6849_v52 = vpop.permute.xlu1 %1665 }
 0x1b9   :  { %v6859_v45 = vpop.permute.xlu0 %1803 }
 0x1bb   :  { %v6853_v60 = vpop.permute.xlu1 %1669 }
 0x1bd   :  { %v6863_v55 = vpop.permute.xlu0 %1879 }
 0x1bf   :  { %v6857_v54 = vpop.permute.xlu1 %1673 }
 0x1c1   :  { %v6867_v62 = vpop.permute.xlu0 %1883 }
 0x1c3   :  { %v6861_v56 = vpop.permute.xlu1 %1797 }
 0x1c5   :  { %v6871_v53 = vpop.permute.xlu0 %2007 }
 0x1c7   :  { %v6865_v59 = vpop.permute.xlu1 %1801 }
 0x1c9   :  { %v6875_v63 = vpop.permute.xlu0 %2011 }
 0x1cb   :  { %v6869_v36 = vpop.permute.xlu1 %1877 }
 0x1cd   :  { %v6879_v1 = vpop.permute.xlu0 %2015 }
 0x1cf   :  { %v6873_v5 = vpop.permute.xlu1 %1881 }
 0x1d1   :  { %v6883_v25 = vpop.permute.xlu0 %1436 }
 0x1d3   :  { %v6877_v8 = vpop.permute.xlu1 %1885 }
 0x1d5   :  { %v6887_v16 = vpop.permute.xlu0 %1595 }
 0x1d7   :  { %v6881_v47 = vpop.permute.xlu1 %2009 }
 0x1db   :  { %v6885_v4 = vpop.permute.xlu1 %2013 }
 0x266   :  { %v1108_v9 = vpop.f32.mrb[0].mxu0 }
 0x267   :  { %v1109_v31 = vadd.f32 %v1108_v9, %v1015_v48  ;;  %v1110_v14 = vpop.f32.mrb[1].mxu0  ;;  %v6891_v9 = vpop.permute.xlu0 %1677 }
 0x268   :  { %v1111_v7 = vadd.f32 %v1110_v14, %v1015_v48 }
 0x269   :  { %v1325_v37 = vmax.f32 %v1109_v31, 0.0 }
 0x26a   :  { %v1326_v41 = vmax.f32 %v1111_v7, 0.0 }
 0x26b   :  { %1332 = vst [vmem:[%s8797_s16] sm:$0xff] %v1325_v37  ;;  %1350 = vrot.lane.b32.xlu0 %v1325_v37, %s5937_s26  ;;  %v6897_v7 = vpop.permute.xlu0 %1807 }
 0x26c   :  { %1333 = vst [vmem:[%s8797_s16 + $0x8] sm:$0xff] %v1326_v41  ;;  %1352 = vrot.lane.b32.xlu1 %v1326_v41, %s5937_s26  ;;  %v1179_v39 = vpop.f32.mrb[0].mxu1 }
 0x26d   :  { %v1180_v57 = vadd.f32 %v1179_v39, %v1015_v48  ;;  %v1181_v44 = vpop.f32.mrb[1].mxu1 }
 0x26e   :  { %v1182_v61 = vadd.f32 %v1181_v44, %v1015_v48 }
 0x26f   :  { %v1327_v23 = vmax.f32 %v1180_v57, 0.0  ;;  %v6901_v41 = vpop.permute.xlu0 %1889 }
 0x270   :  { %v1328_v26 = vmax.f32 %v1182_v61, 0.0  ;;  %v1250_v38 = vpop.f32.mrb[2].mxu0 }
 0x271   :  { %1334 = vst [vmem:[%s8797_s16 + $0x10] sm:$0xff] %v1327_v23  ;;  %v1251_v17 = vadd.f32 %v1250_v38, %v1015_v48  ;;  %1354 = vrot.lane.b32.xlu0 %v1327_v23, %s5937_s26  ;;  %v1252_v49 = vpop.f32.mrb[3].mxu0 }
 0x272   :  { %1335 = vst [vmem:[%s8797_s16 + $0x18] sm:$0xff] %v1328_v26  ;;  %v1253_v46 = vadd.f32 %v1252_v49, %v1015_v48  ;;  %1356 = vrot.lane.b32.xlu1 %v1328_v26, %s5937_s26  ;;  %v1321_v28 = vpop.f32.mrb[2].mxu1 }
 0x273   :  { %v1329_v40 = vmax.f32 %v1251_v17, 0.0  ;;  %v1322_v15 = vadd.f32 %v1321_v28, %v1015_v48  ;;  %v5133_v42 = vpop.f32.mrb[3].mxu1  ;;  %v6889_v48 = vpop.permute.xlu1 %1434 }
 0x274   :  { %v1330_v34 = vmax.f32 %v1253_v46, 0.0 }
 0x275   :  { %1336 = vst [vmem:[%s8797_s16 + $0x20] sm:$0xff] %v1329_v40  ;;  %v1331_v27 = vmax.f32 %v1322_v15, 0.0  ;;  %1358 = vrot.lane.b32.xlu0 %v1329_v40, %s5937_s26 }
 0x276   :  { %1337 = vst [vmem:[%s8797_s16 + $0x28] sm:$0xff] %v1330_v34  ;;  %1360 = vrot.lane.b32.xlu1 %v1330_v34, %s5937_s26 }
 0x277   :  { %1339 = vst.msk [vmem:[%s8797_s16 + $0x30] sm:$0xff] %vm8823_vm7, %v1331_v27  ;;  %v6893_v31 = vpop.permute.xlu1 %1593  ;;  %s8834_s16 = smov 125  }
 0x279   :  { %1362 = vrot.lane.b32.xlu0 %v1331_v27, %s5937_s26  ;;  %s8835_s26 = smov 123  }
 0x27b   :  { %v6895_v14 = vpop.permute.xlu1 %1675 }
 0x27f   :  { %v6899_v37 = vpop.permute.xlu1 %1805 }
 0x283   :  { %v6903_v39 = vpop.permute.xlu1 %1887 }
 0x2dd   :  { %v1351_v57 = vpop.permute.xlu0 %1350 }
 0x2de   :  { %1378 = vst.msk [vmem:[#allocation4] sm:$0xff] %vm1377_vm11, %v1351_v57  ;;  %v1353_v44 = vpop.permute.xlu1 %1352  ;;  %vm8840_vm11 = vmmov %vm8839_vm9 }
 0x2df   :  { %v6906_v61 = vsel %vm8822_vm1, %v1351_v57, %v1353_v44 }
 0x2e3   :  { %v1355_v23 = vpop.permute.xlu0 %1354 }
 0x2e4   :  { %v6909_v26 = vsel %vm8822_vm1, %v1353_v44, %v1355_v23  ;;  %v1357_v38 = vpop.permute.xlu1 %1356 }
 0x2e5   :  { %v6912_v17 = vsel %vm8822_vm1, %v1355_v23, %v1357_v38  ;;  %v6914_v49 = vld [vmem:[#allocation4] sm:$0xff] }
 0x2e6   :  { %1754 = vrot.lane.b32.xlu1 %v6914_v49, %s5944_s21  ;;  %1513 = vrot.lane.b32.xlu0 %v6914_v49, %s5945_s1  ;;  %v1451_v27 = vmul.f32 %v6914_v49, %v6804_v32  ;;  %v1610_v57 = vmul.f32 %v6914_v49, %v6814_v19  ;;  %v1692_v44 = vmul.f32 %v6914_v49, %v6849_v52 }
 0x2e7   :  { %v1359_v46 = vpop.permute.xlu0 %1358  ;;  %v1822_v23 = vmul.f32 %v6851_v29, %v6914_v49 }
 0x2e8   :  { %v6921_v28 = vsel %vm8822_vm1, %v1357_v38, %v1359_v46  ;;  %v1361_v40 = vpop.permute.xlu1 %1360  ;;  %v1904_v38 = vmul.f32 %v6869_v36, %v6914_v49 }
 0x2e9   :  { %v6924_v15 = vsel %vm8822_vm1, %v1359_v46, %v1361_v40  ;;  %v1439_v46 = vsel %vm195_vm2, %v6795_v30, %v6816_v12 }
 0x2ea   :  { %1966 = vrot.lane.b32.xlu0 %v6914_v49, %s5946_s22  ;;  %1515 = vrot.lane.b32.xlu1 %v6906_v61, %s5945_s1 }
 0x2eb   :  { %v1363_v42 = vpop.permute.xlu0 %1362 }
 0x2ec   :  { %v1369_v34 = vsel %vm8822_vm1, %v1361_v40, %v1363_v42  ;;  %v1453_v40 = vmul.f32 %v1439_v46, %v6909_v26  ;;  %v1598_v42 = vsel %vm417_vm14, %v6841_v13, %v6834_v43 }
 0x2ed   :  { %1385 = vst.msk [vmem:[#allocation4 + $0x30] sm:$0xff] %vm1384_vm10, %v1369_v34  ;;  %v1612_v34 = vmul.f32 %v1598_v42, %v6909_v26  ;;  %vm8841_vm10 = vcmask 498688  }
 0x2ee   :  { %1465 = vrot.lane.b32.xlu1 %v1451_v27, %s8834_s16  ;;  %1517 = vrot.lane.b32.xlu0 %v6909_v26, %s5945_s1  ;;  %v1680_v27 = vsel %vm505_vm3, %v6843_v58, %v6853_v60 }
 0x2f2   :  { %1624 = vrot.lane.b32.xlu1 %v1610_v57, %s8835_s26  ;;  %1706 = vrot.lane.b32.xlu0 %v1692_v44, %s8836_s24  ;;  %v1694_v57 = vmul.f32 %v1680_v27, %v6909_v26  ;;  %v1438_v44 = vsel %vm195_vm2, %v6804_v32, %v6795_v30  ;;  %v1892_v30 = vsel %vm8839_vm9, %v6863_v55, %v6873_v5 }
 0x2f3   :  { %v1906_v42 = vmul.f32 %v1892_v30, %v6909_v26 }
 0x2f6   :  { %1756 = vrot.lane.b32.xlu1 %v6906_v61, %s5944_s21  ;;  %1758 = vrot.lane.b32.xlu0 %v6909_v26, %s5944_s21 }
 0x2fa   :  { %1968 = vrot.lane.b32.xlu1 %v6906_v61, %s5946_s22  ;;  %1836 = vrot.lane.b32.xlu0 %v1822_v23, %s8837_s14  ;;  %v1810_v23 = vsel %vm665_vm0, %v6861_v56, %v6855_v21 }
 0x2fb   :  { %v1824_v46 = vmul.f32 %v1810_v23, %v6909_v26 }
 0x2fe   :  { %1918 = vrot.lane.b32.xlu1 %v1904_v38, %s8838_s27  ;;  %1970 = vrot.lane.b32.xlu0 %v6909_v26, %s5946_s22  ;;  %v1452_v38 = vmul.f32 %v1438_v44, %v6906_v61 }
 0x302   :  { %1519 = vrot.lane.b32.xlu1 %v6912_v17, %s5945_s1  ;;  %1469 = vrot.lane.b32.xlu0 %v1453_v40, %s8834_s16  ;;  %v1597_v40 = vsel %vm417_vm14, %v6814_v19, %v6841_v13  ;;  %v1809_v19 = vsel %vm665_vm0, %v6851_v29, %v6861_v56  ;;  %v1441_v29 = vsel %vm195_vm2, %v6801_v20, %v6836_v33 }
 0x303   :  { %v1611_v32 = vmul.f32 %v1597_v40, %v6906_v61  ;;  %v1823_v13 = vmul.f32 %v1809_v19, %v6906_v61  ;;  %v2021_v56 = vsel %vm8841_vm10, %v6871_v53, %v6881_v47  ;;  %v1455_v44 = vmul.f32 %v1441_v29, %v6921_v28 }
 0x304   :  { %v1681_v40 = vsel %vm505_vm3, %v6853_v60, %v6847_v50 }
 0x306   :  { %1760 = vrot.lane.b32.xlu1 %v6912_v17, %s5944_s21  ;;  %1628 = vrot.lane.b32.xlu0 %v1612_v34, %s8835_s26  ;;  %v1679_v34 = vsel %vm505_vm3, %v6849_v52, %v6843_v58  ;;  %v1891_v58 = vsel %vm8840_vm11, %v6869_v36, %v6863_v55  ;;  %v1440_v55 = vsel %vm195_vm2, %v6816_v12, %v6801_v20  ;;  %vm8842_vm11 = vmmov %vm8839_vm9 }
 0x307   :  { %v1693_v27 = vmul.f32 %v1679_v34, %v6906_v61  ;;  %v1905_v52 = vmul.f32 %v1891_v58, %v6906_v61  ;;  %v1600_v36 = vsel %vm417_vm14, %v6845_v24, %v6839_v51  ;;  %v1454_v23 = vmul.f32 %v1440_v55, %v6912_v17 }
 0x308   :  { %v1682_v20 = vsel %vm505_vm3, %v6847_v50, %v6857_v54  ;;  %v1894_v50 = vsel %vm8839_vm9, %v6867_v62, %v6877_v8  ;;  %v1893_v34 = vsel %vm8842_vm11, %v6873_v5, %v6867_v62  ;;  %vm8843_vm9 = vmmov %vm8841_vm10 }
 0x309   :  { %v2023_v19 = vsel %vm8843_vm9, %v6875_v63, %v6885_v4  ;;  %vm8844_vm1 = vmmov %vm8843_vm9 }
 0x30a   :  { %1972 = vrot.lane.b32.xlu1 %v6912_v17, %s5946_s22  ;;  %1710 = vrot.lane.b32.xlu0 %v1694_v57, %s8836_s24  ;;  %v2035_v57 = vmul.f32 %v2021_v56, %v6906_v61  ;;  %v1599_v61 = vsel %vm417_vm14, %v6834_v43, %v6845_v24  ;;  %v1812_v43 = vsel %vm665_vm0, %v6865_v59, %v6859_v45 }
 0x30b   :  { %v1613_v12 = vmul.f32 %v1599_v61, %v6912_v17  ;;  %v1695_v24 = vmul.f32 %v1681_v40, %v6912_v17  ;;  %v1826_v30 = vmul.f32 %v1812_v43, %v6921_v28  ;;  %v2024_v62 = vsel %vm8844_vm1, %v6885_v4, %v6879_v1  ;;  %vm8845_vm1 = vmmov %vm8842_vm11 }
 0x30c   :  { %v2037_v5 = vmul.f32 %v2023_v19, %v6912_v17  ;;  %v1443_v4 = vsel %vm195_vm2, %v6889_v48, %v6883_v25 }
 0x30e   :  { %1467 = vrot.lane.b32.xlu1 %v1452_v38, %s8834_s16  ;;  %1840 = vrot.lane.b32.xlu0 %v1824_v46, %s8837_s14  ;;  %v1614_v38 = vmul.f32 %v1600_v36, %v6921_v28  ;;  %v1696_v46 = vmul.f32 %v1682_v20, %v6921_v28 }
 0x312   :  { %1626 = vrot.lane.b32.xlu1 %v1611_v32, %s8835_s26  ;;  %1922 = vrot.lane.b32.xlu0 %v1906_v42, %s8838_s27  ;;  %v1811_v32 = vsel %vm665_vm0, %v6855_v21, %v6865_v59  ;;  %v1908_v42 = vmul.f32 %v1894_v50, %v6921_v28  ;;  %v2022_v21 = vsel %vm8841_vm10, %v6881_v47, %v6875_v63  ;;  %v7097_v63 = vld [vmem:[#allocation4 + $0x30] sm:$0xff] }
 0x313   :  { %v1825_v60 = vmul.f32 %v1811_v32, %v6912_v17  ;;  %v1907_v59 = vmul.f32 %v1893_v34, %v6912_v17  ;;  %v2038_v47 = vmul.f32 %v2024_v62, %v6921_v28 }
 0x316   :  { %1708 = vrot.lane.b32.xlu1 %v1693_v27, %s8836_s24  ;;  %1521 = vrot.lane.b32.xlu0 %v6921_v28, %s5945_s1  ;;  %v2036_v27 = vmul.f32 %v2022_v21, %v6909_v26  ;;  %v2034_v26 = vmul.f32 %v6871_v53, %v6914_v49  ;;  %v1442_v53 = vsel %vm195_vm2, %v6836_v33, %v6889_v48 }
 0x317   :  { %v1457_v49 = vmul.f32 %v7097_v63, %v1443_v4  ;;  %v1683_v33 = vsel %vm505_vm3, %v6857_v54, %v6895_v14  ;;  %v1813_v48 = vsel %vm665_vm0, %v6859_v45, %v6899_v37  ;;  %v1684_v54 = vsel %vm505_vm3, %v6895_v14, %v6891_v9 }
 0x318   :  { %v1814_v45 = vsel %vm665_vm0, %v6899_v37, %v6897_v7  ;;  %vm8847_vm0 = vcmask 556032  }
 0x319   :  { %v1828_v14 = vmul.f32 %v1814_v45, %v7097_v63  ;;  %vm8848_vm11 = vmmov %vm8847_vm0 }
 0x31a   :  { %1838 = vrot.lane.b32.xlu1 %v1823_v13, %s8837_s14  ;;  %1762 = vrot.lane.b32.xlu0 %v6921_v28, %s5944_s21  ;;  %v1827_v13 = vmul.f32 %v1813_v48, %v6924_v15  ;;  %vm8849_vm10 = vmmov %vm8847_vm0 }
 0x31b   :  { %vm8850_vm9 = vmmov %vm8847_vm0 }
 0x31e   :  { %1920 = vrot.lane.b32.xlu1 %v1905_v52, %s8838_s27  ;;  %1974 = vrot.lane.b32.xlu0 %v6921_v28, %s5946_s22  ;;  %v1697_v28 = vmul.f32 %v1683_v33, %v6924_v15 }
 0x322   :  { %2050 = vrot.lane.b32.xlu1 %v2035_v57, %s5952_s29  ;;  %1473 = vrot.lane.b32.xlu0 %v1455_v44, %s8834_s16 }
 0x326   :  { %1471 = vrot.lane.b32.xlu1 %v1454_v23, %s8834_s16  ;;  %1632 = vrot.lane.b32.xlu0 %v1614_v38, %s8835_s26 }
 0x32a   :  { %1630 = vrot.lane.b32.xlu1 %v1613_v12, %s8835_s26  ;;  %1714 = vrot.lane.b32.xlu0 %v1696_v46, %s8836_s24 }
 0x32e   :  { %1712 = vrot.lane.b32.xlu1 %v1695_v24, %s8836_s24  ;;  %1844 = vrot.lane.b32.xlu0 %v1826_v30, %s8837_s14 }
 0x332   :  { %1842 = vrot.lane.b32.xlu1 %v1825_v60, %s8837_s14  ;;  %1926 = vrot.lane.b32.xlu0 %v1908_v42, %s8838_s27 }
 0x336   :  { %1924 = vrot.lane.b32.xlu1 %v1907_v59, %s8838_s27  ;;  %2052 = vrot.lane.b32.xlu0 %v2036_v27, %s5952_s29 }
 0x33a   :  { %2054 = vrot.lane.b32.xlu1 %v2037_v5, %s5952_s29  ;;  %2056 = vrot.lane.b32.xlu0 %v2038_v47, %s5952_s29 }
 0x33e   :  { %2048 = vrot.lane.b32.xlu1 %v2034_v26, %s5952_s29  ;;  %2017 = vrot.lane.b32.xlu0 %v6692_v2, %s5943_s7  ;;  %v1456_v2 = vmul.f32 %v1442_v53, %v6924_v15 }
 0x342   :  { %2019 = vrot.lane.b32.xlu1 %v6687_v35, %s5943_s7  ;;  %1523 = vrot.lane.b32.xlu0 %v6924_v15, %s5945_s1  ;;  %v1601_v35 = vsel %vm417_vm14, %v6839_v51, %v6893_v31  ;;  %v1602_v51 = vsel %vm417_vm14, %v6893_v31, %v6887_v16  ;;  %v1698_v16 = vmul.f32 %v1684_v54, %v7097_v63  ;;  %vm8846_vm14 = vmmov %vm8845_vm1  ;;  %s5960_s7 = smov 17  }
 0x343   :  { %v1615_v17 = vmul.f32 %v1601_v35, %v6924_v15  ;;  %v1616_v25 = vmul.f32 %v1602_v51, %v7097_v63  ;;  %v1895_v31 = vsel %vm8845_vm1, %v6877_v8, %v6903_v39  ;;  %v1896_v29 = vsel %vm8846_vm14, %v6903_v39, %v6901_v41 }
 0x344   :  { %v1909_v9 = vmul.f32 %v1895_v31, %v6924_v15  ;;  %v1910_v57 = vmul.f32 %v1896_v29, %v7097_v63  ;;  %vm8851_vm1 = vcmask 547840  }
 0x345   :  { %vm8852_vm14 = vmmov %vm8851_vm1 }
 0x346   :  { %1764 = vrot.lane.b32.xlu0 %v6924_v15, %s5944_s21  ;;  %1525 = vrot.lane.b32.xlu1 %v7097_v63, %s5945_s1  ;;  %s8854_s1 = sld [smem:[#allocation20_spill]] }
 0x34a   :  { %1475 = vrot.lane.b32.xlu0 %v1456_v2, %s8834_s16  ;;  %1766 = vrot.lane.b32.xlu1 %v7097_v63, %s5944_s21  ;;  %s5964_s21 = smov 113  }
 0x34e   :  { %1634 = vrot.lane.b32.xlu0 %v1615_v17, %s8835_s26  ;;  %1477 = vrot.lane.b32.xlu1 %v1457_v49, %s8834_s16 }
 0x352   :  { %1716 = vrot.lane.b32.xlu0 %v1697_v28, %s8836_s24  ;;  %1636 = vrot.lane.b32.xlu1 %v1616_v25, %s8835_s26  ;;  %s5972_s26 = smov 19  }
 0x356   :  { %1846 = vrot.lane.b32.xlu0 %v1827_v13, %s8837_s14  ;;  %1718 = vrot.lane.b32.xlu1 %v1698_v16, %s8836_s24 }
 0x358   :  { %v1755_v58 = vpop.permute.xlu1 %1754  ;;  %v1514_v52 = vpop.permute.xlu0 %1513 }
 0x35a   :  { %1928 = vrot.lane.b32.xlu0 %v1909_v9, %s8838_s27  ;;  %1848 = vrot.lane.b32.xlu1 %v1828_v14, %s8837_s14 }
 0x35c   :  { %v1516_v56 = vpop.permute.xlu1 %1515  ;;  %v1967_v8 = vpop.permute.xlu0 %1966 }
 0x35d   :  { %v1527_v7 = vsel %vm325_vm8, %v1514_v52, %v1516_v56 }
 0x35e   :  { %1976 = vrot.lane.b32.xlu0 %v6924_v15, %s5946_s22  ;;  %1930 = vrot.lane.b32.xlu1 %v1910_v57, %s8838_s27  ;;  %s5959_s27 = smov 15  }
 0x360   :  { %v1466_v37 = vpop.permute.xlu1 %1465  ;;  %v1518_v44 = vpop.permute.xlu0 %1517 }
 0x361   :  { %v1528_v55 = vsel %vm325_vm8, %v1516_v56, %v1518_v44 }
 0x362   :  { %1978 = vrot.lane.b32.xlu1 %v7097_v63, %s5946_s22 }
 0x364   :  { %v1625_v36 = vpop.permute.xlu1 %1624  ;;  %v1707_v41 = vpop.permute.xlu0 %1706 }
 0x368   :  { %v1757_v39 = vpop.permute.xlu1 %1756  ;;  %v1759_v23 = vpop.permute.xlu0 %1758 }
 0x369   :  { %v1768_v38 = vsel %vm636_vm6, %v1755_v58, %v1757_v39  ;;  %v1769_v61 = vsel %vm636_vm6, %v1757_v39, %v1759_v23 }
 0x36c   :  { %v1969_v20 = vpop.permute.xlu1 %1968  ;;  %v1837_v12 = vpop.permute.xlu0 %1836 }
 0x36d   :  { %v1980_v46 = vsel %vm8847_vm0, %v1967_v8, %v1969_v20  ;;  %vm8853_vm0 = vmmov %vm8851_vm1 }
 0x370   :  { %v1919_v40 = vpop.permute.xlu1 %1918  ;;  %v1971_v43 = vpop.permute.xlu0 %1970 }
 0x371   :  { %v1981_v24 = vsel %vm8848_vm11, %v1969_v20, %v1971_v43  ;;  %vm2159_vm11 = vcmask 588800  }
 0x374   :  { %v1520_v30 = vpop.permute.xlu1 %1519  ;;  %v1470_v32 = vpop.permute.xlu0 %1469 }
 0x375   :  { %v1529_v50 = vsel %vm325_vm8, %v1518_v44, %v1520_v30 }
 0x378   :  { %v1761_v60 = vpop.permute.xlu1 %1760  ;;  %v1629_v42 = vpop.permute.xlu0 %1628 }
 0x379   :  { %v7167_v34 = vsel %vm636_vm6, %v1759_v23, %v1761_v60 }
 0x37c   :  { %v1973_v21 = vpop.permute.xlu1 %1972  ;;  %v1711_v59 = vpop.permute.xlu0 %1710 }
 0x37d   :  { %v7170_v27 = vsel %vm8849_vm10, %v1971_v43, %v1973_v21  ;;  %vm8855_vm10 = vmmov %vm8853_vm0 }
 0x380   :  { %v1468_v19 = vpop.permute.xlu1 %1467  ;;  %v1841_v62 = vpop.permute.xlu0 %1840 }
 0x381   :  { %v1479_v5 = vsel %vm8825_vm13, %v1466_v37, %v1468_v19  ;;  %v1480_v47 = vsel %vm8825_vm13, %v1468_v19, %v1470_v32 }
 0x382   :  { %v5184_v26 = vpack.c.bf16 %v1528_v55, %v1480_v47  ;;  %v5186_v53 = vpack.c.bf16 %v1527_v7, %v1479_v5 }
 0x384   :  { %v1627_v2 = vpop.permute.xlu1 %1626  ;;  %v7174_v35 = vpop.permute.xlu0 %1922  ;;  %5185 = vmatprep.subr.bf16.mxu0 %v5184_v26 }
 0x385   :  { %v1638_v4 = vsel %vm475_vm5, %v1625_v36, %v1627_v2  ;;  %v1639_v17 = vsel %vm475_vm5, %v1627_v2, %v1629_v42  ;;  %5187 = vmatpush1.bf16.msra.mxu0 %v5186_v53 }
 0x388   :  { %v1709_v49 = vpop.permute.xlu1 %1708  ;;  %v7178_v33 = vpop.permute.xlu0 %1521 }
 0x389   :  { %v1720_v51 = vsel %vm563_vm12, %v1707_v41, %v1709_v49  ;;  %v1721_v28 = vsel %vm563_vm12, %v1709_v49, %v1711_v59  ;;  %v1530_v25 = vsel %vm325_vm8, %v1520_v30, %v7178_v33 }
 0x38a   :  { %v5188_v48 = vpack.c.bf16 %v1721_v28, %v1639_v17  ;;  %v5190_v54 = vpack.c.bf16 %v1720_v51, %v1638_v4 }
 0x38c   :  { %v1839_v13 = vpop.permute.xlu1 %1838  ;;  %v7184_v16 = vpop.permute.xlu0 %1762  ;;  %5189 = vmatprep.subr.bf16.mxu0 %v5188_v48 }
 0x38d   :  { %v1850_v31 = vsel %vm8824_vm15, %v1837_v12, %v1839_v13  ;;  %v1851_v45 = vsel %vm8824_vm15, %v1839_v13, %v1841_v62  ;;  %v1771_v58 = vsel %vm636_vm6, %v1761_v60, %v7184_v16  ;;  %5191 = vmatpush1.bf16.msra.mxu0 %v5190_v54 }
 0x38e   :  { %v5192_v52 = vpack.c.bf16 %v1851_v45, %v1769_v61  ;;  %v5194_v9 = vpack.c.bf16 %v1850_v31, %v1768_v38  ;;  %v7248_v45 = vld [vmem:[%s8854_s1 + $0x8] sm:$0xff] }
 0x390   :  { %v1921_v14 = vpop.permute.xlu1 %1920  ;;  %v7190_v29 = vpop.permute.xlu0 %1974  ;;  %5193 = vmatprep.subr.bf16.mxu0 %v5192_v52 }
 0x391   :  { %v1932_v56 = vsel %vm809_vm4, %v1919_v40, %v1921_v14  ;;  %v1933_v8 = vsel %vm809_vm4, %v1921_v14, %v7174_v35  ;;  %v1983_v57 = vsel %vm8850_vm9, %v1973_v21, %v7190_v29  ;;  %5195 = vmatpush1.bf16.msra.mxu0 %v5194_v9  ;;  %vm8856_vm9 = vcmask 498688   ;;  %v2147_v9 = vld [vmem:[%s8858_s3] sm:$0xff] }
 0x392   :  { %v5196_v7 = vpack.c.bf16 %v1981_v24, %v1933_v8  ;;  %v5198_v37 = vpack.c.bf16 %v1980_v46, %v1932_v56 }
 0x394   :  { %v2051_v44 = vpop.permute.xlu1 %2050  ;;  %v7197_v55 = vpop.permute.xlu0 %1473  ;;  %5197 = vmatprep.subr.bf16.mxu0 %v5196_v7 }
 0x395   :  { %5199 = vmatpush1.bf16.msra.mxu0 %v5198_v37 }
 0x398   :  { %v1472_v36 = vpop.permute.xlu1 %1471  ;;  %v7199_v41 = vpop.permute.xlu0 %1632 }
 0x399   :  { %v1481_v39 = vsel %vm8825_vm13, %v1470_v32, %v1472_v36  ;;  %v1482_v23 = vsel %vm8825_vm13, %v1472_v36, %v7197_v55 }
 0x39a   :  { %v5200_v38 = vpack.c.bf16 %v1530_v25, %v1482_v23  ;;  %v5202_v61 = vpack.c.bf16 %v1529_v50, %v1481_v39 }
 0x39c   :  { %v1631_v20 = vpop.permute.xlu1 %1630  ;;  %v7204_v12 = vpop.permute.xlu0 %1714  ;;  %5201 = vmatprep.subr.bf16.mxu1 %v5200_v38 }
 0x39d   :  { %v1640_v46 = vsel %vm475_vm5, %v1629_v42, %v1631_v20  ;;  %v1641_v40 = vsel %vm475_vm5, %v1631_v20, %v7199_v41  ;;  %5203 = vmatpush1.bf16.msra.mxu1 %v5202_v61 }
 0x3a0   :  { %v1713_v43 = vpop.permute.xlu1 %1712  ;;  %v7209_v24 = vpop.permute.xlu0 %1844 }
 0x3a1   :  { %v1722_v30 = vsel %vm563_vm12, %v1711_v59, %v1713_v43  ;;  %v1723_v32 = vsel %vm563_vm12, %v1713_v43, %v7204_v12 }
 0x3a2   :  { %v5204_v60 = vpack.c.bf16 %v1723_v32, %v1641_v40  ;;  %v5206_v50 = vpack.c.bf16 %v1722_v30, %v1640_v46 }
 0x3a4   :  { %v1843_v21 = vpop.permute.xlu1 %1842  ;;  %v7214_v19 = vpop.permute.xlu0 %1926  ;;  %5205 = vmatprep.subr.bf16.mxu1 %v5204_v60 }
 0x3a5   :  { %v1852_v42 = vsel %vm8824_vm15, %v1841_v62, %v1843_v21  ;;  %v1853_v5 = vsel %vm8824_vm15, %v1843_v21, %v7209_v24  ;;  %5207 = vmatpush1.bf16.msra.mxu1 %v5206_v50 }
 0x3a6   :  { %v5208_v47 = vpack.c.bf16 %v1853_v5, %v1771_v58  ;;  %v5210_v26 = vpack.c.bf16 %v1852_v42, %v7167_v34 }
 0x3a8   :  { %v1925_v53 = vpop.permute.xlu1 %1924  ;;  %v2053_v59 = vpop.permute.xlu0 %2052  ;;  %5209 = vmatprep.subr.bf16.mxu1 %v5208_v47 }
 0x3a9   :  { %v1934_v2 = vsel %vm809_vm4, %v7174_v35, %v1925_v53  ;;  %v1935_v4 = vsel %vm809_vm4, %v1925_v53, %v7214_v19  ;;  %v2063_v17 = vsel %vm8851_vm1, %v2051_v44, %v2053_v59  ;;  %5211 = vmatpush1.bf16.msra.mxu1 %v5210_v26  ;;  %v7234_v35 = vld [vmem:[%s8854_s1] sm:$0xff]  ;;  %vm8857_vm1 = vmmov %vm8856_vm9  ;;  %s5965_s1 = smov 111  }
 0x3aa   :  { %2182 = vmatprep.subr.mxu0 %v2063_v17  ;;  %v5212_v62 = vpack.c.bf16 %v1983_v57, %v1935_v4  ;;  %v5214_v49 = vpack.c.bf16 %v7170_v27, %v1934_v2  ;;  %v2148_v57 = vld [vmem:[%s8858_s3 + $0x8] sm:$0xff] }
 0x3ac   :  { %v2055_v51 = vpop.permute.xlu1 %2054  ;;  %v7226_v28 = vpop.permute.xlu0 %2056  ;;  %5213 = vmatprep.subr.bf16.mxu1 %v5212_v62 }
 0x3ad   :  { %v2064_v34 = vsel %vm8852_vm14, %v2053_v59, %v2055_v51  ;;  %v2065_v25 = vsel %vm8853_vm0, %v2055_v51, %v7226_v28  ;;  %5215 = vmatpush1.bf16.msra.mxu1 %v5214_v49  ;;  %vm2500_vm14 = vcmask 392320  }
 0x3ae   :  { %2259 = vmatprep.subr.mxu1 %v2065_v25  ;;  %2502 = vst.msk [vmem:[#allocation6 + $0x68] sm:$0xff] %vm2500_vm14, %v5936_v6  ;;  %2501 = vst.msk [vmem:[#allocation6 + $0x30] sm:$0xff] %vm2500_vm14, %v5936_v6  ;;  %vm3428_vm14 = vcmask 916480  }
 0x3b0   :  { %v2049_v48 = vpop.permute.xlu1 %2048  ;;  %v2018_v54 = vpop.permute.xlu0 %2017 }
 0x3b1   :  { %v2062_v27 = vsel %vm8855_vm10, %v2049_v48, %v2051_v44  ;;  %v2025_v13 = vsel %vm8856_vm9, %v6879_v1, %v2018_v54  ;;  %2260 = vmatpush1.msra.mxu1 %v2064_v34  ;;  %vm2713_vm10 = vcmask 818848   ;;  %vm3244_vm9 = vcmask 1047680  }
 0x3b2   :  { %v2039_v31 = vmul.f32 %v2025_v13, %v6924_v15  ;;  %2183 = vmatpush1.msra.mxu0 %v2062_v27  ;;  %5043 = vmatmul.mubr.msk.f32.vlgmr.msra.gmra.mrb[4].mxu1 %vm2159_vm11, %v7234_v35  ;;  %2714 = vst.msk [vmem:[#allocation7 + $0x8] sm:$0xff] %vm2713_vm10, %v5936_v6  ;;  %2715 = vst.msk [vmem:[#allocation7 + $0x18] sm:$0xff] %vm2713_vm10, %v5936_v6 }
 0x3b3   :  { %5041 = vmatmul.mubr.msk.f32.vlgmr.msra.gmra.mrb[4].mxu0 %vm2159_vm11, %v7234_v35  ;;  %2313 = vmatprep.mubr.f32.mxu1 %v5936_v6 }
 0x3b4   :  { %v2020_v58 = vpop.permute.xlu1 %2019  ;;  %2058 = vrot.lane.b32.xlu0 %v2039_v31, %s5952_s29  ;;  %v1524_v1 = vpop.permute.xlu0 %1523  ;;  %2236 = vmatprep.mubr.f32.mxu0 %v5936_v6 }
 0x3b5   :  { %v2026_v15 = vsel %vm8857_vm1, %v2018_v54, %v2020_v58  ;;  %v1531_v52 = vsel %vm325_vm8, %v7178_v33, %v1524_v1  ;;  %vm3246_vm1 = vcmask 687104  }
 0x3b6   :  { %v2040_v14 = vmul.f32 %v2026_v15, %v7097_v63  ;;  %5044 = vmatmul.mubr.msk.f32.gmra.mrb[6].mxu1 %vm2159_vm11, %v7248_v45 }
 0x3b7   :  { %5042 = vmatmul.mubr.msk.f32.gmra.mrb[6].mxu0 %vm2159_vm11, %v7248_v45  ;;  %5152 = vmatprep.mubr.msk.f32.mxu1 %vm2159_vm11, %v7234_v35 }
 0x3b8   :  { %v1526_v56 = vpop.permute.xlu1 %1525  ;;  %2060 = vrot.lane.b32.xlu1 %v2040_v14, %s5952_s29  ;;  %v1765_v8 = vpop.permute.xlu0 %1764  ;;  %2151 = vperm.xlu0 %5824, %v2147_v9   ;;  %s5958_s29 = smov 1  }
 0x3b9   :  { %v1532_v33 = vsel %vm325_vm8, %v1524_v1, %v1526_v56  ;;  %1546 = vst.msk [vmem:[#allocation5 + $0x68] sm:$0xff] %vm8823_vm7, %v1526_v56  ;;  %v1772_v63 = vsel %vm636_vm6, %v7184_v16, %v1765_v8  ;;  %2384 = vmatprep.mubr.f32.mxu0 %v5936_v6  ;;  %vm8862_vm8 = vmmov %vm8853_vm0 }
 0x3bc   :  { %v1767_v7 = vpop.permute.xlu1 %1766  ;;  %2156 = vperm.xlu1 %5823, %v2148_v57   ;;  %v1476_v37 = vpop.permute.xlu0 %1475 }
 0x3bd   :  { %v1773_v44 = vsel %vm636_vm6, %v1765_v8, %v1767_v7  ;;  %1787 = vst.msk [vmem:[#allocation5 + $0x110] sm:$0xff] %vm8823_vm7, %v1767_v7  ;;  %v1483_v36 = vsel %vm8825_vm13, %v7197_v55, %v1476_v37 }
 0x3be   :  { %v5218_v20 = vpack.c.bf16 %v1531_v52, %v1483_v36 }
 0x3c0   :  { %v1478_v39 = vpop.permute.xlu1 %1477  ;;  %v1635_v23 = vpop.permute.xlu0 %1634  ;;  %v2097_v50 = vld [vmem:[#allocation5 + $0x68] sm:$0xff] }
 0x3c1   :  { %v1484_v16 = vsel %vm8825_vm13, %v1476_v37, %v1478_v39  ;;  %1498 = vst.msk [vmem:[#allocation5 + $0x30] sm:$0xff] %vm8823_vm7, %v1478_v39  ;;  %v1642_v38 = vsel %vm475_vm5, %v7199_v41, %v1635_v23 }
 0x3c2   :  { %v5216_v61 = vpack.c.bf16 %v1532_v33, %v1484_v16 }
 0x3c4   :  { %v1637_v46 = vpop.permute.xlu1 %1636  ;;  %v1717_v40 = vpop.permute.xlu0 %1716  ;;  %5217 = vmatprep.subr.bf16.mxu0 %v5216_v61 }
 0x3c5   :  { %v1643_v43 = vsel %vm475_vm5, %v1635_v23, %v1637_v46  ;;  %1657 = vst.msk [vmem:[#allocation5 + $0xa0] sm:$0xff] %vm8823_vm7, %v1637_v46  ;;  %v1724_v55 = vsel %vm563_vm12, %v7204_v12, %v1717_v40  ;;  %5219 = vmatpush1.bf16.msra.mxu0 %v5218_v20  ;;  %vm8859_vm5 = vcmask 556032  }
 0x3c6   :  { %v5222_v47 = vpack.c.bf16 %v1724_v55, %v1642_v38  ;;  %vm8860_vm6 = vmmov %vm8859_vm5 }
 0x3c8   :  { %v1719_v30 = vpop.permute.xlu1 %1718  ;;  %v1847_v32 = vpop.permute.xlu0 %1846  ;;  %v2090_v60 = vld [vmem:[#allocation5 + $0x30] sm:$0xff] }
 0x3c9   :  { %v1725_v21 = vsel %vm563_vm12, %v1717_v40, %v1719_v30  ;;  %1739 = vst.msk [vmem:[#allocation5 + $0xd8] sm:$0xff] %vm8823_vm7, %v1719_v30  ;;  %v1854_v41 = vsel %vm8824_vm15, %v7209_v24, %v1847_v32  ;;  %v5232_v42 = vpack.c.bf16 %v2097_v50, %v2090_v60 }
 0x3ca   :  { %v5220_v5 = vpack.c.bf16 %v1725_v21, %v1643_v43  ;;  %v5226_v4 = vpack.c.bf16 %v1854_v41, %v1772_v63 }
 0x3cb   :  { %5233 = vmatprep.subr.bf16.mxu1 %v5232_v42 }
 0x3cc   :  { %v1849_v26 = vpop.permute.xlu1 %1848  ;;  %5235 = vmatpush3.bf16.msra.mxu1 %v5232_v42  ;;  %v1929_v53 = vpop.permute.xlu0 %1928  ;;  %5221 = vmatprep.subr.bf16.mxu0 %v5220_v5  ;;  %v2104_v62 = vld [vmem:[#allocation5 + $0xa0] sm:$0xff] }
 0x3cd   :  { %v1855_v12 = vsel %vm8824_vm15, %v1847_v32, %v1849_v26  ;;  %1869 = vst.msk [vmem:[#allocation5 + $0x148] sm:$0xff] %vm8823_vm7, %v1849_v26  ;;  %v1936_v59 = vsel %vm809_vm4, %v7214_v19, %v1929_v53  ;;  %5223 = vmatpush1.bf16.msra.mxu0 %v5222_v47  ;;  %v2118_v19 = vld [vmem:[#allocation5 + $0x110] sm:$0xff]  ;;  %vm4228_vm15 = vcmask 867328  }
 0x3ce   :  { %v5224_v2 = vpack.c.bf16 %v1855_v12, %v1773_v44  ;;  %v2719_v12 = vld [vmem:[#allocation11 + $0x18] sm:$0xff] }
 0x3d0   :  { %v1931_v17 = vpop.permute.xlu1 %1930  ;;  %v1977_v24 = vpop.permute.xlu0 %1976  ;;  %v2111_v49 = vld [vmem:[#allocation5 + $0xd8] sm:$0xff]  ;;  %5225 = vmatprep.subr.bf16.mxu0 %v5224_v2 }
 0x3d1   :  { %v1937_v51 = vsel %vm809_vm4, %v1929_v53, %v1931_v17  ;;  %1951 = vst.msk [vmem:[#allocation5 + $0x180] sm:$0xff] %vm8823_vm7, %v1931_v17  ;;  %v1984_v34 = vsel %vm8859_vm5, %v7190_v29, %v1977_v24  ;;  %v5236_v25 = vpack.c.bf16 %v2111_v49, %v2104_v62  ;;  %5227 = vmatpush1.bf16.msra.mxu0 %v5226_v4  ;;  %vm8861_vm4 = vmmov %vm8853_vm0  ;;  %v2717_v53 = vld [vmem:[#allocation11 + $0x8] sm:$0xff]  ;;  %v2718_v4 = vld [vmem:[#allocation11 + $0x10] sm:$0xff]  ;;  %vm2573_vm0 = vcmask 1039360  }
 0x3d2   :  { %v5230_v58 = vpack.c.bf16 %v1984_v34, %v1936_v59  ;;  %v2716_v59 = vld [vmem:[#allocation11] sm:$0xff]  ;;  %v5248_v2 = vpack.c.bf16 %v2719_v12, %v2717_v53  ;;  %v2721_v17 = vld [vmem:[#allocation11 + $0x28] sm:$0xff]  ;;  %v2722_v34 = vld [vmem:[#allocation11 + $0x30] sm:$0xff]  ;;  %vm3270_vm5 = vcmask 7168  }
 0x3d3   :  { %5237 = vmatprep.subr.bf16.mxu1 %v5236_v25  ;;  %v5250_v62 = vpack.c.bf16 %v2718_v4, %v2716_v59  ;;  %v2749_v53 = vld [vmem:[#allocation11 + $0x108] sm:$0xff]  ;;  %v2751_v12 = vld [vmem:[#allocation11 + $0x118] sm:$0xff]  ;;  %v2748_v4 = vld [vmem:[#allocation11 + $0x100] sm:$0xff] }
 0x3d4   :  { %v1979_v48 = vpop.permute.xlu1 %1978  ;;  %5239 = vmatpush3.bf16.msra.mxu1 %v5236_v25  ;;  %v2125_v54 = vld [vmem:[#allocation5 + $0x148] sm:$0xff]  ;;  %v2725_v25 = vld [vmem:[#allocation11 + $0x48] sm:$0xff] }
 0x3d5   :  { %v1985_v27 = vsel %vm8860_vm6, %v1977_v24, %v1979_v48  ;;  %1999 = vst.msk [vmem:[#allocation5 + $0x1b8] sm:$0xff] %vm8823_vm7, %v1979_v48  ;;  %v5240_v13 = vpack.c.bf16 %v2125_v54, %v2118_v19  ;;  %v2723_v24 = vld [vmem:[#allocation11 + $0x38] sm:$0xff]  ;;  %vm3381_vm6 = vcmask 121856  }
 0x3d6   :  { %v5228_v31 = vpack.c.bf16 %v1985_v27, %v1937_v51  ;;  %v5252_v49 = vpack.c.bf16 %v2723_v24, %v2721_v17  ;;  %v2720_v51 = vld [vmem:[#allocation11 + $0x20] sm:$0xff]  ;;  %v2727_v48 = vld [vmem:[#allocation11 + $0x58] sm:$0xff]  ;;  %v2750_v17 = vld [vmem:[#allocation11 + $0x110] sm:$0xff] }
 0x3d7   :  { %5241 = vmatprep.subr.bf16.mxu1 %v5240_v13  ;;  %v5254_v19 = vpack.c.bf16 %v2722_v34, %v2720_v51  ;;  %v5256_v54 = vpack.c.bf16 %v2727_v48, %v2725_v25  ;;  %v2724_v27 = vld [vmem:[#allocation11 + $0x40] sm:$0xff]  ;;  %v2753_v24 = vld [vmem:[#allocation11 + $0x128] sm:$0xff]  ;;  %v2754_v25 = vld [vmem:[#allocation11 + $0x130] sm:$0xff] }
 0x3d8   :  { %5243 = vmatpush3.bf16.msra.mxu1 %v5240_v13  ;;  %5229 = vmatprep.subr.bf16.mxu0 %v5228_v31  ;;  %v2132_v1 = vld [vmem:[#allocation5 + $0x180] sm:$0xff]  ;;  %v2752_v34 = vld [vmem:[#allocation11 + $0x120] sm:$0xff] }
 0x3d9   :  { %5231 = vmatpush1.bf16.msra.mxu0 %v5230_v58  ;;  %v2726_v13 = vld [vmem:[#allocation11 + $0x50] sm:$0xff]  ;;  %v2729_v31 = vld [vmem:[#allocation11 + $0x68] sm:$0xff]  ;;  %v2731_v58 = vld [vmem:[#allocation11 + $0x78] sm:$0xff] }
 0x3da   :  { %v2757_v48 = vld [vmem:[#allocation11 + $0x148] sm:$0xff] }
 0x3dc   :  { %v2139_v29 = vld [vmem:[#allocation5 + $0x1b8] sm:$0xff] }
 0x3dd   :  { %v5244_v15 = vpack.c.bf16 %v2139_v29, %v2132_v1  ;;  %v5258_v1 = vpack.c.bf16 %v2726_v13, %v2724_v27  ;;  %v5260_v29 = vpack.c.bf16 %v2731_v58, %v2729_v31  ;;  %v2756_v13 = vld [vmem:[#allocation11 + $0x140] sm:$0xff]  ;;  %v2758_v31 = vld [vmem:[#allocation11 + $0x150] sm:$0xff]  ;;  %v2761_v58 = vld [vmem:[#allocation11 + $0x168] sm:$0xff] }
 0x3df   :  { %5245 = vmatprep.subr.bf16.mxu1 %v5244_v15 }
 0x3e0   :  { %5247 = vmatpush3.bf16.msra.mxu1 %v5244_v15  ;;  %v2728_v15 = vld [vmem:[#allocation11 + $0x60] sm:$0xff] }
 0x426   :  { %v2059_v52 = vpop.permute.xlu0 %2058 }
 0x427   :  { %v2066_v9 = vsel %vm8861_vm4, %v7226_v28, %v2059_v52  ;;  %vm3447_vm4 = vcmask 138240  }
 0x42a   :  { %v2061_v14 = vpop.permute.xlu1 %2060 }
 0x42b   :  { %v2067_v56 = vsel %vm8862_vm8, %v2059_v52, %v2061_v14  ;;  %2081 = vst.msk [vmem:[#allocation5 + $0x1f0] sm:$0xff] %vm8823_vm7, %v2061_v14  ;;  %v2730_v52 = vld [vmem:[#allocation11 + $0x70] sm:$0xff]  ;;  %v2735_v14 = vld [vmem:[#allocation11 + $0x98] sm:$0xff]  ;;  %vm3316_vm8 = vcmask 1031168  }
 0x42c   :  { %2336 = vmatprep.subr.mxu0 %v2067_v56  ;;  %v5262_v56 = vpack.c.bf16 %v2730_v52, %v2728_v15  ;;  %v2760_v52 = vld [vmem:[#allocation11 + $0x160] sm:$0xff] }
 0x42d   :  { %2337 = vmatpush1.msra.mxu0 %v2066_v9  ;;  %v2733_v9 = vld [vmem:[#allocation11 + $0x88] sm:$0xff] }
 0x42e   :  { %5045 = vmatmul.mubr.msk.f32.vlgmr.msra.gmra.mrb[8].mxu0 %vm2159_vm11, %v7234_v35  ;;  %5249 = vmatprep.subr.bf16.mxu0 %v5248_v2  ;;  %v5280_v2 = vpack.c.bf16 %v2751_v12, %v2749_v53  ;;  %v2778_v12 = vld [vmem:[#allocation11 + $0x1f0] sm:$0xff] }
 0x42f   :  { %2390 = vmatprep.mubr.f32.mxu0 %v5936_v6  ;;  %5251 = vmatpush1.bf16.msra.mxu0 %v5250_v62  ;;  %v2755_v62 = vld [vmem:[#allocation11 + $0x138] sm:$0xff] }
 0x430   :  { %5253 = vmatprep.subr.bf16.mxu0 %v5252_v49  ;;  %v5282_v49 = vpack.c.bf16 %v2750_v17, %v2748_v4  ;;  %v5284_v51 = vpack.c.bf16 %v2755_v62, %v2753_v24 }
 0x432   :  { %v2146_v8 = vld [vmem:[#allocation5 + $0x1f0] sm:$0xff]  ;;  %5046 = vmatmul.mubr.msk.f32.gmra.mrb[10].mxu0 %vm2159_vm11, %v7248_v45 }
 0x433   :  { %5150 = vmatprep.subr.mxu1 %v2146_v8  ;;  %5255 = vmatpush1.bf16.msra.mxu0 %v5254_v19  ;;  %v2759_v19 = vld [vmem:[#allocation11 + $0x158] sm:$0xff] }
 0x434   :  { %5151 = vmatpush3.msra.mxu1 %v2146_v8  ;;  %5257 = vmatprep.subr.bf16.mxu0 %v5256_v54  ;;  %v5264_v8 = vpack.c.bf16 %v2735_v14, %v2733_v9  ;;  %v5286_v54 = vpack.c.bf16 %v2754_v25, %v2752_v34  ;;  %v5288_v27 = vpack.c.bf16 %v2759_v19, %v2757_v48  ;;  %v2762_v9 = vld [vmem:[#allocation11 + $0x170] sm:$0xff]  ;;  %v2765_v14 = vld [vmem:[#allocation11 + $0x188] sm:$0xff] }
 0x435   :  { %5153 = vmatmul.mubr.msk.f32.vlgmr.msra.gmra.mrb[8].mxu1 %vm2159_vm11, %v7248_v45  ;;  %vm2670_vm11 = vcmask 818176  }
 0x436   :  { %3213 = vmatprep.mubr.f32.mxu1 %v5936_v6 }
 0x437   :  { %v7312_v28 = vpop.permute.xlu0 %2151  ;;  %5259 = vmatpush1.bf16.msra.mxu0 %v5258_v1  ;;  %v2763_v1 = vld [vmem:[#allocation11 + $0x178] sm:$0xff] }
 0x438   :  { %5261 = vmatprep.subr.bf16.mxu0 %v5260_v29  ;;  %v5290_v29 = vpack.c.bf16 %v2758_v31, %v2756_v13  ;;  %v5292_v15 = vpack.c.bf16 %v2763_v1, %v2761_v58 }
 0x43b   :  { %v7320_v23 = vpop.permute.xlu1 %2156  ;;  %5263 = vmatpush1.bf16.msra.mxu0 %v5262_v56  ;;  %v2767_v56 = vld [vmem:[#allocation11 + $0x198] sm:$0xff] }
 0x43c   :  { %5265 = vmatprep.subr.bf16.mxu0 %v5264_v8  ;;  %v5294_v8 = vpack.c.bf16 %v2762_v9, %v2760_v52 }
 0x485   :  { %v2309_v33 = vpop.f32.mrb[4].mxu1 }
 0x486   :  { %v2232_v63 = vpop.f32.mrb[4].mxu0  ;;  %v2311_v57 = vpop.f32.mrb[5].mxu1  ;;  %v2310_v35 = vadd.f32 %v2309_v33, %v7312_v28  ;;  %v2732_v33 = vld [vmem:[#allocation11 + $0x80] sm:$0xff] }
 0x487   :  { %v2233_v7 = vadd.f32 %v2232_v63, %v7312_v28  ;;  %v2312_v37 = vadd.f32 %v2311_v57, %v7312_v28  ;;  %v2234_v44 = vpop.f32.mrb[5].mxu0  ;;  %v2734_v63 = vld [vmem:[#allocation11 + $0x90] sm:$0xff]  ;;  %v2737_v57 = vld [vmem:[#allocation11 + $0xa8] sm:$0xff] }
 0x488   :  { %v7317_v36 = vmax.f32 %v2310_v35, 0.0  ;;  %v2235_v39 = vadd.f32 %v2234_v44, %v7312_v28  ;;  %v2739_v35 = vld [vmem:[#allocation11 + $0xb8] sm:$0xff]  ;;  %v2736_v44 = vld [vmem:[#allocation11 + $0xa0] sm:$0xff] }
 0x489   :  { %v7322_v45 = vmax.f32 %v2233_v7, 0.0  ;;  %v7324_v16 = vmax.f32 %v2312_v37, 0.0  ;;  %v2315_v38 = vpop.f32.mrb[6].mxu1  ;;  %v5266_v7 = vpack.c.bf16 %v2734_v63, %v2732_v33  ;;  %v5268_v37 = vpack.c.bf16 %v2739_v35, %v2737_v57  ;;  %v2764_v63 = vld [vmem:[#allocation11 + $0x180] sm:$0xff]  ;;  %v2766_v57 = vld [vmem:[#allocation11 + $0x190] sm:$0xff]  ;;  %v2769_v35 = vld [vmem:[#allocation11 + $0x1a8] sm:$0xff] }
 0x48a   :  { %2488 = vst [vmem:[%s8798_s17 + $0x10] sm:$0xff] %v7317_v36  ;;  %v7330_v61 = vmax.f32 %v2235_v39, 0.0  ;;  %v2316_v20 = vadd.f32 %v2315_v38, %v7320_v23  ;;  %v2238_v46 = vpop.f32.mrb[6].mxu0  ;;  %v2317_v40 = vpop.f32.mrb[7].mxu1  ;;  %v2738_v39 = vld [vmem:[#allocation11 + $0xb0] sm:$0xff]  ;;  %v2741_v38 = vld [vmem:[#allocation11 + $0xc8] sm:$0xff]  ;;  %v5296_v33 = vpack.c.bf16 %v2767_v56, %v2765_v14 }
 0x48b   :  { %2486 = vst [vmem:[%s8798_s17] sm:$0xff] %v7322_v45  ;;  %2489 = vst [vmem:[%s8798_s17 + $0x18] sm:$0xff] %v7324_v16  ;;  %v2239_v43 = vadd.f32 %v2238_v46, %v7320_v23  ;;  %v2318_v55 = vadd.f32 %v2317_v40, %v7320_v23  ;;  %v2240_v30 = vpop.f32.mrb[7].mxu0  ;;  %v5830_v32 = vpack.i.bf16 %v7322_v45, %v7324_v16  ;;  %5267 = vmatpush1.bf16.msra.mxu0 %v5266_v7  ;;  %v2771_v7 = vld [vmem:[#allocation11 + $0x1b8] sm:$0xff] }
 0x48c   :  { %2487 = vst [vmem:[%s8798_s17 + $0x8] sm:$0xff] %v7330_v61  ;;  %v7349_v60 = vmax.f32 %v2316_v20, 0.0  ;;  %v2241_v50 = vadd.f32 %v2240_v30, %v7320_v23  ;;  %v5825_v21 = vpack.i.bf16 %v7317_v36, %v7330_v61  ;;  %v2743_v20 = vld [vmem:[#allocation11 + $0xd8] sm:$0xff]  ;;  %v5270_v46 = vpack.c.bf16 %v2738_v39, %v2736_v44  ;;  %5269 = vmatprep.subr.bf16.mxu0 %v5268_v37  ;;  %v2745_v30 = vld [vmem:[#allocation11 + $0xe8] sm:$0xff]  ;;  %v2768_v39 = vld [vmem:[#allocation11 + $0x1a0] sm:$0xff] }
 0x48d   :  { %v7354_v41 = vmax.f32 %v2239_v43, 0.0  ;;  %v7356_v42 = vmax.f32 %v2318_v55, 0.0  ;;  %5831 = vrot.lane.b32.xlu0 %v5830_v32, %s5956_s25  ;;  %v5272_v40 = vpack.c.bf16 %v2743_v20, %v2741_v38  ;;  %v2740_v43 = vld [vmem:[#allocation11 + $0xc0] sm:$0xff]  ;;  %v2742_v55 = vld [vmem:[#allocation11 + $0xd0] sm:$0xff]  ;;  %v2747_v32 = vld [vmem:[#allocation11 + $0xf8] sm:$0xff]  ;;  %v5298_v37 = vpack.c.bf16 %v2766_v57, %v2764_v63 }
 0x48e   :  { %2495 = vst [vmem:[%s8798_s17 + $0x48] sm:$0xff] %v7349_v60  ;;  %v7363_v5 = vmax.f32 %v2241_v50, 0.0  ;;  %5826 = vrot.lane.b32.xlu1 %v5825_v21, %s5956_s25  ;;  %v5274_v50 = vpack.c.bf16 %v2742_v55, %v2740_v43  ;;  %v5276_v21 = vpack.c.bf16 %v2747_v32, %v2745_v30  ;;  %v5300_v44 = vpack.c.bf16 %v2771_v7, %v2769_v35  ;;  %v2770_v38 = vld [vmem:[#allocation11 + $0x1b0] sm:$0xff]  ;;  %v2772_v43 = vld [vmem:[#allocation11 + $0x1c0] sm:$0xff] }
 0x48f   :  { %2493 = vst [vmem:[%s8798_s17 + $0x38] sm:$0xff] %v7354_v41  ;;  %2496 = vst [vmem:[%s8798_s17 + $0x50] sm:$0xff] %v7356_v42  ;;  %v5840_v47 = vpack.i.bf16 %v7354_v41, %v7356_v42  ;;  %5271 = vmatpush1.bf16.msra.mxu0 %v5270_v46  ;;  %v5302_v20 = vpack.c.bf16 %v2770_v38, %v2768_v39  ;;  %v2773_v46 = vld [vmem:[#allocation11 + $0x1c8] sm:$0xff]  ;;  %v2774_v30 = vld [vmem:[#allocation11 + $0x1d0] sm:$0xff] }
 0x490   :  { %2494 = vst [vmem:[%s8798_s17 + $0x40] sm:$0xff] %v7363_v5  ;;  %v5835_v26 = vpack.i.bf16 %v7349_v60, %v7363_v5  ;;  %5273 = vmatprep.subr.bf16.mxu0 %v5272_v40  ;;  %v2775_v40 = vld [vmem:[#allocation11 + $0x1d8] sm:$0xff]  ;;  %v5306_v32 = vpack.c.bf16 %v2774_v30, %v2772_v43 }
 0x491   :  { %5841 = vrot.lane.b32.xlu0 %v5840_v47, %s5956_s25  ;;  %v2744_v47 = vld [vmem:[#allocation11 + $0xe0] sm:$0xff]  ;;  %v5304_v55 = vpack.c.bf16 %v2775_v40, %v2773_v46  ;;  %v2781_v40 = vld [vmem:[#allocation11 + $0x208] sm:$0xff]  ;;  %v2783_v43 = vld [vmem:[#allocation11 + $0x218] sm:$0xff] }
 0x492   :  { %5836 = vrot.lane.b32.xlu1 %v5835_v26, %s5956_s25  ;;  %v2746_v26 = vld [vmem:[#allocation11 + $0xf0] sm:$0xff] }
 0x493   :  { %5275 = vmatpush1.bf16.msra.mxu0 %v5274_v50  ;;  %v5278_v59 = vpack.c.bf16 %v2746_v26, %v2744_v47  ;;  %v2777_v50 = vld [vmem:[#allocation11 + $0x1e8] sm:$0xff]  ;;  %v2776_v47 = vld [vmem:[#allocation11 + $0x1e0] sm:$0xff] }
 0x494   :  { %5277 = vmatprep.subr.bf16.mxu0 %v5276_v21  ;;  %v2779_v21 = vld [vmem:[#allocation11 + $0x1f8] sm:$0xff]  ;;  %v5310_v17 = vpack.c.bf16 %v2778_v12, %v2776_v47  ;;  %v2780_v12 = vld [vmem:[#allocation11 + $0x200] sm:$0xff] }
 0x495   :  { %v5308_v53 = vpack.c.bf16 %v2779_v21, %v2777_v50 }
 0x497   :  { %5279 = vmatpush1.bf16.msra.mxu0 %v5278_v59 }
 0x498   :  { %5281 = vmatprep.subr.bf16.mxu0 %v5280_v2 }
 0x49b   :  { %5283 = vmatpush1.bf16.msra.mxu0 %v5282_v49 }
 0x49c   :  { %5285 = vmatprep.subr.bf16.mxu0 %v5284_v51 }
 0x49f   :  { %5287 = vmatpush1.bf16.msra.mxu0 %v5286_v54 }
 0x4a0   :  { %5289 = vmatprep.subr.bf16.mxu0 %v5288_v27 }
 0x4a3   :  { %5291 = vmatpush1.bf16.msra.mxu0 %v5290_v29 }
 0x4a4   :  { %5293 = vmatprep.subr.bf16.mxu0 %v5292_v15 }
 0x4a7   :  { %5295 = vmatpush1.bf16.msra.mxu0 %v5294_v8 }
 0x4a8   :  { %5297 = vmatprep.subr.bf16.mxu0 %v5296_v33 }
 0x4ab   :  { %5299 = vmatpush1.bf16.msra.mxu0 %v5298_v37 }
 0x4ac   :  { %5301 = vmatprep.subr.bf16.mxu0 %v5300_v44 }
 0x4af   :  { %5303 = vmatpush1.bf16.msra.mxu0 %v5302_v20 }
 0x4b0   :  { %5305 = vmatprep.subr.bf16.mxu0 %v5304_v55  ;;  %v5312_v55 = vpack.c.bf16 %v2783_v43, %v2781_v40  ;;  %v2788_v40 = vld [vmem:[#allocation11 + $0x240] sm:$0xff]  ;;  %v2790_v43 = vld [vmem:[#allocation11 + $0x250] sm:$0xff] }
 0x4b3   :  { %5307 = vmatpush1.bf16.msra.mxu0 %v5306_v32 }
 0x4b4   :  { %5309 = vmatprep.subr.bf16.mxu0 %v5308_v53 }
 0x4b7   :  { %5311 = vmatpush1.bf16.msra.mxu0 %v5310_v17  ;;  %v2787_v17 = vld [vmem:[#allocation11 + $0x238] sm:$0xff] }
 0x4b8   :  { %5313 = vmatprep.subr.bf16.mxu0 %v5312_v55 }
 0x4ff   :  { %v7386_v26 = vpop.permute.xlu0 %5831 }
 0x500   :  { %v5834_v59 = vunpack.i.h.bf16 %v7386_v26  ;;  %v5833_v2 = vunpack.i.l.bf16 %v7386_v26  ;;  %v5827_v4 = vpop.permute.xlu1 %5826 }
 0x501   :  { %v2386_v24 = vpop.f32.mrb[8].mxu0  ;;  %v5829_v62 = vunpack.i.h.bf16 %v5827_v4  ;;  %v5828_v49 = vunpack.i.l.bf16 %v5827_v4  ;;  %v2785_v4 = vld [vmem:[#allocation11 + $0x228] sm:$0xff] }
 0x502   :  { %v2387_v51 = vadd.f32 %v2386_v24, %v7312_v28  ;;  %v2388_v34 = vpop.f32.mrb[9].mxu0 }
 0x503   :  { %v2389_v25 = vadd.f32 %v2388_v34, %v7312_v28  ;;  %v2574_v48 = vsel %vm2573_vm0, %v5834_v59, %v5828_v49  ;;  %v2575_v19 = vsel %vm2573_vm0, %v5828_v49, %v5829_v62  ;;  %v2576_v54 = vsel %vm2573_vm0, %v5829_v62, %v5833_v2  ;;  %v7397_v27 = vpop.permute.xlu0 %5841  ;;  %v2782_v59 = vld [vmem:[#allocation11 + $0x210] sm:$0xff] }
 0x504   :  { %v7399_v13 = vmax.f32 %v2387_v51, 0.0  ;;  %v7402_v31 = vmax.f32 %v7322_v45, %v2574_v48  ;;  %v7405_v58 = vmax.f32 %v7317_v36, %v2576_v54  ;;  %v7408_v1 = vmax.f32 %v7330_v61, %v2575_v19  ;;  %v5837_v29 = vpop.permute.xlu1 %5836  ;;  %v2784_v19 = vld [vmem:[#allocation11 + $0x220] sm:$0xff]  ;;  %v2786_v54 = vld [vmem:[#allocation11 + $0x230] sm:$0xff] }
 0x505   :  { %v7410_v15 = vmax.f32 %v2389_v25, 0.0  ;;  %v2392_v52 = vpop.f32.mrb[10].mxu0  ;;  %v5843_v9 = vunpack.i.l.bf16 %v7397_v27  ;;  %v5839_v14 = vunpack.i.h.bf16 %v5837_v29  ;;  %v5838_v36 = vunpack.i.l.bf16 %v5837_v29 }
 0x506   :  { %2490 = vst [vmem:[%s8798_s17 + $0x20] sm:$0xff] %v7399_v13  ;;  %v2393_v45 = vadd.f32 %v2392_v52, %v7320_v23  ;;  %v2394_v56 = vpop.f32.mrb[11].mxu0  ;;  %2642 = vrot.lane.b32.xlu0 %v7402_v31, %s5957_s2  ;;  %v5845_v61 = vpack.i.bf16 %v7405_v58, %v7408_v1  ;;  %v5844_v32 = vunpack.i.h.bf16 %v7397_v27  ;;  %v5314_v48 = vpack.c.bf16 %v2782_v59, %v2780_v12  ;;  %v2794_v27 = vld [vmem:[#allocation11 + $0x270] sm:$0xff] }
 0x507   :  { %2491 = vst [vmem:[%s8798_s17 + $0x28] sm:$0xff] %v7410_v15  ;;  %v2395_v8 = vadd.f32 %v2394_v56, %v7320_v23  ;;  %v2582_v33 = vsel %vm2573_vm0, %v5839_v14, %v5843_v9  ;;  %v2581_v35 = vsel %vm2573_vm0, %v5838_v36, %v5839_v14  ;;  %v5316_v14 = vpack.c.bf16 %v2787_v17, %v2785_v4  ;;  %v2909_v56 = vld [vmem:[#allocation11 + $0x608] sm:$0xff] }
 0x508   :  { %v5154_v63 = vpop.f32.mrb[8].mxu1  ;;  %v7430_v57 = vmax.f32 %v2393_v45, 0.0  ;;  %v7434_v7 = vmax.f32 %v7349_v60, %v2582_v33  ;;  %5846 = vrot.lane.b32.xlu1 %v5845_v61, %s5957_s2  ;;  %v7441_v38 = vmax.f32 %v7363_v5, %v2581_v35  ;;  %v5850_v60 = vpack.i.bf16 %v7410_v15, %v7399_v13  ;;  %v2789_v45 = vld [vmem:[#allocation11 + $0x248] sm:$0xff]  ;;  %v2911_v61 = vld [vmem:[#allocation11 + $0x618] sm:$0xff] }
 0x509   :  { %v2469_v37 = vadd.f32 %v5154_v63, %v7320_v23  ;;  %v2463_v44 = vpop.f32.mrb[9].mxu1  ;;  %v7438_v39 = vmax.f32 %v2395_v8, 0.0  ;;  %v2580_v49 = vsel %vm2573_vm0, %v5844_v32, %v5838_v36  ;;  %v5440_v33 = vpack.c.bf16 %v2911_v61, %v2909_v56  ;;  %v2908_v63 = vld [vmem:[#allocation11 + $0x600] sm:$0xff] }
 0x50a   :  { %v2464_v20 = vadd.f32 %v2463_v44, %v7312_v28  ;;  %2497 = vst [vmem:[%s8798_s17 + $0x58] sm:$0xff] %v7430_v57  ;;  %v5855_v23 = vpack.i.bf16 %v7434_v7, %v7441_v38  ;;  %v7503_v35 = vmax.f32 %v7354_v41, %v2580_v49  ;;  %v5318_v41 = vpack.c.bf16 %v2786_v54, %v2784_v19  ;;  %v2792_v49 = vld [vmem:[#allocation11 + $0x260] sm:$0xff]  ;;  %v2798_v54 = vld [vmem:[#allocation11 + $0x290] sm:$0xff] }
 0x50b   :  { %v7450_v46 = vmax.f32 %v2469_v37, 0.0  ;;  %2498 = vst [vmem:[%s8798_s17 + $0x60] sm:$0xff] %v7438_v39  ;;  %v5860_v28 = vpack.i.bf16 %v7438_v39, %v7430_v57  ;;  %5441 = vmatprep.subr.bf16.mxu1 %v5440_v33  ;;  %v5322_v4 = vpack.c.bf16 %v2790_v43, %v2788_v40  ;;  %v2796_v19 = vld [vmem:[#allocation11 + $0x280] sm:$0xff] }
 0x50c   :  { %v7458_v5 = vmax.f32 %v2464_v20, 0.0  ;;  %5851 = vrot.lane.b32.xlu1 %v5850_v60, %s5956_s25  ;;  %5856 = vrot.lane.b32.xlu0 %v5855_v23, %s5957_s2  ;;  %v5330_v61 = vpack.c.bf16 %v2798_v54, %v2796_v19  ;;  %v2800_v33 = vld [vmem:[#allocation11 + $0x2a0] sm:$0xff] }
 0x50d   :  { %2499 = vst.msk [vmem:[%s8798_s17 + $0x68] sm:$0xff] %vm8823_vm7, %v7450_v46  ;;  %2516 = vst.msk [vmem:[#allocation6 + $0x68] sm:$0xff] %vm8823_vm7, %v7450_v46  ;;  %v2820_v54 = vld [vmem:[#allocation11 + $0x340] sm:$0xff] }
 0x50e   :  { %2492 = vst.msk [vmem:[%s8798_s17 + $0x30] sm:$0xff] %vm8823_vm7, %v7458_v5  ;;  %2509 = vst.msk [vmem:[#allocation6 + $0x30] sm:$0xff] %vm8823_vm7, %v7458_v5  ;;  %s8863_s17 = smov 16  }
 0x510   :  { %5861 = vrot.lane.b32.xlu0 %v5860_v28, %s5956_s25 }
 0x514   :  { %v7553_v56 = vld [vmem:[#allocation6 + $0x68] sm:$0xff] }
 0x515   :  { %v7479_v30 = vld [vmem:[#allocation6 + $0x30] sm:$0xff] }
 0x516   :  { %2557 = vrot.lane.b32.xlu0 %v7479_v30, %s5956_s25 }
 0x578   :  { %v2643_v21 = vpop.permute.xlu0 %2642 }
 0x57a   :  { %v7484_v50 = vpop.permute.xlu1 %5846 }
 0x57b   :  { %v5849_v47 = vunpack.i.h.bf16 %v7484_v50  ;;  %v5848_v53 = vunpack.i.l.bf16 %v7484_v50 }
 0x57d   :  { %v2671_v24 = vsel %vm2670_vm11, %v2643_v21, %v5848_v53  ;;  %v2672_v62 = vsel %vm2670_vm11, %v5848_v53, %v5849_v47  ;;  %v2793_v21 = vld [vmem:[#allocation11 + $0x268] sm:$0xff]  ;;  %v2795_v53 = vld [vmem:[#allocation11 + $0x278] sm:$0xff] }
 0x57e   :  { %v2697_v51 = vmax.f32 %v7402_v31, %v2671_v24  ;;  %v7494_v34 = vpop.permute.xlu1 %5851  ;;  %v2698_v25 = vmax.f32 %v7408_v1, %v2672_v62  ;;  %v7497_v29 = vpop.permute.xlu0 %5856  ;;  %v2791_v31 = vld [vmem:[#allocation11 + $0x258] sm:$0xff]  ;;  %v2910_v1 = vld [vmem:[#allocation11 + $0x610] sm:$0xff]  ;;  %v5324_v62 = vpack.c.bf16 %v2795_v53, %v2793_v21 }
 0x57f   :  { %v5853_v52 = vunpack.i.l.bf16 %v7494_v34  ;;  %v5859_v8 = vunpack.i.h.bf16 %v7497_v29  ;;  %v5858_v36 = vunpack.i.l.bf16 %v7497_v29  ;;  %v5854_v37 = vunpack.i.h.bf16 %v7494_v34  ;;  %v2799_v34 = vld [vmem:[#allocation11 + $0x298] sm:$0xff] }
 0x580   :  { %2982 = vmatprep.mubr.f32.mxu0 %v2698_v25  ;;  %v5442_v20 = vpack.c.bf16 %v2910_v1, %v2908_v63  ;;  %v2802_v63 = vld [vmem:[#allocation11 + $0x2b0] sm:$0xff]  ;;  %v2815_v21 = vld [vmem:[#allocation11 + $0x318] sm:$0xff] }
 0x581   :  { %v2577_v44 = vsel %vm2573_vm0, %v5833_v2, %v5853_v52  ;;  %2983 = vmatmul.mubr.f32.vlgmr.msra.gmra.mrb[12].mxu0 %v2697_v51  ;;  %v2678_v23 = vsel %vm2670_vm11, %v5858_v36, %v5859_v8  ;;  %v5320_v2 = vpack.c.bf16 %v2791_v31, %v2789_v45  ;;  %v2578_v12 = vsel %vm2573_vm0, %v5853_v52, %v5854_v37  ;;  %v2797_v51 = vld [vmem:[#allocation11 + $0x288] sm:$0xff]  ;;  %v2803_v52 = vld [vmem:[#allocation11 + $0x2b8] sm:$0xff] }
 0x582   :  { %v7510_v60 = vmax.f32 %v7324_v16, %v2577_v44  ;;  %5315 = vmatpush1.bf16.msra.mxu0 %v5314_v48  ;;  %v7517_v28 = vpop.permute.xlu0 %5861  ;;  %v2705_v26 = vmax.f32 %v7441_v38, %v2678_v23  ;;  %5443 = vmatpush1.bf16.msra.mxu1 %v5442_v20  ;;  %v2807_v44 = vld [vmem:[#allocation11 + $0x2d8] sm:$0xff]  ;;  %v2804_v23 = vld [vmem:[#allocation11 + $0x2c0] sm:$0xff] }
 0x583   :  { %5317 = vmatprep.subr.bf16.mxu0 %v5316_v14  ;;  %v5864_v16 = vunpack.i.h.bf16 %v7517_v28  ;;  %v5863_v55 = vunpack.i.l.bf16 %v7517_v28  ;;  %5480 = vmatprep.subr.bf16.mxu1 %v5954_v22 }
 0x584   :  { %v5865_v32 = vpack.i.bf16 %v7510_v60, %v7503_v35  ;;  %2988 = vmatprep.mubr.f32.mxu0 %v2705_v26  ;;  %v2809_v26 = vld [vmem:[#allocation11 + $0x2e8] sm:$0xff] }
 0x585   :  { %v2583_v38 = vsel %vm2573_vm0, %v5843_v9, %v5863_v55  ;;  %v2584_v59 = vsel %vm2573_vm0, %v5863_v55, %v5864_v16  ;;  %v7540_v9 = vmax.f32 %v7399_v13, %v2578_v12  ;;  %v2801_v13 = vld [vmem:[#allocation11 + $0x2a8] sm:$0xff]  ;;  %v2808_v55 = vld [vmem:[#allocation11 + $0x2e0] sm:$0xff] }
 0x586   :  { %5866 = vrot.lane.b32.xlu1 %v5865_v32, %s5957_s2  ;;  %5319 = vmatpush1.bf16.msra.mxu0 %v5318_v41  ;;  %v7534_v17 = vmax.f32 %v7356_v42, %v2583_v38  ;;  %v7537_v24 = vmax.f32 %v7430_v57, %v2584_v59  ;;  %v5326_v42 = vpack.c.bf16 %v2794_v27, %v2792_v49  ;;  %v2806_v41 = vld [vmem:[#allocation11 + $0x2d0] sm:$0xff]  ;;  %v2813_v32 = vld [vmem:[#allocation11 + $0x308] sm:$0xff]  ;;  %v2812_v38 = vld [vmem:[#allocation11 + $0x300] sm:$0xff] }
 0x587   :  { %5321 = vmatprep.subr.bf16.mxu0 %v5320_v2  ;;  %v5328_v57 = vpack.c.bf16 %v2799_v34, %v2797_v51  ;;  %v5332_v31 = vpack.c.bf16 %v2803_v52, %v2801_v13  ;;  %v2811_v2 = vld [vmem:[#allocation11 + $0x2f8] sm:$0xff]  ;;  %v5338_v40 = vpack.c.bf16 %v2806_v41, %v2804_v23  ;;  %v5344_v12 = vpack.c.bf16 %v2815_v21, %v2813_v32  ;;  %v2814_v59 = vld [vmem:[#allocation11 + $0x310] sm:$0xff]  ;;  %v2816_v51 = vld [vmem:[#allocation11 + $0x320] sm:$0xff] }
 0x588   :  { %v5870_v25 = vpack.i.bf16 %v7537_v24, %v7534_v17  ;;  %v7544_v48 = vpop.permute.xlu0 %2557  ;;  %v5340_v43 = vpack.c.bf16 %v2811_v2, %v2809_v26  ;;  %v5346_v49 = vpack.c.bf16 %v2814_v59, %v2812_v38  ;;  %v2818_v34 = vld [vmem:[#allocation11 + $0x330] sm:$0xff]  ;;  %v2825_v52 = vld [vmem:[#allocation11 + $0x368] sm:$0xff]  ;;  %v2835_v26 = vld [vmem:[#allocation11 + $0x3b8] sm:$0xff] }
 0x589   :  { %v2579_v14 = vsel %vm2573_vm0, %v5854_v37, %v7544_v48  ;;  %v2620_v45 = vmax.f32 %v7479_v30, %v7544_v48  ;;  %v2805_v37 = vld [vmem:[#allocation11 + $0x2c8] sm:$0xff]  ;;  %v5334_v30 = vpack.c.bf16 %v2802_v63, %v2800_v33  ;;  %v2822_v13 = vld [vmem:[#allocation11 + $0x350] sm:$0xff]  ;;  %v2839_v32 = vld [vmem:[#allocation11 + $0x3d8] sm:$0xff]  ;;  %v2606_v50 = vmax.f32 %v7458_v5, %v7544_v48 }
 0x58a   :  { %2650 = vrot.lane.b32.xlu1 %v7540_v9, %s5957_s2  ;;  %5323 = vmatpush1.bf16.msra.mxu0 %v5322_v4  ;;  %v7559_v1 = vmax.f32 %v7410_v15, %v2579_v14  ;;  %v5336_v20 = vpack.c.bf16 %v2807_v44, %v2805_v37  ;;  %v2810_v15 = vld [vmem:[#allocation11 + $0x2f0] sm:$0xff]  ;;  %v2817_v4 = vld [vmem:[#allocation11 + $0x328] sm:$0xff]  ;;  %v2827_v14 = vld [vmem:[#allocation11 + $0x378] sm:$0xff] }
 0x58b   :  { %5871 = vrot.lane.b32.xlu0 %v5870_v25, %s5957_s2  ;;  %5325 = vmatprep.subr.bf16.mxu0 %v5324_v62  ;;  %v5342_v53 = vpack.c.bf16 %v2810_v15, %v2808_v55  ;;  %v2819_v62 = vld [vmem:[#allocation11 + $0x338] sm:$0xff]  ;;  %v2821_v25 = vld [vmem:[#allocation11 + $0x348] sm:$0xff]  ;;  %v2826_v33 = vld [vmem:[#allocation11 + $0x370] sm:$0xff] }
 0x58c   :  { %v5348_v27 = vpack.c.bf16 %v2819_v62, %v2817_v4  ;;  %v2829_v63 = vld [vmem:[#allocation11 + $0x388] sm:$0xff]  ;;  %v2831_v37 = vld [vmem:[#allocation11 + $0x398] sm:$0xff]  ;;  %v2830_v23 = vld [vmem:[#allocation11 + $0x390] sm:$0xff] }
 0x58d   :  { %v2833_v41 = vld [vmem:[#allocation11 + $0x3a8] sm:$0xff]  ;;  %v2834_v55 = vld [vmem:[#allocation11 + $0x3b0] sm:$0xff]  ;;  %v2843_v4 = vld [vmem:[#allocation11 + $0x3f8] sm:$0xff] }
 0x58e   :  { %2571 = vrot.lane.b32.xlu1 %v7553_v56, %s5956_s25  ;;  %5327 = vmatpush1.bf16.msra.mxu0 %v5326_v42  ;;  %v2823_v42 = vld [vmem:[#allocation11 + $0x358] sm:$0xff]  ;;  %v2837_v15 = vld [vmem:[#allocation11 + $0x3c8] sm:$0xff]  ;;  %v2838_v38 = vld [vmem:[#allocation11 + $0x3d0] sm:$0xff] }
 0x58f   :  { %2654 = vrot.lane.b32.xlu0 %v2620_v45, %s5957_s2  ;;  %5329 = vmatprep.subr.bf16.mxu0 %v5328_v57  ;;  %v5350_v57 = vpack.c.bf16 %v2818_v34, %v2816_v51  ;;  %v5352_v19 = vpack.c.bf16 %v2823_v42, %v2821_v25  ;;  %v5354_v45 = vpack.c.bf16 %v2822_v13, %v2820_v54  ;;  %v2841_v59 = vld [vmem:[#allocation11 + $0x3e8] sm:$0xff]  ;;  %v2842_v51 = vld [vmem:[#allocation11 + $0x3f0] sm:$0xff]  ;;  %v2847_v25 = vld [vmem:[#allocation11 + $0x418] sm:$0xff] }
 0x590   :  { %v2845_v34 = vld [vmem:[#allocation11 + $0x408] sm:$0xff] }
 0x592   :  { %2652 = vrot.lane.b32.xlu1 %v7559_v1, %s5957_s2  ;;  %5331 = vmatpush1.bf16.msra.mxu0 %v5330_v61  ;;  %v5356_v61 = vpack.c.bf16 %v2827_v14, %v2825_v52 }
 0x593   :  { %5333 = vmatprep.subr.bf16.mxu0 %v5332_v31  ;;  %v2824_v31 = vld [vmem:[#allocation11 + $0x360] sm:$0xff] }
 0x594   :  { %v5358_v44 = vpack.c.bf16 %v2826_v33, %v2824_v31  ;;  %v2846_v31 = vld [vmem:[#allocation11 + $0x410] sm:$0xff] }
 0x596   :  { %5335 = vmatpush1.bf16.msra.mxu0 %v5334_v30  ;;  %v5360_v30 = vpack.c.bf16 %v2831_v37, %v2829_v63 }
 0x597   :  { %5337 = vmatprep.subr.bf16.mxu0 %v5336_v20  ;;  %v2828_v20 = vld [vmem:[#allocation11 + $0x380] sm:$0xff] }
 0x598   :  { %v5362_v2 = vpack.c.bf16 %v2830_v23, %v2828_v20 }
 0x59a   :  { %5339 = vmatpush1.bf16.msra.mxu0 %v5338_v40  ;;  %v5364_v40 = vpack.c.bf16 %v2835_v26, %v2833_v41 }
 0x59b   :  { %5341 = vmatprep.subr.bf16.mxu0 %v5340_v43  ;;  %v2832_v43 = vld [vmem:[#allocation11 + $0x3a0] sm:$0xff] }
 0x59c   :  { %v5366_v21 = vpack.c.bf16 %v2834_v55, %v2832_v43  ;;  %v2850_v43 = vld [vmem:[#allocation11 + $0x430] sm:$0xff] }
 0x59e   :  { %5343 = vmatpush1.bf16.msra.mxu0 %v5342_v53  ;;  %v5368_v53 = vpack.c.bf16 %v2839_v32, %v2837_v15  ;;  %v2853_v15 = vld [vmem:[#allocation11 + $0x448] sm:$0xff]  ;;  %v2855_v32 = vld [vmem:[#allocation11 + $0x458] sm:$0xff] }
 0x59f   :  { %5345 = vmatprep.subr.bf16.mxu0 %v5344_v12  ;;  %v2836_v12 = vld [vmem:[#allocation11 + $0x3c0] sm:$0xff] }
 0x5a0   :  { %v5370_v62 = vpack.c.bf16 %v2838_v38, %v2836_v12  ;;  %v2857_v12 = vld [vmem:[#allocation11 + $0x468] sm:$0xff]  ;;  %v2859_v38 = vld [vmem:[#allocation11 + $0x478] sm:$0xff] }
 0x5a2   :  { %5347 = vmatpush1.bf16.msra.mxu0 %v5346_v49  ;;  %v5372_v49 = vpack.c.bf16 %v2843_v4, %v2841_v59 }
 0x5a3   :  { %5349 = vmatprep.subr.bf16.mxu0 %v5348_v27  ;;  %v2840_v27 = vld [vmem:[#allocation11 + $0x3e0] sm:$0xff] }
 0x5a4   :  { %v5374_v42 = vpack.c.bf16 %v2842_v51, %v2840_v27  ;;  %v2861_v27 = vld [vmem:[#allocation11 + $0x488] sm:$0xff]  ;;  %v2863_v51 = vld [vmem:[#allocation11 + $0x498] sm:$0xff] }
 0x5a6   :  { %5351 = vmatpush1.bf16.msra.mxu0 %v5350_v57  ;;  %v5376_v57 = vpack.c.bf16 %v2847_v25, %v2845_v34  ;;  %v5392_v25 = vpack.c.bf16 %v2863_v51, %v2861_v27  ;;  %v2893_v27 = vld [vmem:[#allocation11 + $0x588] sm:$0xff]  ;;  %v2895_v51 = vld [vmem:[#allocation11 + $0x598] sm:$0xff] }
 0x5a7   :  { %5353 = vmatprep.subr.bf16.mxu0 %v5352_v19 }
 0x5aa   :  { %5355 = vmatpush1.bf16.msra.mxu0 %v5354_v45 }
 0x5ab   :  { %5357 = vmatprep.subr.bf16.mxu0 %v5356_v61  ;;  %v2844_v61 = vld [vmem:[#allocation11 + $0x400] sm:$0xff] }
 0x5ae   :  { %5359 = vmatpush1.bf16.msra.mxu0 %v5358_v44  ;;  %v2849_v44 = vld [vmem:[#allocation11 + $0x428] sm:$0xff] }
 0x5af   :  { %5361 = vmatprep.subr.bf16.mxu0 %v5360_v30  ;;  %v2851_v30 = vld [vmem:[#allocation11 + $0x438] sm:$0xff] }
 0x5b2   :  { %5363 = vmatpush1.bf16.msra.mxu0 %v5362_v2  ;;  %v5380_v2 = vpack.c.bf16 %v2851_v30, %v2849_v44  ;;  %v2868_v44 = vld [vmem:[#allocation11 + $0x4c0] sm:$0xff]  ;;  %v2870_v30 = vld [vmem:[#allocation11 + $0x4d0] sm:$0xff] }
 0x5b3   :  { %5365 = vmatprep.subr.bf16.mxu0 %v5364_v40  ;;  %v2848_v40 = vld [vmem:[#allocation11 + $0x420] sm:$0xff] }
 0x5b4   :  { %v5382_v28 = vpack.c.bf16 %v2850_v43, %v2848_v40  ;;  %v2879_v40 = vld [vmem:[#allocation11 + $0x518] sm:$0xff] }
 0x5b6   :  { %5367 = vmatpush1.bf16.msra.mxu0 %v5366_v21 }
 0x5b7   :  { %5369 = vmatprep.subr.bf16.mxu0 %v5368_v53 }
 0x5ba   :  { %5371 = vmatpush1.bf16.msra.mxu0 %v5370_v62  ;;  %v2856_v62 = vld [vmem:[#allocation11 + $0x460] sm:$0xff] }
 0x5bb   :  { %5373 = vmatprep.subr.bf16.mxu0 %v5372_v49  ;;  %v2858_v49 = vld [vmem:[#allocation11 + $0x470] sm:$0xff] }
 0x5bc   :  { %v5390_v34 = vpack.c.bf16 %v2858_v49, %v2856_v62  ;;  %v2888_v62 = vld [vmem:[#allocation11 + $0x560] sm:$0xff]  ;;  %v2890_v49 = vld [vmem:[#allocation11 + $0x570] sm:$0xff] }
 0x5be   :  { %5375 = vmatpush1.bf16.msra.mxu0 %v5374_v42  ;;  %v2860_v42 = vld [vmem:[#allocation11 + $0x480] sm:$0xff] }
 0x5bf   :  { %5377 = vmatprep.subr.bf16.mxu0 %v5376_v57  ;;  %v2862_v57 = vld [vmem:[#allocation11 + $0x490] sm:$0xff] }
 0x5f8   :  { %v5867_v19 = vpop.permute.xlu1 %5866 }
 0x5f9   :  { %v5869_v54 = vunpack.i.h.bf16 %v5867_v19  ;;  %v5868_v13 = vunpack.i.l.bf16 %v5867_v19  ;;  %v2865_v19 = vld [vmem:[#allocation11 + $0x4a8] sm:$0xff] }
 0x5fb   :  { %v2677_v52 = vsel %vm2670_vm11, %v5868_v13, %v5858_v36  ;;  %v2673_v33 = vsel %vm2670_vm11, %v5849_v47, %v5869_v54 }
 0x5fc   :  { %v7566_v14 = vpop.permute.xlu1 %2650  ;;  %v2704_v45 = vmax.f32 %v7503_v35, %v2677_v52  ;;  %v5378_v35 = vpack.c.bf16 %v2846_v31, %v2844_v61  ;;  %v2699_v47 = vmax.f32 %v7405_v58, %v2673_v33  ;;  %v2864_v52 = vld [vmem:[#allocation11 + $0x4a0] sm:$0xff]  ;;  %v2869_v61 = vld [vmem:[#allocation11 + $0x4c8] sm:$0xff]  ;;  %v2871_v31 = vld [vmem:[#allocation11 + $0x4d8] sm:$0xff] }
 0x5fd   :  { %v7572_v63 = vpop.permute.xlu0 %5871  ;;  %v2674_v37 = vsel %vm2670_vm11, %v5869_v54, %v7566_v14  ;;  %v5394_v54 = vpack.c.bf16 %v2862_v57, %v2860_v42  ;;  %v2892_v42 = vld [vmem:[#allocation11 + $0x580] sm:$0xff]  ;;  %v2894_v57 = vld [vmem:[#allocation11 + $0x590] sm:$0xff] }
 0x5fe   :  { %v5874_v20 = vunpack.i.h.bf16 %v7572_v63  ;;  %v5873_v36 = vunpack.i.l.bf16 %v7572_v63  ;;  %v2700_v23 = vmax.f32 %v7510_v60, %v2674_v37  ;;  %2989 = vmatmul.mubr.f32.gmra.mrb[14].mxu0 %v2704_v45  ;;  %v2866_v45 = vld [vmem:[#allocation11 + $0x4b0] sm:$0xff]  ;;  %v5400_v37 = vpack.c.bf16 %v2871_v31, %v2869_v61  ;;  %v2901_v61 = vld [vmem:[#allocation11 + $0x5c8] sm:$0xff]  ;;  %v2903_v31 = vld [vmem:[#allocation11 + $0x5d8] sm:$0xff] }
 0x5ff   :  { %v5398_v33 = vpack.c.bf16 %v2866_v45, %v2864_v52  ;;  %v2896_v52 = vld [vmem:[#allocation11 + $0x5a0] sm:$0xff]  ;;  %v2898_v45 = vld [vmem:[#allocation11 + $0x5b0] sm:$0xff] }
 0x600   :  { %v7582_v41 = vpop.permute.xlu1 %2571  ;;  %3059 = vmatprep.mubr.f32.mxu0 %v2700_v23  ;;  %v2680_v26 = vsel %vm2670_vm11, %v5873_v36, %v5874_v20  ;;  %v2679_v48 = vsel %vm2670_vm11, %v5859_v8, %v5873_v36  ;;  %v2852_v8 = vld [vmem:[#allocation11 + $0x440] sm:$0xff]  ;;  %v2873_v36 = vld [vmem:[#allocation11 + $0x4e8] sm:$0xff]  ;;  %v2875_v23 = vld [vmem:[#allocation11 + $0x4f8] sm:$0xff] }
 0x601   :  { %v2655_v55 = vpop.permute.xlu0 %2654  ;;  %v2585_v60 = vsel %vm2573_vm0, %v5864_v16, %v7582_v41  ;;  %v2627_v5 = vmax.f32 %v7553_v56, %v7582_v41  ;;  %v2707_v58 = vmax.f32 %v7534_v17, %v2680_v26  ;;  %v2706_v29 = vmax.f32 %v7434_v7, %v2679_v48  ;;  %v2854_v56 = vld [vmem:[#allocation11 + $0x450] sm:$0xff]  ;;  %v2883_v48 = vld [vmem:[#allocation11 + $0x538] sm:$0xff] }
 0x602   :  { %v2703_v21 = vmax.f32 %v2606_v50, %v2655_v55  ;;  %v7598_v53 = vmax.f32 %v7438_v39, %v2585_v60  ;;  %3060 = vmatmul.mubr.f32.vlgmr.msra.gmra.mrb[12].mxu0 %v2699_v47  ;;  %v5384_v17 = vpack.c.bf16 %v2855_v32, %v2853_v15  ;;  %v5386_v4 = vpack.c.bf16 %v2854_v56, %v2852_v8  ;;  %v2872_v47 = vld [vmem:[#allocation11 + $0x4e0] sm:$0xff]  ;;  %v2874_v26 = vld [vmem:[#allocation11 + $0x4f0] sm:$0xff] }
 0x603   :  { %5379 = vmatpush1.bf16.msra.mxu0 %v5378_v35  ;;  %2668 = vrot.lane.b32.xlu0 %v2627_v5, %s5957_s2  ;;  %v5388_v7 = vpack.c.bf16 %v2859_v38, %v2857_v12  ;;  %v5402_v35 = vpack.c.bf16 %v2870_v30, %v2868_v44  ;;  %v5404_v50 = vpack.c.bf16 %v2875_v23, %v2873_v36  ;;  %v2876_v60 = vld [vmem:[#allocation11 + $0x500] sm:$0xff]  ;;  %v2878_v5 = vld [vmem:[#allocation11 + $0x510] sm:$0xff]  ;;  %v2889_v38 = vld [vmem:[#allocation11 + $0x568] sm:$0xff] }
 0x604   :  { %5049 = vmatmul.mubr.msk.f32.vlgmr.msra.gmra.mrb[10].mxu1 %vm8823_vm7, %v2703_v21  ;;  %3065 = vmatprep.mubr.f32.mxu0 %v2707_v58  ;;  %v7602_v16 = vpop.permute.xlu1 %2652  ;;  %v5406_v43 = vpack.c.bf16 %v2874_v26, %v2872_v47  ;;  %v2881_v58 = vld [vmem:[#allocation11 + $0x528] sm:$0xff]  ;;  %v5410_v15 = vpack.c.bf16 %v2878_v5, %v2876_v60  ;;  %v2880_v21 = vld [vmem:[#allocation11 + $0x520] sm:$0xff]  ;;  %v2886_v12 = vld [vmem:[#allocation11 + $0x550] sm:$0xff] }
 0x605   :  { %2666 = vrot.lane.b32.xlu1 %v7598_v53, %s5957_s2  ;;  %v2676_v39 = vsel %vm2670_vm11, %v7602_v16, %v2655_v55  ;;  %5381 = vmatprep.subr.bf16.mxu0 %v5380_v2  ;;  %v2877_v2 = vld [vmem:[#allocation11 + $0x508] sm:$0xff]  ;;  %v5412_v32 = vpack.c.bf16 %v2883_v48, %v2881_v58  ;;  %v2900_v44 = vld [vmem:[#allocation11 + $0x5c0] sm:$0xff]  ;;  %v2902_v30 = vld [vmem:[#allocation11 + $0x5d0] sm:$0xff] }
 0x606   :  { %v2702_v59 = vmax.f32 %v7559_v1, %v2676_v39  ;;  %3066 = vmatmul.mubr.f32.gmra.mrb[14].mxu0 %v2706_v29  ;;  %3219 = vmatprep.mubr.f32.mxu1 %v5936_v6  ;;  %v2867_v1 = vld [vmem:[#allocation11 + $0x4b8] sm:$0xff]  ;;  %v5408_v55 = vpack.c.bf16 %v2879_v40, %v2877_v2  ;;  %v2885_v29 = vld [vmem:[#allocation11 + $0x548] sm:$0xff]  ;;  %v2884_v39 = vld [vmem:[#allocation11 + $0x540] sm:$0xff]  ;;  %v2675_v40 = vsel %vm2670_vm11, %v7566_v14, %v7602_v16 }
 0x607   :  { %5383 = vmatpush1.bf16.msra.mxu0 %v5382_v28  ;;  %v5396_v13 = vpack.c.bf16 %v2867_v1, %v2865_v19  ;;  %v2882_v28 = vld [vmem:[#allocation11 + $0x530] sm:$0xff]  ;;  %v2897_v19 = vld [vmem:[#allocation11 + $0x5a8] sm:$0xff]  ;;  %v2899_v1 = vld [vmem:[#allocation11 + $0x5b8] sm:$0xff] }
 0x608   :  { %3136 = vmatprep.mubr.f32.mxu0 %v2702_v59  ;;  %5385 = vmatprep.subr.bf16.mxu0 %v5384_v17  ;;  %v2887_v17 = vld [vmem:[#allocation11 + $0x558] sm:$0xff]  ;;  %v5414_v8 = vpack.c.bf16 %v2882_v28, %v2880_v21  ;;  %v2905_v36 = vld [vmem:[#allocation11 + $0x5e8] sm:$0xff]  ;;  %v2904_v47 = vld [vmem:[#allocation11 + $0x5e0] sm:$0xff] }
 0x609   :  { %v5416_v56 = vpack.c.bf16 %v2887_v17, %v2885_v29  ;;  %v2891_v59 = vld [vmem:[#allocation11 + $0x578] sm:$0xff]  ;;  %v2906_v26 = vld [vmem:[#allocation11 + $0x5f0] sm:$0xff] }
 0x60a   :  { %v2907_v23 = vld [vmem:[#allocation11 + $0x5f8] sm:$0xff]  ;;  %v5438_v2 = vpack.c.bf16 %v2906_v26, %v2904_v47 }
 0x60b   :  { %5387 = vmatpush1.bf16.msra.mxu0 %v5386_v4  ;;  %v5418_v4 = vpack.c.bf16 %v2886_v12, %v2884_v39  ;;  %v3250_v28 = vld [vmem:[%s8796_s15] ss:$2 sm:$0x3]  ;;  %v5051_v12 = vld [vmem:[%s8796_s15 + $0x1] ss:$2 sm:$0x3] }
 0x60c   :  { %5389 = vmatprep.subr.bf16.mxu0 %v5388_v7  ;;  %v5420_v7 = vpack.c.bf16 %v2891_v59, %v2889_v38  ;;  %v3265_v39 = vrot.slane %v3250_v28, %v6113_v11  ;;  %v3335_v38 = vrot.slane %v5051_v12, %v6110_v10  ;;  %v3339_v59 = vrot.slane %v5051_v12, %v6113_v11  ;;  %s5961_s15 = smov 29   ;;  %v3582_v12 = vld [vmem:[%s8786_s5 + $0x8] sm:$0xff] }
 0x60f   :  { %5391 = vmatpush1.bf16.msra.mxu0 %v5390_v34  ;;  %v5422_v34 = vpack.c.bf16 %v2890_v49, %v2888_v62 }
 0x610   :  { %5393 = vmatprep.subr.bf16.mxu0 %v5392_v25  ;;  %v5424_v25 = vpack.c.bf16 %v2895_v51, %v2893_v27 }
 0x613   :  { %5395 = vmatpush1.bf16.msra.mxu0 %v5394_v54  ;;  %v5426_v54 = vpack.c.bf16 %v2894_v57, %v2892_v42 }
 0x614   :  { %5397 = vmatprep.subr.bf16.mxu0 %v5396_v13  ;;  %v5428_v13 = vpack.c.bf16 %v2899_v1, %v2897_v19 }
 0x617   :  { %5399 = vmatpush1.bf16.msra.mxu0 %v5398_v33  ;;  %v5430_v33 = vpack.c.bf16 %v2898_v45, %v2896_v52 }
 0x618   :  { %5401 = vmatprep.subr.bf16.mxu0 %v5400_v37  ;;  %v5432_v37 = vpack.c.bf16 %v2903_v31, %v2901_v61 }
 0x61b   :  { %5403 = vmatpush1.bf16.msra.mxu0 %v5402_v35  ;;  %v5434_v35 = vpack.c.bf16 %v2902_v30, %v2900_v44 }
 0x61c   :  { %5405 = vmatprep.subr.bf16.mxu0 %v5404_v50  ;;  %v5436_v50 = vpack.c.bf16 %v2907_v23, %v2905_v36 }
 0x61f   :  { %5407 = vmatpush1.bf16.msra.mxu0 %v5406_v43  ;;  %v2701_v43 = vmax.f32 %v7540_v9, %v2675_v40 }
 0x620   :  { %5409 = vmatprep.subr.bf16.mxu0 %v5408_v55  ;;  %v2613_v55 = vmax.f32 %v7450_v46, %v7582_v41 }
 0x623   :  { %5411 = vmatpush1.bf16.msra.mxu0 %v5410_v15 }
 0x624   :  { %5413 = vmatprep.subr.bf16.mxu0 %v5412_v32 }
 0x627   :  { %5415 = vmatpush1.bf16.msra.mxu0 %v5414_v8 }
 0x628   :  { %5417 = vmatprep.subr.bf16.mxu0 %v5416_v56  ;;  %v3261_v56 = vrot.slane %v3250_v28, %v6110_v10 }
 0x62b   :  { %5419 = vmatpush1.bf16.msra.mxu0 %v5418_v4 }
 0x62c   :  { %5421 = vmatprep.subr.bf16.mxu0 %v5420_v7 }
 0x62f   :  { %5423 = vmatpush1.bf16.msra.mxu0 %v5422_v34 }
 0x630   :  { %5425 = vmatprep.subr.bf16.mxu0 %v5424_v25 }
 0x633   :  { %5427 = vmatpush1.bf16.msra.mxu0 %v5426_v54 }
 0x634   :  { %5429 = vmatprep.subr.bf16.mxu0 %v5428_v13 }
 0x637   :  { %5431 = vmatpush1.bf16.msra.mxu0 %v5430_v33 }
 0x638   :  { %5433 = vmatprep.subr.bf16.mxu0 %v5432_v37 }
 0x63b   :  { %5435 = vmatpush1.bf16.msra.mxu0 %v5434_v35 }
 0x63c   :  { %5437 = vmatprep.subr.bf16.mxu0 %v5436_v50 }
 0x63f   :  { %5439 = vmatpush1.bf16.msra.mxu0 %v5438_v2 }
 0x642   :  { %3137 = vmatmul.mubr.f32.vlgmr.msra.gmra.mrb[12].mxu0 %v2701_v43 }
 0x675   :  { %v2669_v60 = vpop.permute.xlu0 %2668 }
 0x676   :  { %v2710_v5 = vmax.f32 %v2613_v55, %v2669_v60 }
 0x677   :  { %v2667_v58 = vpop.permute.xlu1 %2666 }
 0x678   :  { %v2681_v48 = vsel %vm2670_vm11, %v5874_v20, %v2667_v58  ;;  %v2682_v15 = vsel %vm2670_vm11, %v2667_v58, %v2669_v60  ;;  %5050 = vmatmul.mubr.msk.f32.gmra.mrb[12].mxu1 %vm8823_vm7, %v2710_v5 }
 0x679   :  { %v2708_v14 = vmax.f32 %v7537_v24, %v2681_v48  ;;  %v2709_v16 = vmax.f32 %v7598_v53, %v2682_v15 }
 0x67b   :  { %3142 = vmatprep.mubr.f32.mxu0 %v2709_v16 }
 0x67c   :  { %3143 = vmatmul.mubr.f32.gmra.mrb[14].mxu0 %v2708_v14 }
 0x67d   :  { %5052 = vmatprep.mubr.msk.f32.mxu0 %vm8823_vm7, %v3582_v12 }
 0x6d7   :  { %v3215_v9 = vpop.f32.mrb[10].mxu1 }
 0x6d8   :  { %v3217_v32 = vpop.f32.mrb[11].mxu1 }
 0x715   :  { %v3138_v46 = vpop.f32.mrb[12].mxu0 }
 0x716   :  { %v5752_v63 = vadd.f32 %v3215_v9, %v3138_v46  ;;  %v3140_v20 = vpop.f32.mrb[13].mxu0 }
 0x717   :  { %v5753_v41 = vadd.f32 %v3217_v32, %v3140_v20 }
 0x718   :  { %3230 = vrot.lane.b32.xlu1 %v5752_v63, %s8863_s17 }
 0x719   :  { %3232 = vrot.lane.b32.xlu0 %v5753_v41, %s8863_s17 }
 0x74b   :  { %v3221_v24 = vpop.f32.mrb[12].mxu1 }
 0x74c   :  { %v3223_v21 = vpop.f32.mrb[13].mxu1 }
 0x74f   :  { %v3144_v53 = vpop.f32.mrb[14].mxu0 }
 0x750   :  { %v5754_v29 = vadd.f32 %v3221_v24, %v3144_v53  ;;  %v3146_v17 = vpop.f32.mrb[15].mxu0 }
 0x751   :  { %v5755_v8 = vadd.f32 %v3223_v21, %v3146_v17 }
 0x752   :  { %3234 = vrot.lane.b32.xlu1 %v5754_v29, %s8863_s17 }
 0x753   :  { %3236 = vrot.lane.b32.xlu0 %v5755_v8, %s8863_s17 }
 0x756   :  { %3266 = vrot.lane.b32.xlu1 %v3261_v56, %s5958_s29 }
 0x757   :  { %3268 = vrot.lane.b32.xlu0 %v3265_v39, %s5958_s29 }
 0x75a   :  { %3340 = vrot.lane.b32.xlu1 %v3335_v38, %s5941_s30 }
 0x75b   :  { %3342 = vrot.lane.b32.xlu0 %v3339_v59, %s5941_s30  ;;  %s5962_s30 = smov 126  }
 0x75e   :  { %3377 = vrot.lane.b32.xlu1 %v3261_v56, %s5959_s27 }
 0x75f   :  { %3379 = vrot.lane.b32.xlu0 %v3265_v39, %s5959_s27  ;;  %s5969_s27 = smov 117  }
 0x762   :  { %3443 = vrot.lane.b32.xlu1 %v3335_v38, %s5960_s7 }
 0x763   :  { %3445 = vrot.lane.b32.xlu0 %v3339_v59, %s5960_s7  ;;  %s5970_s7 = smov 49  }
 0x766   :  { %3482 = vrot.lane.b32.xlu1 %v3261_v56, %s5961_s15 }
 0x767   :  { %3484 = vrot.lane.b32.xlu0 %v3265_v39, %s5961_s15 }
 0x76a   :  { %3548 = vrot.lane.b32.xlu1 %v3335_v38, %s5942_s0 }
 0x76b   :  { %3550 = vrot.lane.b32.xlu0 %v3339_v59, %s5942_s0  ;;  %s5963_s0 = smov 112   ;;  %v3625_v59 = vld [vmem:[%s8787_s6] sm:$0xff] }
 0x78a   :  { %v3231_v4 = vpop.permute.xlu1 %3230 }
 0x78b   :  { %3245 = vst.msk [vmem:[#allocation7] sm:$0xff] %vm3244_vm9, %v3231_v4  ;;  %v3233_v7 = vpop.permute.xlu0 %3232 }
 0x78c   :  { %v3238_v62 = vsel %vm8823_vm7, %v3231_v4, %v3233_v7  ;;  %v3626_v4 = vld [vmem:[%s8787_s6 + $0x8] sm:$0xff] }
 0x78d   :  { %3247 = vst.msk [vmem:[#allocation7 + $0x8] sm:$0xff] %vm3246_vm1, %v3238_v62 }
 0x792   :  { %v7649_v49 = vld [vmem:[#allocation7] sm:$0xff] }
 0x793   :  { %3308 = vrot.lane.b32.xlu1 %v7649_v49, %s5962_s30 }
 0x794   :  { %v7653_v27 = vld [vmem:[#allocation7 + $0x8] sm:$0xff] }
 0x795   :  { %3310 = vrot.lane.b32.xlu0 %v7653_v27, %s5962_s30 }
 0x797   :  { %3420 = vrot.lane.b32.xlu1 %v7649_v49, %s5963_s0 }
 0x799   :  { %3422 = vrot.lane.b32.xlu0 %v7653_v27, %s5963_s0 }
 0x7c4   :  { %v3235_v51 = vpop.permute.xlu1 %3234 }
 0x7c5   :  { %3248 = vst.msk [vmem:[#allocation7 + $0x10] sm:$0xff] %vm3244_vm9, %v3235_v51  ;;  %v3237_v34 = vpop.permute.xlu0 %3236 }
 0x7c6   :  { %v3239_v25 = vsel %vm8823_vm7, %v3235_v51, %v3237_v34  ;;  %v3628_v51 = vld [vmem:[%s8787_s6 + $0x18] sm:$0xff] }
 0x7c7   :  { %3249 = vst.msk [vmem:[#allocation7 + $0x18] sm:$0xff] %vm3246_vm1, %v3239_v25  ;;  %vm3401_vm1 = vcmask 924672  }
 0x7c8   :  { %v3267_v42 = vpop.permute.xlu1 %3266 }
 0x7c9   :  { %v3274_v57 = vmul.f32 %v7649_v49, %v3267_v42  ;;  %v3269_v19 = vpop.permute.xlu0 %3268 }
 0x7ca   :  { %v3271_v1 = vsel %vm3270_vm5, %v3267_v42, %v3269_v19 }
 0x7cb   :  { %v3275_v54 = vmul.f32 %v7653_v27, %v3271_v1  ;;  %3282 = vrot.lane.b32.xlu1 %v3274_v57, %s5956_s25 }
 0x7cc   :  { %v3341_v13 = vpop.permute.xlu1 %3340  ;;  %v3255_v5 = vld [vmem:[#allocation7 + $0x10] sm:$0xff] }
 0x7cd   :  { %v3347_v52 = vmul.f32 %v3341_v13, %v7649_v49  ;;  %3284 = vrot.lane.b32.xlu0 %v3275_v54, %s5956_s25  ;;  %v3343_v45 = vpop.permute.xlu0 %3342  ;;  %v3276_v48 = vmul.f32 %v3267_v42, %v3255_v5  ;;  %v3349_v14 = vmul.f32 %v3341_v13, %v3255_v5 }
 0x7ce   :  { %v3344_v61 = vsel %vm195_vm2, %v3341_v13, %v3343_v45  ;;  %vm3486_vm2 = vcmask 236544   ;;  %v3256_v58 = vld [vmem:[#allocation7 + $0x18] sm:$0xff] }
 0x7cf   :  { %v3348_v31 = vmul.f32 %v3344_v61, %v7653_v27  ;;  %3355 = vrot.lane.b32.xlu1 %v3347_v52, %s8834_s16  ;;  %v3277_v15 = vmul.f32 %v3271_v1, %v3256_v58  ;;  %v3350_v16 = vmul.f32 %v3344_v61, %v3256_v58 }
 0x7d0   :  { %v3378_v33 = vpop.permute.xlu1 %3377 }
 0x7d1   :  { %v3385_v37 = vmul.f32 %v3378_v33, %v7649_v49  ;;  %3357 = vrot.lane.b32.xlu0 %v3348_v31, %s8834_s16  ;;  %v3380_v44 = vpop.permute.xlu0 %3379  ;;  %v3387_v9 = vmul.f32 %v3378_v33, %v3255_v5 }
 0x7d2   :  { %v3382_v30 = vsel %vm3381_vm6, %v3378_v33, %v3380_v44  ;;  %vm3467_vm6 = vcmask 908288  }
 0x7d3   :  { %v3386_v36 = vmul.f32 %v3382_v30, %v7653_v27  ;;  %3393 = vrot.lane.b32.xlu1 %v3385_v37, %s5964_s21  ;;  %v3388_v32 = vmul.f32 %v3382_v30, %v3256_v58 }
 0x7d4   :  { %v3444_v23 = vpop.permute.xlu1 %3443 }
 0x7d5   :  { %v3451_v35 = vmul.f32 %v3444_v23, %v7649_v49  ;;  %3395 = vrot.lane.b32.xlu0 %v3386_v36, %s5964_s21  ;;  %v3446_v50 = vpop.permute.xlu0 %3445  ;;  %v3453_v46 = vmul.f32 %v3444_v23, %v3255_v5 }
 0x7d6   :  { %v3448_v47 = vsel %vm3447_vm4, %v3444_v23, %v3446_v50 }
 0x7d7   :  { %v3452_v26 = vmul.f32 %v3448_v47, %v7653_v27  ;;  %3459 = vrot.lane.b32.xlu1 %v3451_v35, %s5965_s1  ;;  %v3454_v20 = vmul.f32 %v3448_v47, %v3256_v58 }
 0x7d8   :  { %v3483_v2 = vpop.permute.xlu1 %3482 }
 0x7d9   :  { %v3490_v40 = vmul.f32 %v3483_v2, %v7649_v49  ;;  %3461 = vrot.lane.b32.xlu0 %v3452_v26, %s5965_s1  ;;  %v3485_v43 = vpop.permute.xlu0 %3484  ;;  %v3492_v63 = vmul.f32 %v3483_v2, %v3255_v5 }
 0x7da   :  { %v3487_v55 = vsel %vm3486_vm2, %v3483_v2, %v3485_v43  ;;  %vm3506_vm2 = vcmask 809984  }
 0x7db   :  { %v3491_v60 = vmul.f32 %v3487_v55, %v7653_v27  ;;  %3498 = vrot.lane.b32.xlu1 %v3490_v40, %s5966_s28  ;;  %v3493_v21 = vmul.f32 %v3487_v55, %v3256_v58 }
 0x7dc   :  { %v3549_v41 = vpop.permute.xlu1 %3548 }
 0x7dd   :  { %3500 = vrot.lane.b32.xlu0 %v3491_v60, %s5966_s28  ;;  %v3551_v24 = vpop.permute.xlu0 %3550  ;;  %v3555_v28 = vmul.f32 %v3549_v41, %v7649_v49  ;;  %v3557_v17 = vmul.f32 %v3549_v41, %v3255_v5 }
 0x7de   :  { %v3552_v53 = vsel %vm505_vm3, %v3549_v41, %v3551_v24  ;;  %vm8864_vm3 = vcmask 556032  }
 0x7df   :  { %3312 = vrot.lane.b32.xlu1 %v3255_v5, %s5962_s30  ;;  %v3556_v29 = vmul.f32 %v3552_v53, %v7653_v27  ;;  %v3558_v56 = vmul.f32 %v3552_v53, %v3256_v58  ;;  %vm8865_vm11 = vmmov %vm8864_vm3 }
 0x7e0   :  { %vm8866_vm10 = vmmov %vm8864_vm3 }
 0x7e1   :  { %3314 = vrot.lane.b32.xlu0 %v3256_v58, %s5962_s30  ;;  %vm8867_vm9 = vmmov %vm8864_vm3  ;;  %s5977_s30 = smov 27  }
 0x7e2   :  { %vm8868_vm5 = vmmov %vm8864_vm3 }
 0x7e3   :  { %3424 = vrot.lane.b32.xlu1 %v3255_v5, %s5963_s0  ;;  %vm8869_vm4 = vmmov %vm8864_vm3 }
 0x7e5   :  { %3426 = vrot.lane.b32.xlu0 %v3256_v58, %s5963_s0  ;;  %s5979_s0 = smov 46  }
 0x7e7   :  { %3286 = vrot.lane.b32.xlu1 %v3276_v48, %s5956_s25 }
 0x7e9   :  { %3288 = vrot.lane.b32.xlu0 %v3277_v15, %s5956_s25 }
 0x7eb   :  { %3525 = vrot.lane.b32.xlu1 %v7649_v49, %s5967_s4 }
 0x7ed   :  { %3527 = vrot.lane.b32.xlu0 %v7653_v27, %s5967_s4  ;;  %v3627_v27 = vld [vmem:[%s8787_s6 + $0x10] sm:$0xff]  ;;  %s5968_s6 = smov 114  }
 0x7ef   :  { %3359 = vrot.lane.b32.xlu1 %v3349_v14, %s8834_s16 }
 0x7f1   :  { %3361 = vrot.lane.b32.xlu0 %v3350_v16, %s8834_s16 }
 0x7f3   :  { %3397 = vrot.lane.b32.xlu1 %v3387_v9, %s5964_s21 }
 0x7f5   :  { %3399 = vrot.lane.b32.xlu0 %v3388_v32, %s5964_s21 }
 0x7f7   :  { %3463 = vrot.lane.b32.xlu1 %v3453_v46, %s5965_s1 }
 0x7f9   :  { %3531 = vrot.lane.b32.xlu0 %v3256_v58, %s5967_s4 }
 0x7fb   :  { %3502 = vrot.lane.b32.xlu1 %v3492_v63, %s5966_s28 }
 0x7fd   :  { %3465 = vrot.lane.b32.xlu0 %v3454_v20, %s5965_s1 }
 0x7ff   :  { %3529 = vrot.lane.b32.xlu1 %v3255_v5, %s5967_s4 }
 0x801   :  { %3504 = vrot.lane.b32.xlu0 %v3493_v21, %s5966_s28 }
 0x803   :  { %3563 = vrot.lane.b32.xlu1 %v3555_v28, %s8836_s24 }
 0x805   :  { %v3309_v8 = vpop.permute.xlu1 %3308  ;;  %3565 = vrot.lane.b32.xlu0 %v3556_v29, %s8836_s24 }
 0x807   :  { %3567 = vrot.lane.b32.xlu1 %v3557_v17, %s8836_s24  ;;  %v3311_v39 = vpop.permute.xlu0 %3310 }
 0x808   :  { %v7715_v38 = vsel %vm3316_vm8, %v3309_v8, %v3311_v39  ;;  %3324 = vst.msk [vmem:[#allocation8 + $0x28] sm:$0xff] %vm8864_vm3, %v3311_v39 }
 0x809   :  { %3569 = vrot.lane.b32.xlu0 %v3558_v56, %s8836_s24  ;;  %v3421_v7 = vpop.permute.xlu1 %3420 }
 0x80b   :  { %3631 = vperm.xlu1 %5823, %v3625_v59   ;;  %v3423_v62 = vpop.permute.xlu0 %3422 }
 0x80c   :  { %v7727_v49 = vsel %vm3428_vm14, %v3421_v7, %v3423_v62  ;;  %3436 = vst.msk [vmem:[#allocation8 + $0x88] sm:$0xff] %vm8865_vm11, %v3423_v62  ;;  %vm8870_vm11 = vmmov %vm8864_vm3 }
 0x80d   :  { %3636 = vperm.xlu0 %5824, %v3626_v4  }
 0x80f   :  { %3641 = vperm.xlu1 %5823, %v3627_v27   ;;  %v3594_v63 = vld [vmem:[#allocation8 + $0x28] sm:$0xff] }
 0x811   :  { %3646 = vperm.xlu0 %5824, %v3628_v51  }
 0x83d   :  { %v3283_v34 = vpop.permute.xlu1 %3282 }
 0x83f   :  { %v3285_v25 = vpop.permute.xlu0 %3284 }
 0x840   :  { %v3290_v42 = vsel %vm2573_vm0, %v3283_v34, %v3285_v25  ;;  %3297 = vst.msk [vmem:[#allocation8 + $0x8] sm:$0xff] %vm8866_vm10, %v3285_v25  ;;  %vm8871_vm10 = vmmov %vm8864_vm3  ;;  %v3606_v34 = vld [vmem:[#allocation8 + $0x88] sm:$0xff] }
 0x841   :  { %v3356_v57 = vpop.permute.xlu1 %3355 }
 0x843   :  { %v3358_v19 = vpop.permute.xlu0 %3357 }
 0x844   :  { %v7739_v1 = vsel %vm8825_vm13, %v3356_v57, %v3358_v19  ;;  %3370 = vst.msk [vmem:[#allocation8 + $0x48] sm:$0xff] %vm8867_vm9, %v3358_v19  ;;  %vm8872_vm9 = vmmov %vm8864_vm3 }
 0x845   :  { %v3394_v54 = vpop.permute.xlu1 %3393 }
 0x847   :  { %v3396_v13 = vpop.permute.xlu0 %3395  ;;  %v3590_v48 = vld [vmem:[#allocation8 + $0x8] sm:$0xff] }
 0x848   :  { %v7743_v52 = vsel %vm3401_vm1, %v3394_v54, %v3396_v13  ;;  %3409 = vst.msk [vmem:[#allocation8 + $0x68] sm:$0xff] %vm8868_vm5, %v3396_v13  ;;  %vm3533_vm5 = vcmask 801792  }
 0x849   :  { %v3460_v45 = vpop.permute.xlu1 %3459 }
 0x84b   :  { %v3462_v61 = vpop.permute.xlu0 %3461  ;;  %v3598_v29 = vld [vmem:[#allocation8 + $0x48] sm:$0xff] }
 0x84c   :  { %v7747_v31 = vsel %vm3467_vm6, %v3460_v45, %v3462_v61  ;;  %3475 = vst.msk [vmem:[#allocation8 + $0xa8] sm:$0xff] %vm8869_vm4, %v3462_v61  ;;  %vm8875_vm4 = vmmov %vm8864_vm3 }
 0x84d   :  { %v3499_v33 = vpop.permute.xlu1 %3498 }
 0x84f   :  { %v3501_v37 = vpop.permute.xlu0 %3500  ;;  %v3602_v59 = vld [vmem:[#allocation8 + $0x68] sm:$0xff] }
 0x850   :  { %v7751_v44 = vsel %vm3506_vm2, %v3499_v33, %v3501_v37  ;;  %3514 = vst.msk [vmem:[#allocation8 + $0xc8] sm:$0xff] %vm8864_vm3, %v3501_v37 }
 0x851   :  { %v3313_v30 = vpop.permute.xlu1 %3312 }
 0x853   :  { %v3315_v36 = vpop.permute.xlu0 %3314  ;;  %v3610_v45 = vld [vmem:[#allocation8 + $0xa8] sm:$0xff] }
 0x854   :  { %v3318_v23 = vsel %vm3316_vm8, %v3313_v30, %v3315_v36  ;;  %3326 = vst.msk [vmem:[#allocation8 + $0x38] sm:$0xff] %vm8870_vm11, %v3315_v36  ;;  %vm8873_vm8 = vmmov %vm8864_vm3 }
 0x855   :  { %v3425_v35 = vpop.permute.xlu1 %3424  ;;  %v5450_v53 = vpack.c.bf16 %v3318_v23, %v7715_v38 }
 0x857   :  { %v3427_v50 = vpop.permute.xlu0 %3426  ;;  %v3614_v23 = vld [vmem:[#allocation8 + $0xc8] sm:$0xff] }
 0x858   :  { %v3430_v47 = vsel %vm3428_vm14, %v3425_v35, %v3427_v50  ;;  %3438 = vst.msk [vmem:[#allocation8 + $0x98] sm:$0xff] %vm8871_vm10, %v3427_v50  ;;  %vm8874_vm14 = vmmov %vm8864_vm3 }
 0x859   :  { %v3287_v26 = vpop.permute.xlu1 %3286  ;;  %v5462_v54 = vpack.c.bf16 %v3430_v47, %v7727_v49 }
 0x85b   :  { %v3289_v2 = vpop.permute.xlu0 %3288  ;;  %v3596_v14 = vld [vmem:[#allocation8 + $0x38] sm:$0xff] }
 0x85c   :  { %v3291_v40 = vsel %vm2573_vm0, %v3287_v26, %v3289_v2  ;;  %3299 = vst.msk [vmem:[#allocation8 + $0x18] sm:$0xff] %vm8872_vm9, %v3289_v2  ;;  %v5448_v20 = vpack.c.bf16 %v3596_v14, %v3594_v63  ;;  %v3585_v14 = vld [vmem:[%s8786_s5 + $0x20] sm:$0xff] }
 0x85d   :  { %v3526_v43 = vpop.permute.xlu1 %3525  ;;  %v5446_v46 = vpack.c.bf16 %v3291_v40, %v3290_v42 }
 0x85f   :  { %v3528_v55 = vpop.permute.xlu0 %3527  ;;  %v3608_v7 = vld [vmem:[#allocation8 + $0x98] sm:$0xff] }
 0x860   :  { %v7761_v60 = vsel %vm3533_vm5, %v3526_v43, %v3528_v55  ;;  %3541 = vst.msk [vmem:[#allocation8 + $0xe8] sm:$0xff] %vm8873_vm8, %v3528_v55  ;;  %v5460_v42 = vpack.c.bf16 %v3608_v7, %v3606_v34 }
 0x861   :  { %v3360_v5 = vpop.permute.xlu1 %3359 }
 0x863   :  { %v3362_v58 = vpop.permute.xlu0 %3361  ;;  %v3592_v15 = vld [vmem:[#allocation8 + $0x18] sm:$0xff] }
 0x864   :  { %v3364_v16 = vsel %vm8825_vm13, %v3360_v5, %v3362_v58  ;;  %3372 = vst.msk [vmem:[#allocation8 + $0x58] sm:$0xff] %vm8874_vm14, %v3362_v58  ;;  %v5444_v9 = vpack.c.bf16 %v3592_v15, %v3590_v48  ;;  %v3581_v48 = vld [vmem:[%s8786_s5] sm:$0xff]  ;;  %v3586_v15 = vld [vmem:[%s8786_s5 + $0x28] sm:$0xff]  ;;  %vm4215_vm13 = vcmask 861640  }
 0x865   :  { %v3398_v32 = vpop.permute.xlu1 %3397  ;;  %v5454_v39 = vpack.c.bf16 %v3364_v16, %v7739_v1  ;;  %v3588_v16 = vld [vmem:[%s8786_s5 + $0x38] sm:$0xff] }
 0x866   :  { %5445 = vmatprep.subr.bf16.mxu0 %v5444_v9  ;;  %v3587_v9 = vld [vmem:[%s8786_s5 + $0x30] sm:$0xff] }
 0x867   :  { %5447 = vmatpush1.bf16.msra.mxu0 %v5446_v46  ;;  %v3400_v41 = vpop.permute.xlu0 %3399  ;;  %v3618_v2 = vld [vmem:[#allocation8 + $0xe8] sm:$0xff] }
 0x868   :  { %v3403_v24 = vsel %vm3401_vm1, %v3398_v32, %v3400_v41  ;;  %3411 = vst.msk [vmem:[#allocation8 + $0x78] sm:$0xff] %vm8875_vm4, %v3400_v41  ;;  %5449 = vmatprep.subr.bf16.mxu0 %v5448_v20  ;;  %vm8876_vm1 = vmmov %vm8864_vm3 }
 0x869   :  { %v3464_v21 = vpop.permute.xlu1 %3463  ;;  %v5458_v51 = vpack.c.bf16 %v3403_v24, %v7743_v52  ;;  %vm8877_vm11 = vmmov %vm8876_vm1 }
 0x86a   :  { %vm8880_vm10 = vmmov %vm8876_vm1 }
 0x86b   :  { %5451 = vmatpush1.bf16.msra.mxu0 %v5450_v53  ;;  %v3532_v28 = vpop.permute.xlu0 %3531  ;;  %v3600_v17 = vld [vmem:[#allocation8 + $0x58] sm:$0xff]  ;;  %vm8881_vm9 = vmmov %vm8876_vm1 }
 0x86c   :  { %3543 = vst.msk [vmem:[#allocation8 + $0xf8] sm:$0xff] %vm8864_vm3, %v3532_v28  ;;  %v5452_v8 = vpack.c.bf16 %v3600_v17, %v3598_v29  ;;  %vm8882_vm8 = vmmov %vm8876_vm1 }
 0x86d   :  { %v3503_v56 = vpop.permute.xlu1 %3502  ;;  %vm8883_vm14 = vmmov %vm8876_vm1 }
 0x86e   :  { %5453 = vmatprep.subr.bf16.mxu0 %v5452_v8  ;;  %vm8884_vm4 = vmmov %vm8876_vm1 }
 0x86f   :  { %5455 = vmatpush1.bf16.msra.mxu0 %v5454_v39  ;;  %v3466_v12 = vpop.permute.xlu0 %3465  ;;  %v3604_v4 = vld [vmem:[#allocation8 + $0x78] sm:$0xff]  ;;  %vm8885_vm3 = vmmov %vm8876_vm1 }
 0x870   :  { %v3469_v62 = vsel %vm3467_vm6, %v3464_v21, %v3466_v12  ;;  %3477 = vst.msk [vmem:[#allocation8 + $0xb8] sm:$0xff] %vm8876_vm1, %v3466_v12  ;;  %v5456_v38 = vpack.c.bf16 %v3604_v4, %v3602_v59  ;;  %vm8878_vm6 = vmmov %vm8876_vm1 }
 0x871   :  { %v3530_v27 = vpop.permute.xlu1 %3529  ;;  %v5466_v37 = vpack.c.bf16 %v3469_v62, %v7747_v31 }
 0x872   :  { %v3535_v25 = vsel %vm3533_vm5, %v3530_v27, %v3532_v28  ;;  %5457 = vmatprep.subr.bf16.mxu0 %v5456_v38 }
 0x873   :  { %5459 = vmatpush1.bf16.msra.mxu0 %v5458_v51  ;;  %v3505_v57 = vpop.permute.xlu0 %3504  ;;  %v3620_v50 = vld [vmem:[#allocation8 + $0xf8] sm:$0xff]  ;;  %v5474_v31 = vpack.c.bf16 %v3535_v25, %v7761_v60 }
 0x874   :  { %v3508_v19 = vsel %vm3506_vm2, %v3503_v56, %v3505_v57  ;;  %3516 = vst.msk [vmem:[#allocation8 + $0xd8] sm:$0xff] %vm8877_vm11, %v3505_v57  ;;  %5461 = vmatprep.subr.bf16.mxu0 %v5460_v42  ;;  %vm8879_vm2 = vmmov %vm8876_vm1  ;;  %v5472_v40 = vpack.c.bf16 %v3620_v50, %v3618_v2  ;;  %v3583_v60 = vld [vmem:[%s8786_s5 + $0x10] sm:$0xff] }
 0x875   :  { %v3564_v1 = vpop.permute.xlu1 %3563  ;;  %v5470_v26 = vpack.c.bf16 %v3508_v19, %v7751_v44  ;;  %v3584_v44 = vld [vmem:[%s8786_s5 + $0x18] sm:$0xff]  ;;  %vm8886_vm11 = vmmov %vm8876_vm1  ;;  %s5974_s5 = smov 106  }
 0x877   :  { %5463 = vmatpush1.bf16.msra.mxu0 %v5462_v54  ;;  %v3566_v13 = vpop.permute.xlu0 %3565  ;;  %v3612_v61 = vld [vmem:[#allocation8 + $0xb8] sm:$0xff] }
 0x878   :  { %v3571_v52 = vsel %vm563_vm12, %v3564_v1, %v3566_v13  ;;  %3578 = vst.msk [vmem:[#allocation8 + $0x108] sm:$0xff] %vm8878_vm6, %v3566_v13  ;;  %v5464_v33 = vpack.c.bf16 %v3612_v61, %v3610_v45  ;;  %v3884_v13 = vld [vmem:[%s8789_s8] sm:$0xff]  ;;  %v3885_v45 = vld [vmem:[%s8789_s8 + $0x8] sm:$0xff]  ;;  %v3886_v61 = vld [vmem:[%s8789_s8 + $0x10] sm:$0xff]  ;;  %vm3921_vm6 = vcmask 1043456  }
 0x879   :  { %v3568_v30 = vpop.permute.xlu1 %3567 }
 0x87a   :  { %5465 = vmatprep.subr.bf16.mxu0 %v5464_v33  ;;  %v5481_v33 = vpack.c.bf16 %v3885_v45, %v3884_v13 }
 0x87b   :  { %5467 = vmatpush1.bf16.msra.mxu0 %v5466_v37  ;;  %v3570_v36 = vpop.permute.xlu0 %3569  ;;  %v3616_v35 = vld [vmem:[#allocation8 + $0xd8] sm:$0xff]  ;;  %v3887_v37 = vld [vmem:[%s8789_s8 + $0x18] sm:$0xff] }
 0x87c   :  { %v3572_v49 = vsel %vm563_vm12, %v3568_v30, %v3570_v36  ;;  %3580 = vst.msk [vmem:[#allocation8 + $0x118] sm:$0xff] %vm8879_vm2, %v3570_v36  ;;  %v5468_v47 = vpack.c.bf16 %v3616_v35, %v3614_v23  ;;  %vm3766_vm12 = vcmask 687648   ;;  %5482 = vmatpush1.bf16.msra.mxu1 %v5481_v33  ;;  %v5484_v30 = vpack.c.bf16 %v3887_v37, %v3886_v61  ;;  %v3888_v36 = vld [vmem:[%s8789_s8 + $0x20] sm:$0xff]  ;;  %v3889_v23 = vld [vmem:[%s8789_s8 + $0x28] sm:$0xff] }
 0x87d   :  { %v5478_v58 = vpack.c.bf16 %v3572_v49, %v3571_v52  ;;  %3767 = vst.msk [vmem:[#allocation9 + $0x8] sm:$0xff] %vm3766_vm12, %v5936_v6  ;;  %3768 = vst.msk [vmem:[#allocation9 + $0x18] sm:$0xff] %vm3766_vm12, %v5936_v6  ;;  %5483 = vmatprep.subr.bf16.mxu1 %v5954_v22  ;;  %v5487_v50 = vpack.c.bf16 %v3889_v23, %v3888_v36  ;;  %v3890_v49 = vld [vmem:[%s8789_s8 + $0x30] sm:$0xff]  ;;  %vm3863_vm2 = vcmask 932864  }
 0x87e   :  { %5469 = vmatprep.subr.bf16.mxu0 %v5468_v47  ;;  %3769 = vst.msk [vmem:[#allocation9 + $0x28] sm:$0xff] %vm3766_vm12, %v5936_v6  ;;  %3770 = vst.msk [vmem:[#allocation9 + $0x38] sm:$0xff] %vm3766_vm12, %v5936_v6  ;;  %v3891_v47 = vld [vmem:[%s8789_s8 + $0x38] sm:$0xff] }
 0x87f   :  { %5471 = vmatpush1.bf16.msra.mxu0 %v5470_v26  ;;  %v3622_v43 = vld [vmem:[#allocation8 + $0x108] sm:$0xff]  ;;  %v5490_v2 = vpack.c.bf16 %v3891_v47, %v3890_v49  ;;  %vm8887_vm12 = vmmov %vm8876_vm1 }
 0x880   :  { %5473 = vmatprep.subr.bf16.mxu0 %v5472_v40  ;;  %5485 = vmatpush1.bf16.msra.mxu1 %v5484_v30  ;;  %v3892_v40 = vld [vmem:[%s8789_s8 + $0x40] sm:$0xff] }
 0x881   :  { %5486 = vmatprep.subr.bf16.mxu1 %v5954_v22 }
 0x883   :  { %5475 = vmatpush1.bf16.msra.mxu0 %v5474_v31  ;;  %v3624_v55 = vld [vmem:[#allocation8 + $0x118] sm:$0xff] }
 0x884   :  { %v5476_v5 = vpack.c.bf16 %v3624_v55, %v3622_v43  ;;  %5488 = vmatpush1.bf16.msra.mxu1 %v5487_v50  ;;  %v3893_v31 = vld [vmem:[%s8789_s8 + $0x48] sm:$0xff]  ;;  %v3894_v55 = vld [vmem:[%s8789_s8 + $0x50] sm:$0xff] }
 0x885   :  { %5489 = vmatprep.subr.bf16.mxu1 %v5954_v22  ;;  %v5493_v43 = vpack.c.bf16 %v3893_v31, %v3892_v40 }
 0x886   :  { %5477 = vmatprep.subr.bf16.mxu0 %v5476_v5  ;;  %v3895_v5 = vld [vmem:[%s8789_s8 + $0x58] sm:$0xff] }
 0x887   :  { %5479 = vmatpush1.bf16.msra.mxu0 %v5478_v58  ;;  %v5496_v58 = vpack.c.bf16 %v3895_v5, %v3894_v55 }
 0x888   :  { %5491 = vmatpush1.bf16.msra.mxu1 %v5490_v2 }
 0x889   :  { %5492 = vmatprep.subr.bf16.mxu1 %v5954_v22 }
 0x88a   :  { %3726 = vmatmul.mubr.f32.vlgmr.msra.gmra.mrb[16].mxu0 %v3581_v48  ;;  %v3632_v32 = vpop.permute.xlu1 %3631  ;;  %v3896_v48 = vld [vmem:[%s8789_s8 + $0x60] sm:$0xff] }
 0x88b   :  { %5053 = vmatprep.mubr.msk.f32.mxu0 %vm8823_vm7, %v3584_v44  ;;  %v3897_v44 = vld [vmem:[%s8789_s8 + $0x68] sm:$0xff] }
 0x88c   :  { %v3637_v21 = vpop.permute.xlu0 %3636  ;;  %5494 = vmatpush1.bf16.msra.mxu1 %v5493_v43 }
 0x88d   :  { %5495 = vmatprep.subr.bf16.mxu1 %v5954_v22 }
 0x88e   :  { %3732 = vmatmul.mubr.f32.gmra.mrb[18].mxu0 %v3583_v60  ;;  %v3642_v39 = vpop.permute.xlu1 %3641  ;;  %v5499_v60 = vpack.c.bf16 %v3897_v44, %v3896_v48 }
 0x88f   :  { %5054 = vmatprep.mubr.msk.f32.mxu0 %vm8823_vm7, %v3586_v15  ;;  %v3898_v15 = vld [vmem:[%s8789_s8 + $0x70] sm:$0xff] }
 0x890   :  { %v3647_v27 = vpop.permute.xlu0 %3646  ;;  %5497 = vmatpush1.bf16.msra.mxu1 %v5496_v58 }
 0x891   :  { %5498 = vmatprep.subr.bf16.mxu1 %v5954_v22 }
 0x892   :  { %3738 = vmatmul.mubr.f32.gmra.mrb[20].mxu0 %v3585_v14  ;;  %v3899_v14 = vld [vmem:[%s8789_s8 + $0x78] sm:$0xff] }
 0x893   :  { %5055 = vmatprep.mubr.msk.f32.mxu0 %vm8823_vm7, %v3588_v16  ;;  %v5502_v16 = vpack.c.bf16 %v3899_v14, %v3898_v15  ;;  %vm4209_vm7 = vcmask 459840  }
 0x894   :  { %5500 = vmatpush1.bf16.msra.mxu1 %v5499_v60 }
 0x895   :  { %5501 = vmatprep.subr.bf16.mxu1 %v5954_v22 }
 0x896   :  { %3744 = vmatmul.mubr.f32.gmra.mrb[22].mxu0 %v3587_v9  ;;  %v3900_v9 = vld [vmem:[%s8789_s8 + $0x80] sm:$0xff] }
 0x898   :  { %5503 = vmatpush1.bf16.msra.mxu1 %v5502_v16 }
 0x899   :  { %5504 = vmatprep.subr.bf16.mxu1 %v5954_v22 }
 0x95d   :  { %v3727_v46 = vpop.f32.mrb[16].mxu0 }
 0x95e   :  { %v3728_v63 = vadd.f32 %v3727_v46, %v3632_v32  ;;  %v3729_v20 = vpop.f32.mrb[17].mxu0 }
 0x95f   :  { %v3730_v41 = vadd.f32 %v3729_v20, %v3632_v32  ;;  %v3901_v32 = vld [vmem:[%s8789_s8 + $0x88] sm:$0xff]  ;;  %v3903_v20 = vld [vmem:[%s8789_s8 + $0x98] sm:$0xff] }
 0x960   :  { %v7813_v24 = vmax.f32 %v3728_v63, 0.0  ;;  %v5505_v46 = vpack.c.bf16 %v3901_v32, %v3900_v9  ;;  %v3902_v63 = vld [vmem:[%s8789_s8 + $0x90] sm:$0xff]  ;;  %v4010_v9 = vld [vmem:[%s8790_s9] sm:$0xff] }
 0x961   :  { %v7815_v53 = vmax.f32 %v3730_v41, 0.0  ;;  %v3733_v28 = vpop.f32.mrb[18].mxu0  ;;  %v5508_v41 = vpack.c.bf16 %v3903_v20, %v3902_v63 }
 0x962   :  { %3758 = vst [vmem:[%s8799_s18] sm:$0xff] %v7813_v24  ;;  %v3734_v29 = vadd.f32 %v3733_v28, %v3637_v21  ;;  %v3735_v17 = vpop.f32.mrb[19].mxu0  ;;  %3795 = vrot.lane.b32.xlu1 %v7813_v24, %s5956_s25  ;;  %5506 = vmatpush1.bf16.msra.mxu1 %v5505_v46  ;;  %v3905_v28 = vld [vmem:[%s8789_s8 + $0xa8] sm:$0xff] }
 0x963   :  { %3759 = vst.msk [vmem:[%s8799_s18 + $0x8] sm:$0xff] %vm8880_vm10, %v7815_v53  ;;  %v3736_v8 = vadd.f32 %v3735_v17, %v3637_v21  ;;  %5507 = vmatprep.subr.bf16.mxu1 %v5954_v22  ;;  %v3904_v21 = vld [vmem:[%s8789_s8 + $0xa0] sm:$0xff]  ;;  %v3906_v17 = vld [vmem:[%s8789_s8 + $0xb0] sm:$0xff] }
 0x964   :  { %3772 = vst.msk [vmem:[#allocation9 + $0x8] sm:$0xff] %vm8881_vm9, %v7815_v53  ;;  %v7830_v56 = vmax.f32 %v3734_v29, 0.0  ;;  %v5511_v29 = vpack.c.bf16 %v3905_v28, %v3904_v21 }
 0x965   :  { %v7832_v12 = vmax.f32 %v3736_v8, 0.0  ;;  %v3739_v59 = vpop.f32.mrb[20].mxu0  ;;  %v3907_v8 = vld [vmem:[%s8789_s8 + $0xb8] sm:$0xff] }
 0x966   :  { %3760 = vst [vmem:[%s8799_s18 + $0x10] sm:$0xff] %v7830_v56  ;;  %v3740_v4 = vadd.f32 %v3739_v59, %v3642_v39  ;;  %v3741_v7 = vpop.f32.mrb[21].mxu0  ;;  %3799 = vrot.lane.b32.xlu1 %v7830_v56, %s5956_s25  ;;  %5509 = vmatpush1.bf16.msra.mxu1 %v5508_v41  ;;  %v3908_v59 = vld [vmem:[%s8789_s8 + $0xc0] sm:$0xf]  ;;  %s5981_s8 = smov [#allocation14]  }
 0x967   :  { %3761 = vst.msk [vmem:[%s8799_s18 + $0x18] sm:$0xff] %vm8882_vm8, %v7832_v12  ;;  %v3742_v62 = vadd.f32 %v3741_v7, %v3642_v39  ;;  %5510 = vmatprep.subr.bf16.mxu1 %v5954_v22  ;;  %v5514_v39 = vpack.c.bf16 %v3907_v8, %v3906_v17  ;;  %vm8891_vm8 = vcmask 261120   ;;  %v4011_v8 = vld [vmem:[%s8790_s9 + $0x8] sm:$0xff]  ;;  %s5008_s21 = sshll.u32 %s5981_s8, 4  ;;  %s5009_s21 = int_to_ptr.vmem [resolvable:$true] %s5008_s21 }
 0x968   :  { %3774 = vst.msk [vmem:[#allocation9 + $0x18] sm:$0xff] %vm8883_vm14, %v7832_v12  ;;  %v7847_v38 = vmax.f32 %v3740_v4, 0.0  ;;  %vm8892_vm14 = vmmov %vm8891_vm8  ;;  %s5905_s1 = scalar_lea.vmem %s5009_s21, 32  ;;  %p5910_p9 = scmp.lt.s32.totalorder %s5009_s21, %s5009_s21 }
 0x969   :  { %v7849_v51 = vmax.f32 %v3742_v62, 0.0  ;;  %v3745_v34 = vpop.f32.mrb[22].mxu0  ;;  %p5906_p8 = scmp.ne.s32.totalorder %s5009_s21, %s5905_s1  ;;  %p5911_p10 = scmp.lt.s32.totalorder %s5905_s1, %s5905_s1 }
 0x96a   :  { %3762 = vst [vmem:[%s8799_s18 + $0x20] sm:$0xff] %v7847_v38  ;;  %v3746_v25 = vadd.f32 %v3745_v34, %v3647_v27  ;;  %v3747_v42 = vpop.f32.mrb[23].mxu0  ;;  %3803 = vrot.lane.b32.xlu1 %v7847_v38, %s5956_s25  ;;  %5512 = vmatpush1.bf16.msra.mxu1 %v5511_v29 }
 0x96b   :  { %v7855_v57 = vld [vmem:[#allocation9 + $0x8] sm:$0xff]  ;;  %3763 = vst.msk [vmem:[%s8799_s18 + $0x28] sm:$0xff] %vm8884_vm4, %v7849_v51  ;;  %v3748_v19 = vadd.f32 %v3747_v42, %v3647_v27  ;;  %5513 = vmatprep.subr.bf16.mxu1 %v5954_v22  ;;  %vm8893_vm4 = vmmov %vm8891_vm8  ;;  %p5912_p11 = por %p5911_p10, %p5910_p9 }
 0x96c   :  { %3776 = vst.msk [vmem:[#allocation9 + $0x28] sm:$0xff] %vm8885_vm3, %v7849_v51  ;;  %3797 = vrot.lane.b32.xlu0 %v7855_v57, %s5956_s25  ;;  %v7868_v1 = vmax.f32 %v3746_v25, 0.0  ;;  %vm8894_vm3 = vmmov %vm8893_vm4 }
 0x96d   :  { %v7870_v54 = vmax.f32 %v3748_v19, 0.0  ;;  %p5913_p12 = pnand %p5912_p11, %p5906_p8 }
 0x96e   :  { %3764 = vst [vmem:[%s8799_s18 + $0x30] sm:$0xff] %v7868_v1  ;;  %3807 = vrot.lane.b32.xlu1 %v7868_v1, %s5956_s25  ;;  %5515 = vmatpush1.bf16.msra.mxu1 %v5514_v39  ;;  %v4012_v39 = vld [vmem:[%s8790_s9 + $0x10] sm:$0xff] }
 0x96f   :  { %v7885_v52 = vld [vmem:[#allocation9 + $0x18] sm:$0xff]  ;;  %3765 = vst.msk [vmem:[%s8799_s18 + $0x38] sm:$0xff] %vm8876_vm1, %v7870_v54  ;;  %3973 = vmatprep.subr.mxu1 %v5936_v6  ;;  %s5978_s18 = smov 76  }
 0x970   :  { %3778 = vst.msk [vmem:[#allocation9 + $0x38] sm:$0xff] %vm8886_vm11, %v7870_v54  ;;  %3801 = vrot.lane.b32.xlu0 %v7885_v52, %s5956_s25  ;;  %vm4125_vm11 = vcmask 796040  }
 0x972   :  { %5056 = vmatpush1.msk.msra.mxu1 %vm3921_vm6, %v3908_v59  ;;  %v4013_v59 = vld [vmem:[%s8790_s9 + $0x18] sm:$0xff]  ;;  %s5973_s9 = smov 38   ;;  %vm4140_vm6 = vcmask 1042192  }
 0x973   :  { %v7908_v35 = vld [vmem:[#allocation9 + $0x28] sm:$0xff] }
 0x974   :  { %3805 = vrot.lane.b32.xlu0 %v7908_v35, %s5956_s25 }
 0x977   :  { %v7919_v26 = vld [vmem:[#allocation9 + $0x38] sm:$0xff] }
 0x978   :  { %3809 = vrot.lane.b32.xlu0 %v7919_v26, %s5956_s25  ;;  %s5971_s25 = smov 87  }
 0x9d4   :  { %v3796_v4 = vpop.permute.xlu1 %3795 }
 0x9d8   :  { %v3800_v62 = vpop.permute.xlu1 %3799 }
 0x9dc   :  { %v3804_v45 = vpop.permute.xlu1 %3803 }
 0x9de   :  { %v3798_v7 = vpop.permute.xlu0 %3797 }
 0x9df   :  { %v3811_v27 = vsel %vm2573_vm0, %v3796_v4, %v3798_v7  ;;  %v3832_v34 = vmax.f32 %v7855_v57, %v3798_v7  ;;  %v3824_v23 = vmax.f32 %v7815_v53, %v3798_v7  ;;  %v4289_v4 = vld [vmem:[%s8791_s10 + $0x8] sm:$0xff]  ;;  %v4291_v7 = vld [vmem:[%s8791_s10 + $0x18] sm:$0xff] }
 0x9e0   :  { %v3823_v25 = vmax.f32 %v7813_v24, %v3811_v27  ;;  %v3808_v37 = vpop.permute.xlu1 %3807  ;;  %v5524_v27 = vpack.c.bf16 %v4291_v7, %v4289_v4  ;;  %v4326_v4 = vld [vmem:[%s8791_s10 + $0x130] sm:$0xff] }
 0x9e1   :  { %3849 = vrot.lane.b32.xlu0 %v3832_v34, %s5968_s6  ;;  %v4290_v34 = vld [vmem:[%s8791_s10 + $0x10] sm:$0xff] }
 0x9e2   :  { %3847 = vrot.lane.b32.xlu1 %v3823_v25, %s5968_s6  ;;  %v3802_v22 = vpop.permute.xlu0 %3801 }
 0x9e3   :  { %v3812_v42 = vsel %vm2573_vm0, %v3800_v62, %v3802_v22  ;;  %v3834_v19 = vmax.f32 %v7885_v52, %v3802_v22  ;;  %v3826_v47 = vmax.f32 %v7832_v12, %v3802_v22  ;;  %v4288_v62 = vld [vmem:[%s8791_s10] sm:$0xff]  ;;  %v4295_v22 = vld [vmem:[%s8791_s10 + $0x38] sm:$0xff] }
 0x9e4   :  { %v3825_v13 = vmax.f32 %v7830_v56, %v3812_v42  ;;  %v5526_v42 = vpack.c.bf16 %v4290_v34, %v4288_v62  ;;  %v4329_v62 = vld [vmem:[%s8791_s10 + $0x148] sm:$0xff]  ;;  %v4328_v34 = vld [vmem:[%s8791_s10 + $0x140] sm:$0xff] }
 0x9e5   :  { %3853 = vrot.lane.b32.xlu0 %v3834_v19, %s5968_s6 }
 0x9e6   :  { %3851 = vrot.lane.b32.xlu1 %v3825_v13, %s5968_s6  ;;  %v3806_v61 = vpop.permute.xlu0 %3805 }
 0x9e7   :  { %v3813_v33 = vsel %vm2573_vm0, %v3804_v45, %v3806_v61  ;;  %v3836_v57 = vmax.f32 %v7908_v35, %v3806_v61  ;;  %v3828_v43 = vmax.f32 %v7849_v51, %v3806_v61  ;;  %v4294_v45 = vld [vmem:[%s8791_s10 + $0x30] sm:$0xff]  ;;  %v4297_v61 = vld [vmem:[%s8791_s10 + $0x48] sm:$0xff] }
 0x9e8   :  { %v3827_v24 = vmax.f32 %v7847_v38, %v3813_v33  ;;  %v4299_v33 = vld [vmem:[%s8791_s10 + $0x58] sm:$0xff] }
 0x9e9   :  { %3857 = vrot.lane.b32.xlu0 %v3836_v57, %s5968_s6 }
 0x9ea   :  { %3855 = vrot.lane.b32.xlu1 %v3827_v24, %s5968_s6  ;;  %v3810_v30 = vpop.permute.xlu0 %3809 }
 0x9eb   :  { %v3814_v36 = vsel %vm2573_vm0, %v3808_v37, %v3810_v30  ;;  %v3838_v52 = vmax.f32 %v7919_v26, %v3810_v30  ;;  %vm8888_vm0 = vmmov %vm8876_vm1  ;;  %v3830_v48 = vmax.f32 %v7870_v54, %v3810_v30  ;;  %v4296_v37 = vld [vmem:[%s8791_s10 + $0x40] sm:$0xff]  ;;  %v4298_v30 = vld [vmem:[%s8791_s10 + $0x50] sm:$0xff]  ;;  %vm4111_vm1 = vcmask 394240  }
 0x9ec   :  { %v3829_v56 = vmax.f32 %v7868_v1, %v3814_v36  ;;  %vm8889_vm10 = vmmov %vm8888_vm0  ;;  %v4301_v36 = vld [vmem:[%s8791_s10 + $0x68] sm:$0xff] }
 0x9ed   :  { %3861 = vrot.lane.b32.xlu0 %v3838_v52, %s5968_s6  ;;  %vm8890_vm9 = vmmov %vm8888_vm0  ;;  %v4303_v52 = vld [vmem:[%s8791_s10 + $0x78] sm:$0xff] }
 0x9ee   :  { %3859 = vrot.lane.b32.xlu1 %v3829_v56, %s5968_s6 }
 0xa53   :  { %v3850_v50 = vpop.permute.xlu0 %3849 }
 0xa54   :  { %v3877_v49 = vmax.f32 %v3824_v23, %v3850_v50  ;;  %v3848_v35 = vpop.permute.xlu1 %3847  ;;  %v5536_v23 = vpack.c.bf16 %v4303_v52, %v4301_v36 }
 0xa55   :  { %v3864_v38 = vsel %vm3863_vm2, %v3848_v35, %v3850_v50  ;;  %v4300_v50 = vld [vmem:[%s8791_s10 + $0x60] sm:$0xff]  ;;  %v4305_v35 = vld [vmem:[%s8791_s10 + $0x88] sm:$0xff] }
 0xa56   :  { %v3876_v2 = vmax.f32 %v3823_v25, %v3864_v38  ;;  %5057 = vmatprep.mubr.msk.f32.mxu1 %vm8887_vm12, %v3877_v49  ;;  %v4293_v25 = vld [vmem:[%s8791_s10 + $0x28] sm:$0xff]  ;;  %v4302_v49 = vld [vmem:[%s8791_s10 + $0x70] sm:$0xff]  ;;  %v4307_v38 = vld [vmem:[%s8791_s10 + $0x98] sm:$0xff] }
 0xa57   :  { %v3854_v40 = vpop.permute.xlu0 %3853  ;;  %v5528_v19 = vpack.c.bf16 %v4295_v22, %v4293_v25 }
 0xa58   :  { %v3879_v31 = vmax.f32 %v3826_v47, %v3854_v40  ;;  %v3852_v26 = vpop.permute.xlu1 %3851  ;;  %3990 = vmatmul.mubr.f32.vlgmr.msra.gmra.mrb[14].mxu1 %v3876_v2  ;;  %v5538_v47 = vpack.c.bf16 %v4302_v49, %v4300_v50  ;;  %v5540_v2 = vpack.c.bf16 %v4307_v38, %v4305_v35 }
 0xa59   :  { %v3865_v1 = vsel %vm3863_vm2, %v3852_v26, %v3854_v40  ;;  %v4304_v40 = vld [vmem:[%s8791_s10 + $0x80] sm:$0xff]  ;;  %v4309_v26 = vld [vmem:[%s8791_s10 + $0xa8] sm:$0xff] }
 0xa5a   :  { %v3878_v53 = vmax.f32 %v3825_v13, %v3865_v1  ;;  %5058 = vmatprep.mubr.msk.f32.mxu1 %vm8888_vm0, %v3879_v31  ;;  %v4292_v13 = vld [vmem:[%s8791_s10 + $0x20] sm:$0xff]  ;;  %v4306_v31 = vld [vmem:[%s8791_s10 + $0x90] sm:$0xff]  ;;  %v4311_v1 = vld [vmem:[%s8791_s10 + $0xb8] sm:$0xff]  ;;  %vm4170_vm0 = vcmask 1042344  }
 0xa5b   :  { %v3858_v55 = vpop.permute.xlu0 %3857  ;;  %v5530_v57 = vpack.c.bf16 %v4294_v45, %v4292_v13 }
 0xa5c   :  { %v3881_v5 = vmax.f32 %v3828_v43, %v3858_v55  ;;  %v3856_v58 = vpop.permute.xlu1 %3855  ;;  %3995 = vmatmul.mubr.f32.gmra.mrb[16].mxu1 %v3878_v53  ;;  %v5542_v43 = vpack.c.bf16 %v4306_v31, %v4304_v40  ;;  %v5544_v53 = vpack.c.bf16 %v4311_v1, %v4309_v26  ;;  %v4339_v40 = vld [vmem:[%s8791_s10 + $0x198] sm:$0xff]  ;;  %v4336_v31 = vld [vmem:[%s8791_s10 + $0x180] sm:$0xff] }
 0xa5d   :  { %v3866_v12 = vsel %vm3863_vm2, %v3856_v58, %v3858_v55  ;;  %v4308_v55 = vld [vmem:[%s8791_s10 + $0xa0] sm:$0xff]  ;;  %v4313_v58 = vld [vmem:[%s8791_s10 + $0xc8] sm:$0xff] }
 0xa5e   :  { %v3880_v44 = vmax.f32 %v3827_v24, %v3866_v12  ;;  %5059 = vmatprep.mubr.msk.f32.mxu1 %vm8889_vm10, %v3881_v5  ;;  %v5532_v24 = vpack.c.bf16 %v4299_v33, %v4297_v61  ;;  %v4310_v5 = vld [vmem:[%s8791_s10 + $0xb0] sm:$0xff]  ;;  %v4315_v12 = vld [vmem:[%s8791_s10 + $0xd8] sm:$0xff]  ;;  %vm4171_vm10 = vcmask 306178  }
 0xa5f   :  { %v3862_v60 = vpop.permute.xlu0 %3861 }
 0xa60   :  { %v3883_v15 = vmax.f32 %v3830_v48, %v3862_v60  ;;  %v3860_v14 = vpop.permute.xlu1 %3859  ;;  %4000 = vmatmul.mubr.f32.gmra.mrb[18].mxu1 %v3880_v44  ;;  %v5546_v48 = vpack.c.bf16 %v4310_v5, %v4308_v55  ;;  %v5548_v44 = vpack.c.bf16 %v4315_v12, %v4313_v58  ;;  %v4341_v55 = vld [vmem:[%s8791_s10 + $0x1a8] sm:$0xff]  ;;  %v4343_v5 = vld [vmem:[%s8791_s10 + $0x1b8] sm:$0xff]  ;;  %v4340_v58 = vld [vmem:[%s8791_s10 + $0x1a0] sm:$0xff] }
 0xa61   :  { %v3867_v51 = vsel %vm3863_vm2, %v3860_v14, %v3862_v60  ;;  %v4312_v60 = vld [vmem:[%s8791_s10 + $0xc0] sm:$0xff]  ;;  %v4317_v14 = vld [vmem:[%s8791_s10 + $0xe8] sm:$0xff]  ;;  %vm4141_vm2 = vcmask 150530  }
 0xa62   :  { %v3882_v16 = vmax.f32 %v3829_v56, %v3867_v51  ;;  %5060 = vmatprep.mubr.msk.f32.mxu1 %vm8890_vm9, %v3883_v15  ;;  %v5534_v56 = vpack.c.bf16 %v4298_v30, %v4296_v37  ;;  %v4314_v15 = vld [vmem:[%s8791_s10 + $0xd0] sm:$0xff]  ;;  %v4319_v51 = vld [vmem:[%s8791_s10 + $0xf8] sm:$0xff]  ;;  %v4332_v37 = vld [vmem:[%s8791_s10 + $0x160] sm:$0xff]  ;;  %vm4148_vm9 = vcmask 550040  }
 0xa63   :  { %vm4142_vm12 = vmor %vm4141_vm2, %vm4140_vm6  ;;  %vm4185_vm6 = vcmask 705840  }
 0xa64   :  { %4005 = vmatmul.mubr.f32.gmra.mrb[20].mxu1 %v3882_v16  ;;  %v5550_v16 = vpack.c.bf16 %v4314_v15, %v4312_v60 }
 0xa65   :  { %5163 = vmatprep.mubr.msk.f32.mxu1 %vm8891_vm8, %v4010_v9  ;;  %v5552_v9 = vpack.c.bf16 %v4319_v51, %v4317_v14  ;;  %v4345_v51 = vld [vmem:[%s8791_s10 + $0x1c8] sm:$0xff]  ;;  %vm4167_vm8 = vcmask 957440  }
 0xb2b   :  { %v3991_v54 = vpop.f32.mrb[14].mxu1 }
 0xb2c   :  { %v3993_v32 = vpop.f32.mrb[15].mxu1 }
 0xb2d   :  { %v4318_v32 = vld [vmem:[%s8791_s10 + $0xf0] sm:$0xff] }
 0xb2f   :  { %v3996_v46 = vpop.f32.mrb[16].mxu1 }
 0xb30   :  { %v5516_v63 = vpack.c.bf16 %v3996_v46, %v3991_v54  ;;  %v3998_v20 = vpop.f32.mrb[17].mxu1  ;;  %v4316_v54 = vld [vmem:[%s8791_s10 + $0xe0] sm:$0xff]  ;;  %v4321_v46 = vld [vmem:[%s8791_s10 + $0x108] sm:$0xff] }
 0xb31   :  { %v5554_v20 = vpack.c.bf16 %v4318_v32, %v4316_v54  ;;  %v4346_v32 = vld [vmem:[%s8791_s10 + $0x1d0] sm:$0xff] }
 0xb32   :  { %5517 = vmatprep.subr.bf16.mxu1 %v5516_v63 }
 0xb33   :  { %v4001_v41 = vpop.f32.mrb[18].mxu1  ;;  %5519 = vmatpush3.bf16.msra.mxu1 %v5516_v63  ;;  %v4323_v63 = vld [vmem:[%s8791_s10 + $0x118] sm:$0xff] }
 0xb34   :  { %v4003_v21 = vpop.f32.mrb[19].mxu1 }
 0xb35   :  { %v4320_v21 = vld [vmem:[%s8791_s10 + $0x100] sm:$0xff] }
 0xb37   :  { %v4006_v28 = vpop.f32.mrb[20].mxu1 }
 0xb38   :  { %v5520_v29 = vpack.c.bf16 %v4006_v28, %v4001_v41  ;;  %v4008_v17 = vpop.f32.mrb[21].mxu1  ;;  %v5556_v41 = vpack.c.bf16 %v4323_v63, %v4321_v46  ;;  %v4322_v28 = vld [vmem:[%s8791_s10 + $0x110] sm:$0xff] }
 0xb39   :  { %v4325_v17 = vld [vmem:[%s8791_s10 + $0x128] sm:$0xff] }
 0xb3a   :  { %5521 = vmatprep.subr.bf16.mxu1 %v5520_v29 }
 0xb3b   :  { %5523 = vmatpush3.bf16.msra.mxu1 %v5520_v29  ;;  %v5558_v29 = vpack.c.bf16 %v4322_v28, %v4320_v21  ;;  %v4351_v21 = vld [vmem:[%s8791_s10 + $0x1f8] sm:$0xff]  ;;  %v4348_v28 = vld [vmem:[%s8791_s10 + $0x1e0] sm:$0xff] }
 0xb3c   :  { %5525 = vmatprep.subr.bf16.mxu1 %v5524_v27  ;;  %v4331_v27 = vld [vmem:[%s8791_s10 + $0x158] sm:$0xff] }
 0xb3d   :  { %v5564_v22 = vpack.c.bf16 %v4331_v27, %v4329_v62 }
 0xb3e   :  { %5164 = vmatmul.mubr.msk.f32.vlgmr.msra.gmra.mrb[22].mxu1 %vm8892_vm14, %v4011_v8  ;;  %v4327_v8 = vld [vmem:[%s8791_s10 + $0x138] sm:$0xff]  ;;  %vm4161_vm14 = vcmask 951840  }
 0xb3f   :  { %5166 = vmatprep.mubr.msk.f32.mxu1 %vm8893_vm4, %v4012_v39  ;;  %5527 = vmatpush1.bf16.msra.mxu1 %v5526_v42  ;;  %v4324_v39 = vld [vmem:[%s8791_s10 + $0x120] sm:$0xff]  ;;  %v4330_v42 = vld [vmem:[%s8791_s10 + $0x150] sm:$0xff]  ;;  %vm4194_vm4 = vcmask 1042104  }
 0xb40   :  { %5529 = vmatprep.subr.bf16.mxu1 %v5528_v19  ;;  %v5562_v7 = vpack.c.bf16 %v4326_v4, %v4324_v39  ;;  %v5566_v61 = vpack.c.bf16 %v4330_v42, %v4328_v34  ;;  %v4350_v39 = vld [vmem:[%s8791_s10 + $0x1f0] sm:$0xff]  ;;  %v4353_v4 = vld [vmem:[%s8791_s10 + $0x208] sm:$0xff] }
 0xb42   :  { %5167 = vmatmul.mubr.msk.f32.gmra.mrb[24].mxu1 %vm8894_vm3, %v4013_v59  ;;  %v5560_v59 = vpack.c.bf16 %v4327_v8, %v4325_v17  ;;  %vm4195_vm3 = vcmask 60418  }
 0xb43   :  { %5531 = vmatpush1.bf16.msra.mxu1 %v5530_v57  ;;  %v4333_v57 = vld [vmem:[%s8791_s10 + $0x168] sm:$0xff]  ;;  %vm4196_vm2 = vmor %vm4195_vm3, %vm4194_vm4  ;;  %vm4283_vm3 = vcmask 1042168  }
 0xb44   :  { %5533 = vmatprep.subr.bf16.mxu1 %v5532_v24  ;;  %v4335_v24 = vld [vmem:[%s8791_s10 + $0x178] sm:$0xff] }
 0xb45   :  { %v5568_v52 = vpack.c.bf16 %v4335_v24, %v4333_v57 }
 0xb47   :  { %5535 = vmatpush1.bf16.msra.mxu1 %v5534_v56  ;;  %v4334_v56 = vld [vmem:[%s8791_s10 + $0x170] sm:$0xff] }
 0xb48   :  { %5537 = vmatprep.subr.bf16.mxu1 %v5536_v23  ;;  %v5570_v35 = vpack.c.bf16 %v4334_v56, %v4332_v37 }
 0xb4b   :  { %5539 = vmatpush1.bf16.msra.mxu1 %v5538_v47 }
 0xb4c   :  { %5541 = vmatprep.subr.bf16.mxu1 %v5540_v2  ;;  %v4337_v2 = vld [vmem:[%s8791_s10 + $0x188] sm:$0xff] }
 0xb4d   :  { %v5572_v1 = vpack.c.bf16 %v4339_v40, %v4337_v2 }
 0xb4f   :  { %5543 = vmatpush1.bf16.msra.mxu1 %v5542_v43  ;;  %v4338_v43 = vld [vmem:[%s8791_s10 + $0x190] sm:$0xff] }
 0xb50   :  { %5545 = vmatprep.subr.bf16.mxu1 %v5544_v53  ;;  %v5574_v53 = vpack.c.bf16 %v4338_v43, %v4336_v31 }
 0xb53   :  { %5547 = vmatpush1.bf16.msra.mxu1 %v5546_v48  ;;  %v5576_v48 = vpack.c.bf16 %v4343_v5, %v4341_v55  ;;  %v4352_v55 = vld [vmem:[%s8791_s10 + $0x200] sm:$0xff]  ;;  %v4354_v5 = vld [vmem:[%s8791_s10 + $0x210] sm:$0xff] }
 0xb54   :  { %5549 = vmatprep.subr.bf16.mxu1 %v5548_v44  ;;  %v4342_v44 = vld [vmem:[%s8791_s10 + $0x1b0] sm:$0xff] }
 0xb55   :  { %v5578_v60 = vpack.c.bf16 %v4342_v44, %v4340_v58  ;;  %v4359_v44 = vld [vmem:[%s8791_s10 + $0x238] sm:$0xff] }
 0xb57   :  { %5551 = vmatpush1.bf16.msra.mxu1 %v5550_v16  ;;  %v4347_v16 = vld [vmem:[%s8791_s10 + $0x1d8] sm:$0xff] }
 0xb58   :  { %5553 = vmatprep.subr.bf16.mxu1 %v5552_v9  ;;  %v4344_v9 = vld [vmem:[%s8791_s10 + $0x1c0] sm:$0xff]  ;;  %v5580_v54 = vpack.c.bf16 %v4347_v16, %v4345_v51  ;;  %v5590_v51 = vpack.c.bf16 %v4354_v5, %v4352_v55  ;;  %v4377_v55 = vld [vmem:[%s8791_s10 + $0x2c8] sm:$0xff]  ;;  %v4379_v5 = vld [vmem:[%s8791_s10 + $0x2d8] sm:$0xff] }
 0xb59   :  { %v5582_v63 = vpack.c.bf16 %v4346_v32, %v4344_v9  ;;  %v4358_v32 = vld [vmem:[%s8791_s10 + $0x230] sm:$0xff] }
 0xb5b   :  { %5555 = vmatpush1.bf16.msra.mxu1 %v5554_v20 }
 0xb5c   :  { %5557 = vmatprep.subr.bf16.mxu1 %v5556_v41  ;;  %v4349_v41 = vld [vmem:[%s8791_s10 + $0x1e8] sm:$0xff] }
 0xb5d   :  { %v5584_v8 = vpack.c.bf16 %v4351_v21, %v4349_v41 }
 0xb5f   :  { %5559 = vmatpush1.bf16.msra.mxu1 %v5558_v29 }
 0xb60   :  { %5561 = vmatprep.subr.bf16.mxu1 %v5560_v59  ;;  %v5586_v59 = vpack.c.bf16 %v4350_v39, %v4348_v28  ;;  %v4360_v28 = vld [vmem:[%s8791_s10 + $0x240] sm:$0xff] }
 0xb63   :  { %5563 = vmatpush1.bf16.msra.mxu1 %v5562_v7  ;;  %v4355_v7 = vld [vmem:[%s8791_s10 + $0x218] sm:$0xff] }
 0xb64   :  { %5565 = vmatprep.subr.bf16.mxu1 %v5564_v22  ;;  %v5588_v27 = vpack.c.bf16 %v4355_v7, %v4353_v4  ;;  %v4364_v4 = vld [vmem:[%s8791_s10 + $0x260] sm:$0xff]  ;;  %v4366_v7 = vld [vmem:[%s8791_s10 + $0x270] sm:$0xff] }
 0xb67   :  { %5567 = vmatpush1.bf16.msra.mxu1 %v5566_v61 }
 0xb68   :  { %5569 = vmatprep.subr.bf16.mxu1 %v5568_v52 }
 0xb6b   :  { %5571 = vmatpush1.bf16.msra.mxu1 %v5570_v35 }
 0xb6c   :  { %5573 = vmatprep.subr.bf16.mxu1 %v5572_v1 }
 0xb6f   :  { %5575 = vmatpush1.bf16.msra.mxu1 %v5574_v53 }
 0xb70   :  { %5577 = vmatprep.subr.bf16.mxu1 %v5576_v48  ;;  %v4357_v48 = vld [vmem:[%s8791_s10 + $0x228] sm:$0xff] }
 0xb71   :  { %v5592_v9 = vpack.c.bf16 %v4359_v44, %v4357_v48  ;;  %v4376_v48 = vld [vmem:[%s8791_s10 + $0x2c0] sm:$0xff] }
 0xb73   :  { %5579 = vmatpush1.bf16.msra.mxu1 %v5578_v60 }
 0xb74   :  { %5581 = vmatprep.subr.bf16.mxu1 %v5580_v54  ;;  %v4356_v54 = vld [vmem:[%s8791_s10 + $0x220] sm:$0xff] }
 0xb75   :  { %v5594_v41 = vpack.c.bf16 %v4358_v32, %v4356_v54  ;;  %v4883_v54 = vld [vmem:[%s8793_s12 + $0xc8] sm:$0xff] }
 0xb76   :  { %v4381_v32 = vld [vmem:[%s8791_s10 + $0x2e8] sm:$0xff] }
 0xb77   :  { %5583 = vmatpush1.bf16.msra.mxu1 %v5582_v63  ;;  %v4361_v63 = vld [vmem:[%s8791_s10 + $0x248] sm:$0xff] }
 0xb78   :  { %5585 = vmatprep.subr.bf16.mxu1 %v5584_v8  ;;  %v4367_v8 = vld [vmem:[%s8791_s10 + $0x278] sm:$0xff] }
 0xb7b   :  { %5587 = vmatpush1.bf16.msra.mxu1 %v5586_v59 }
 0xb7c   :  { %5589 = vmatprep.subr.bf16.mxu1 %v5588_v27  ;;  %v4371_v27 = vld [vmem:[%s8791_s10 + $0x298] sm:$0xff] }
 0xc11   :  { %v5165_v25 = vpop.f32.mrb[22].mxu1 }
 0xc12   :  { %v4157_v19 = vrot.slane %v5165_v25, %v6135_v18  ;;  %v4174_v13 = vcombine.high %v5165_v25, %v5165_v25  ;;  %v4092_v45 = vpop.f32.mrb[23].mxu1 }
 0xc13   :  { %4112 = vst.msk [vmem:[#allocation10] sm:$0x3] %vm4111_vm1, %v4092_v45  ;;  %v4120_v33 = vrot.slane %v4092_v45, %v6135_v18  ;;  %v4127_v36 = vcombine.high %v4092_v45, %v4092_v45  ;;  %vm4172_vm1 = vmor %vm4171_vm10, %vm4170_vm0  ;;  %vm4239_vm10 = vcmask 615640  }
 0xc14   :  { %v4163_v30 = vcombine.high %v4157_v19, %v4157_v19  ;;  %v4181_v23 = vrot.slane %v4174_v13, %v6135_v18 }
 0xc15   :  { %v4121_v50 = vcombine.high %v4120_v33, %v4120_v33  ;;  %v8171_v49 = vpop.f32.mrb[24].mxu1  ;;  %v4134_v47 = vrot.slane %v4127_v36, %v6135_v18 }
 0xc16   :  { %4164 = vrot.lane.b32.xlu1 %v4163_v30, %s5969_s27  ;;  %v4102_v38 = vpop.f32.mrb[25].mxu1  ;;  %v4187_v26 = vcombine.high %v4181_v23, %v4181_v23  ;;  %v4248_v20 = vrot.slane %v8171_v49, %v6135_v18  ;;  %v4264_v29 = vcombine.high %v8171_v49, %v8171_v49 }
 0xc17   :  { %4122 = vrot.lane.b32.xlu0 %v4121_v50, %s5970_s7  ;;  %v4217_v12 = vcombine.high %v4102_v38, %v4102_v38  ;;  %v4144_v15 = vcombine.high %v4134_v47, %v4134_v47  ;;  %v4205_v46 = vrot.slane %v4102_v38, %v6135_v18 }
 0xc18   :  { %v4254_v62 = vcombine.high %v4248_v20, %v4248_v20  ;;  %v4271_v34 = vrot.slane %v4264_v29, %v6135_v18  ;;  %v4362_v29 = vld [vmem:[%s8791_s10 + $0x250] sm:$0xff] }
 0xc19   :  { %v4224_v14 = vrot.slane %v4217_v12, %v6135_v18  ;;  %v4211_v17 = vcombine.high %v4205_v46, %v4205_v46  ;;  %v5598_v39 = vpack.c.bf16 %v4362_v29, %v4360_v28  ;;  %v4866_v28 = vld [vmem:[%s8793_s12 + $0x40] sm:$0xff]  ;;  %v4867_v29 = vld [vmem:[%s8793_s12 + $0x48] sm:$0xff] }
 0xc1a   :  { %4135 = vrot.lane.b32.xlu1 %v4134_v47, %s5967_s4  ;;  %s5976_s4 = smov 57   ;;  %v4277_v22 = vcombine.high %v4271_v34, %v4271_v34 }
 0xc1b   :  { %4188 = vrot.lane.b32.xlu0 %v4187_v26, %s5971_s25  ;;  %v4235_v25 = vcombine.high %v4224_v14, %v4224_v14 }
 0xc1e   :  { %4158 = vrot.lane.b32.xlu1 %v4157_v19, %s5946_s22 }
 0xc1f   :  { %4145 = vrot.lane.b32.xlu0 %v4144_v15, %s5972_s26 }
 0xc22   :  { %4182 = vrot.lane.b32.xlu1 %v4181_v23, %s5973_s9 }
 0xc23   :  { %4225 = vrot.lane.b32.xlu0 %v4224_v14, %s5974_s5 }
 0xc26   :  { %4206 = vrot.lane.b32.xlu1 %v4205_v46, %s5975_s23 }
 0xc27   :  { %4212 = vrot.lane.b32.xlu0 %v4211_v17, %s5976_s4  ;;  %v4365_v17 = vld [vmem:[%s8791_s10 + $0x268] sm:$0xff] }
 0xc28   :  { %v5600_v59 = vpack.c.bf16 %v4367_v8, %v4365_v17  ;;  %v4382_v8 = vld [vmem:[%s8791_s10 + $0x2f0] sm:$0xff] }
 0xc2a   :  { %4255 = vrot.lane.b32.xlu1 %v4254_v62, %s8834_s16  ;;  %v4369_v62 = vld [vmem:[%s8791_s10 + $0x288] sm:$0xff] }
 0xc2b   :  { %4236 = vrot.lane.b32.xlu0 %v4235_v25, %s5977_s30  ;;  %v4370_v25 = vld [vmem:[%s8791_s10 + $0x290] sm:$0xff] }
 0xc2e   :  { %4249 = vrot.lane.b32.xlu1 %v4248_v20, %s5978_s18  ;;  %v4363_v20 = vld [vmem:[%s8791_s10 + $0x258] sm:$0xff] }
 0xc2f   :  { %4278 = vrot.lane.b32.xlu0 %v4277_v22, %s8837_s14  ;;  %v5596_v21 = vpack.c.bf16 %v4363_v20, %v4361_v63  ;;  %v4874_v22 = vld [vmem:[%s8793_s12 + $0x80] sm:$0xff] }
 0xc32   :  { %4272 = vrot.lane.b32.xlu1 %v4271_v34, %s5979_s0  ;;  %v4368_v34 = vld [vmem:[%s8791_s10 + $0x280] sm:$0xff] }
 0xc88   :  { %v4165_v42 = vpop.permute.xlu1 %4164 }
 0xc89   :  { %v4123_v19 = vpop.permute.xlu0 %4122  ;;  %v4166_v33 = vrot.slane %v4165_v42, 6 }
 0xc8a   :  { %4126 = vst.msk [vmem:[#allocation10] sm:$0x3] %vm4125_vm11, %v4123_v19  ;;  %vm4191_vm11 = vcmask 711680   ;;  %v4858_v19 = vld [vmem:[%s8793_s12] sm:$0xff] }
 0xc8b   :  { %v4168_v36 = vsel %vm4167_vm8, %v4166_v33, %v4165_v42  ;;  %vm4261_vm8 = vcmask 371714   ;;  %v4875_v42 = vld [vmem:[%s8793_s12 + $0x88] sm:$0xff]  ;;  %v4876_v33 = vld [vmem:[%s8793_s12 + $0x90] sm:$0xff] }
 0xc8c   :  { %v4136_v13 = vpop.permute.xlu1 %4135 }
 0xc8d   :  { %v4137_v45 = vrot.slane %v4136_v13, 6  ;;  %v4189_v61 = vpop.permute.xlu0 %4188 }
 0xc8e   :  { %v4190_v37 = vrot.slane %v4189_v61, 6 }
 0xc8f   :  { %v4138_v57 = vsel %vm3533_vm5, %v4137_v45, %v4136_v13  ;;  %vm4231_vm5 = vcmask 1042256   ;;  %v5602_v13 = vpack.c.bf16 %v4366_v7, %v4364_v4  ;;  %v5720_v45 = vpack.c.bf16 %v4875_v42, %v4874_v22  ;;  %v4385_v4 = vld [vmem:[%s8791_s10 + $0x308] sm:$0xff]  ;;  %v4387_v7 = vld [vmem:[%s8791_s10 + $0x318] sm:$0xff]  ;;  %v4868_v22 = vld [vmem:[%s8793_s12 + $0x50] sm:$0xff] }
 0xc90   :  { %4143 = vst.msk [vmem:[#allocation10] sm:$0xf] %vm4142_vm12, %v4138_v57  ;;  %v4159_v24 = vpop.permute.xlu1 %4158  ;;  %v4192_v56 = vsel %vm4191_vm11, %v4190_v37, %v4189_v61  ;;  %vm4232_vm12 = vcmask 216066   ;;  %vm8897_vm11 = vcmask 777216   ;;  %v4859_v61 = vld [vmem:[%s8793_s12 + $0x8] sm:$0xff]  ;;  %v4877_v57 = vld [vmem:[%s8793_s12 + $0x98] sm:$0xff] }
 0xc91   :  { %v4146_v30 = vpop.permute.xlu0 %4145  ;;  %vm4233_vm0 = vmor %vm4232_vm12, %vm4231_vm5  ;;  %v5722_v37 = vpack.c.bf16 %v4859_v61, %v4858_v19  ;;  %5721 = vmatprep.subr.bf16.mxu0 %v5720_v45  ;;  %v4869_v42 = vld [vmem:[%s8793_s12 + $0x58] sm:$0xff]  ;;  %v5620_v19 = vpack.c.bf16 %v4387_v7, %v4385_v4  ;;  %v4886_v45 = vld [vmem:[%s8793_s12 + $0xe0] sm:$0xff]  ;;  %vm4992_vm5 = vcmask 73728  }
 0xc92   :  { %4149 = vst.msk [vmem:[#allocation10 + $0x2] sm:$0x3] %vm4148_vm9, %v4146_v30  ;;  %vm4260_vm9 = vcmask 1042408   ;;  %v5724_v30 = vpack.c.bf16 %v4877_v57, %v4876_v33  ;;  %v4887_v61 = vld [vmem:[%s8793_s12 + $0xe8] sm:$0xff]  ;;  %v4391_v57 = vld [vmem:[%s8791_s10 + $0x338] sm:$0xff] }
 0xc93   :  { %4162 = vst.msk [vmem:[#allocation10 + $0x2] sm:$0x3] %vm4161_vm14, %v4159_v24  ;;  %vm4252_vm14 = vcmask 1017440   ;;  %vm4262_vm4 = vmor %vm4261_vm8, %vm4260_vm9  ;;  %v5604_v24 = vpack.c.bf16 %v4371_v27, %v4369_v62  ;;  %5723 = vmatpush3.bf16.msra.mxu0 %v5722_v37  ;;  %v5738_v62 = vpack.c.bf16 %v4867_v29, %v4866_v28  ;;  %v4389_v33 = vld [vmem:[%s8791_s10 + $0x328] sm:$0xff]  ;;  %v4415_v28 = vld [vmem:[%s8791_s10 + $0x3f8] sm:$0xff] }
 0xc94   :  { %v4183_v52 = vpop.permute.xlu1 %4182  ;;  %4173 = vst.msk [vmem:[#allocation10 + $0x2] sm:$0xf] %vm4172_vm1, %v4168_v36  ;;  %vm8895_vm1 = vcmask 1022976   ;;  %v4860_v36 = vld [vmem:[%s8793_s12 + $0x10] sm:$0xff]  ;;  %5725 = vmatprep.subr.bf16.mxu0 %v5724_v30  ;;  %v5744_v30 = vpack.c.bf16 %v4887_v61, %v4886_v45  ;;  %v4419_v4 = vld [vmem:[%s8791_s10 + $0x418] sm:$0xff]  ;;  %v4420_v61 = vld [vmem:[%s8791_s10 + $0x420] sm:$0xff] }
 0xc95   :  { %4186 = vst.msk [vmem:[#allocation10 + $0x4] sm:$0x3] %vm4185_vm6, %v4183_v52  ;;  %v4226_v23 = vpop.permute.xlu0 %4225  ;;  %v4861_v52 = vld [vmem:[%s8793_s12 + $0x18] sm:$0xff]  ;;  %vm8898_vm6 = vcmask 130048  }
 0xc96   :  { %v4227_v50 = vrot.slane %v4226_v23, 6  ;;  %4197 = vst.msk [vmem:[#allocation10 + $0x4] sm:$0xf] %vm4196_vm2, %v4192_v56  ;;  %v4878_v56 = vld [vmem:[%s8793_s12 + $0xa0] sm:$0xff]  ;;  %vm4854_vm2 = vcmp.lt.s32.totalorder %v86_v0, 256 }
 0xc98   :  { %v4207_v49 = vpop.permute.xlu1 %4206  ;;  %v4229_v38 = vsel %vm4228_vm15, %v4227_v50, %v4226_v23  ;;  %vm8896_vm15 = vcmask 125954   ;;  %v4373_v23 = vld [vmem:[%s8791_s10 + $0x2a8] sm:$0xff]  ;;  %v4375_v50 = vld [vmem:[%s8791_s10 + $0x2b8] sm:$0xff] }
 0xc99   :  { %4210 = vst.msk [vmem:[#allocation10 + $0x6] sm:$0x3] %vm4209_vm7, %v4207_v49  ;;  %v4213_v35 = vpop.permute.xlu0 %4212  ;;  %vm4275_vm7 = vcmask 771440   ;;  %v4879_v49 = vld [vmem:[%s8793_s12 + $0xa8] sm:$0xff] }
 0xc9a   :  { %4216 = vst.msk [vmem:[#allocation10 + $0x6] sm:$0x3] %vm4215_vm13, %v4213_v35  ;;  %vm4284_vm13 = vmor %vm8896_vm15, %vm4283_vm3  ;;  %v5726_v35 = vpack.c.bf16 %v4861_v52, %v4860_v36  ;;  %v5624_v36 = vpack.c.bf16 %v4391_v57, %v4389_v33  ;;  %v4388_v52 = vld [vmem:[%s8791_s10 + $0x320] sm:$0xff]  ;;  %v4422_v33 = vld [vmem:[%s8791_s10 + $0x430] sm:$0xff] }
 0xc9b   :  { %4234 = vst.msk [vmem:[#allocation10 + $0x6] sm:$0xf] %vm4233_vm0, %v4229_v38  ;;  %v5606_v38 = vpack.c.bf16 %v4370_v25, %v4368_v34  ;;  %v4384_v34 = vld [vmem:[%s8791_s10 + $0x300] sm:$0xff] }
 0xc9c   :  { %v4256_v47 = vpop.permute.xlu1 %4255  ;;  %5727 = vmatpush3.bf16.msra.mxu0 %v5726_v35 }
 0xc9d   :  { %v4257_v2 = vrot.slane %v4256_v47, 6  ;;  %v4237_v40 = vpop.permute.xlu0 %4236 }
 0xc9e   :  { %4240 = vst.msk [vmem:[#allocation10 + $0x8] sm:$0x3] %vm4239_vm10, %v4237_v40  ;;  %v4862_v40 = vld [vmem:[%s8793_s12 + $0x20] sm:$0xff] }
 0xc9f   :  { %v4258_v26 = vsel %vm8895_vm1, %v4257_v2, %v4256_v47  ;;  %v4372_v47 = vld [vmem:[%s8791_s10 + $0x2a0] sm:$0xff]  ;;  %v5728_v2 = vpack.c.bf16 %v4879_v49, %v4878_v56  ;;  %v4390_v56 = vld [vmem:[%s8791_s10 + $0x330] sm:$0xff] }
 0xca0   :  { %v4250_v31 = vpop.permute.xlu1 %4249  ;;  %v5626_v49 = vpack.c.bf16 %v4390_v56, %v4388_v52  ;;  %v4424_v52 = vld [vmem:[%s8791_s10 + $0x440] sm:$0xff]  ;;  %v4426_v56 = vld [vmem:[%s8791_s10 + $0x450] sm:$0xff] }
 0xca1   :  { %4253 = vst.msk [vmem:[#allocation10 + $0x8] sm:$0x3] %vm4252_vm14, %v4250_v31  ;;  %v4279_v1 = vpop.permute.xlu0 %4278  ;;  %v4863_v31 = vld [vmem:[%s8793_s12 + $0x28] sm:$0xff]  ;;  %5729 = vmatprep.subr.bf16.mxu0 %v5728_v2 }
 0xca2   :  { %v4280_v43 = vrot.slane %v4279_v1, 6  ;;  %4263 = vst.msk [vmem:[#allocation10 + $0x8] sm:$0xf] %vm4262_vm4, %v4258_v26  ;;  %v4286_v53 = vld [vmem:[#allocation10] sm:$0xff]  ;;  %v5608_v26 = vpack.c.bf16 %v4375_v50, %v4373_v23  ;;  %v4393_v23 = vld [vmem:[%s8791_s10 + $0x348] sm:$0xff] }
 0xca3   :  { %v4505_v58 = vrot.slane %v4286_v53, %v6135_v18  ;;  %v4498_v12 = vcombine.high %v4286_v53, %v4286_v53  ;;  %v4881_v53 = vld [vmem:[%s8793_s12 + $0xb8] sm:$0xff]  ;;  %v4397_v2 = vld [vmem:[%s8791_s10 + $0x368] sm:$0xff] }
 0xca4   :  { %v4281_v60 = vsel %vm8897_vm11, %v4280_v43, %v4279_v1  ;;  %v4273_v15 = vpop.permute.xlu1 %4272  ;;  %v4374_v1 = vld [vmem:[%s8791_s10 + $0x2b0] sm:$0xff]  ;;  %v4395_v50 = vld [vmem:[%s8791_s10 + $0x358] sm:$0xff] }
 0xca5   :  { %4276 = vst.msk [vmem:[#allocation10 + $0xa] sm:$0x3] %vm4275_vm7, %v4273_v15  ;;  %v4513_v14 = vcombine.high %v4505_v58, %v4505_v58  ;;  %v8257_v16 = vrot.slane %v4498_v12, %v6135_v18  ;;  %v4880_v43 = vld [vmem:[%s8793_s12 + $0xb0] sm:$0xff]  ;;  %v5610_v12 = vpack.c.bf16 %v4374_v1, %v4372_v47  ;;  %v4865_v15 = vld [vmem:[%s8793_s12 + $0x38] sm:$0xff]  ;;  %v5628_v35 = vpack.c.bf16 %v4395_v50, %v4393_v23  ;;  %v4396_v1 = vld [vmem:[%s8791_s10 + $0x360] sm:$0xff] }
 0xca6   :  { %4285 = vst.msk [vmem:[#allocation10 + $0xa] sm:$0xf] %vm4284_vm13, %v4281_v60  ;;  %v5732_v44 = vpack.c.bf16 %v4881_v53, %v4880_v43  ;;  %v4864_v60 = vld [vmem:[%s8793_s12 + $0x30] sm:$0xff]  ;;  %v4401_v53 = vld [vmem:[%s8791_s10 + $0x388] sm:$0xff]  ;;  %v5662_v50 = vpack.c.bf16 %v4426_v56, %v4424_v52  ;;  %v4467_v56 = vld [vmem:[%s8791_s10 + $0x598] sm:$0xff] }
 0xca7   :  { %4603 = vmatprep.mubr.f32.mxu1 %v4513_v14  ;;  %v4514_v46 = vcombine.high %v8257_v16, %v8257_v16  ;;  %v5612_v14 = vpack.c.bf16 %v4379_v5, %v4377_v55  ;;  %v5734_v63 = vpack.c.bf16 %v4865_v15, %v4864_v60  ;;  %v4394_v47 = vld [vmem:[%s8791_s10 + $0x350] sm:$0xff]  ;;  %v4403_v55 = vld [vmem:[%s8791_s10 + $0x398] sm:$0xff]  ;;  %v4429_v23 = vld [vmem:[%s8791_s10 + $0x468] sm:$0xff] }
 0xca8   :  { %4604 = vmatmul.mubr.f32.vlgmr.msra.gmra.mrb[26].mxu1 %v4505_v58  ;;  %v5730_v58 = vpack.c.bf16 %v4863_v31, %v4862_v40  ;;  %v4399_v40 = vld [vmem:[%s8791_s10 + $0x378] sm:$0xff]  ;;  %v4398_v43 = vld [vmem:[%s8791_s10 + $0x370] sm:$0xff]  ;;  %v4465_v52 = vld [vmem:[%s8791_s10 + $0x588] sm:$0xff] }
 0xca9   :  { %5591 = vmatpush1.bf16.msra.mxu1 %v5590_v51  ;;  %4674 = vmatprep.mubr.f32.mxu1 %v4514_v46  ;;  %v4378_v51 = vld [vmem:[%s8791_s10 + $0x2d0] sm:$0xff]  ;;  %v4383_v46 = vld [vmem:[%s8791_s10 + $0x2f8] sm:$0xff]  ;;  %v5634_v5 = vpack.c.bf16 %v4398_v43, %v4396_v1  ;;  %v4437_v43 = vld [vmem:[%s8791_s10 + $0x4a8] sm:$0xff] }
 0xcaa   :  { %5593 = vmatprep.subr.bf16.mxu1 %v5592_v9  ;;  %v4882_v9 = vld [vmem:[%s8793_s12 + $0xc0] sm:$0xff]  ;;  %5731 = vmatpush3.bf16.msra.mxu0 %v5730_v58  ;;  %v5614_v20 = vpack.c.bf16 %v4378_v51, %v4376_v48  ;;  %v5616_v17 = vpack.c.bf16 %v4383_v46, %v4381_v32  ;;  %v5636_v58 = vpack.c.bf16 %v4403_v55, %v4401_v53  ;;  %v4402_v48 = vld [vmem:[%s8791_s10 + $0x390] sm:$0xff]  ;;  %v4407_v60 = vld [vmem:[%s8791_s10 + $0x3b8] sm:$0xff] }
 0xcab   :  { %5733 = vmatprep.subr.bf16.mxu0 %v5732_v44  ;;  %v4405_v44 = vld [vmem:[%s8791_s10 + $0x3a8] sm:$0xff]  ;;  %v4404_v51 = vld [vmem:[%s8791_s10 + $0x3a0] sm:$0xff]  ;;  %v4411_v32 = vld [vmem:[%s8791_s10 + $0x3d8] sm:$0xff] }
 0xcac   :  { %v4434_v1 = vld [vmem:[%s8791_s10 + $0x490] sm:$0xff]  ;;  %v4439_v53 = vld [vmem:[%s8791_s10 + $0x4b8] sm:$0xff] }
 0xcad   :  { %5595 = vmatpush1.bf16.msra.mxu1 %v5594_v41  ;;  %v4380_v41 = vld [vmem:[%s8791_s10 + $0x2e0] sm:$0xff] }
 0xcae   :  { %5597 = vmatprep.subr.bf16.mxu1 %v5596_v21  ;;  %v5736_v21 = vpack.c.bf16 %v4883_v54, %v4882_v9  ;;  %5735 = vmatpush3.bf16.msra.mxu0 %v5734_v63  ;;  %v5618_v27 = vpack.c.bf16 %v4382_v8, %v4380_v41  ;;  %v4406_v9 = vld [vmem:[%s8791_s10 + $0x3b0] sm:$0xff]  ;;  %v4409_v54 = vld [vmem:[%s8791_s10 + $0x3c8] sm:$0xff]  ;;  %v4412_v8 = vld [vmem:[%s8791_s10 + $0x3e0] sm:$0xff] }
 0xcaf   :  { %v5642_v46 = vpack.c.bf16 %v4406_v9, %v4404_v51  ;;  %v5644_v63 = vpack.c.bf16 %v4411_v32, %v4409_v54  ;;  %v4410_v41 = vld [vmem:[%s8791_s10 + $0x3d0] sm:$0xff]  ;;  %v8519_v7 = vld [vmem:[#allocation10 + $0x8] sm:$0x3f]  ;;  %v4445_v9 = vld [vmem:[%s8791_s10 + $0x4e8] sm:$0xff] }
 0xcb0   :  { %5737 = vmatprep.subr.bf16.mxu0 %v5736_v21  ;;  %v4413_v21 = vld [vmem:[%s8791_s10 + $0x3e8] sm:$0xff]  ;;  %v4442_v51 = vld [vmem:[%s8791_s10 + $0x4d0] sm:$0xff]  ;;  %v4447_v54 = vld [vmem:[%s8791_s10 + $0x4f8] sm:$0xff] }
 0xcb1   :  { %5599 = vmatpush1.bf16.msra.mxu1 %v5598_v39  ;;  %v4884_v39 = vld [vmem:[%s8793_s12 + $0xd0] sm:$0xff] }
 0xcb2   :  { %5601 = vmatprep.subr.bf16.mxu1 %v5600_v59  ;;  %v4885_v59 = vld [vmem:[%s8793_s12 + $0xd8] sm:$0xff]  ;;  %5739 = vmatpush3.bf16.msra.mxu0 %v5738_v62 }
 0xcb3   :  { %v5740_v25 = vpack.c.bf16 %v4885_v59, %v4884_v39  ;;  %v4414_v39 = vld [vmem:[%s8791_s10 + $0x3f0] sm:$0xff]  ;;  %v4417_v59 = vld [vmem:[%s8791_s10 + $0x408] sm:$0xff] }
 0xcb4   :  { %v5650_v62 = vpack.c.bf16 %v4414_v39, %v4412_v8  ;;  %v4450_v8 = vld [vmem:[%s8791_s10 + $0x510] sm:$0xff]  ;;  %v4453_v39 = vld [vmem:[%s8791_s10 + $0x528] sm:$0xff] }
 0xcb5   :  { %5603 = vmatpush1.bf16.msra.mxu1 %v5602_v13  ;;  %v4386_v13 = vld [vmem:[%s8791_s10 + $0x310] sm:$0xff]  ;;  %5741 = vmatprep.subr.bf16.mxu0 %v5740_v25 }
 0xcb6   :  { %5605 = vmatprep.subr.bf16.mxu1 %v5604_v24  ;;  %v5742_v24 = vpack.c.bf16 %v4869_v42, %v4868_v22  ;;  %v5622_v37 = vpack.c.bf16 %v4386_v13, %v4384_v34  ;;  %v4416_v34 = vld [vmem:[%s8791_s10 + $0x400] sm:$0xff]  ;;  %v4418_v25 = vld [vmem:[%s8791_s10 + $0x410] sm:$0xff]  ;;  %v8529_v22 = vrot.slane %v8519_v7, %v6135_v18  ;;  %v4421_v42 = vld [vmem:[%s8791_s10 + $0x428] sm:$0xff] }
 0xcb7   :  { %v5654_v13 = vpack.c.bf16 %v4418_v25, %v4416_v34  ;;  %v4454_v34 = vld [vmem:[%s8791_s10 + $0x530] sm:$0xff]  ;;  %v4457_v25 = vld [vmem:[%s8791_s10 + $0x548] sm:$0xff] }
 0xcb8   :  { %5743 = vmatpush3.bf16.msra.mxu0 %v5742_v24  ;;  %v4530_v57 = vcombine.high %v8529_v22, %v8529_v22  ;;  %v4425_v24 = vld [vmem:[%s8791_s10 + $0x448] sm:$0xff] }
 0xcb9   :  { %5607 = vmatpush1.bf16.msra.mxu1 %v5606_v38  ;;  %5745 = vmatprep.subr.bf16.mxu0 %v5744_v30  ;;  %v4392_v38 = vld [vmem:[%s8791_s10 + $0x340] sm:$0xff]  ;;  %v5658_v30 = vpack.c.bf16 %v4422_v33, %v4420_v61  ;;  %v4458_v61 = vld [vmem:[%s8791_s10 + $0x550] sm:$0xff]  ;;  %v4461_v33 = vld [vmem:[%s8791_s10 + $0x568] sm:$0xff] }
 0xcba   :  { %5609 = vmatprep.subr.bf16.mxu1 %v5608_v26  ;;  %v5630_v31 = vpack.c.bf16 %v4394_v47, %v4392_v38  ;;  %v5632_v26 = vpack.c.bf16 %v4399_v40, %v4397_v2  ;;  %v4430_v38 = vld [vmem:[%s8791_s10 + $0x470] sm:$0xff]  ;;  %v4433_v47 = vld [vmem:[%s8791_s10 + $0x488] sm:$0xff]  ;;  %v4435_v2 = vld [vmem:[%s8791_s10 + $0x498] sm:$0xff] }
 0xcbd   :  { %5611 = vmatpush1.bf16.msra.mxu1 %v5610_v12  ;;  %v4400_v12 = vld [vmem:[%s8791_s10 + $0x380] sm:$0xff] }
 0xcbe   :  { %5613 = vmatprep.subr.bf16.mxu1 %v5612_v14  ;;  %v5638_v15 = vpack.c.bf16 %v4402_v48, %v4400_v12  ;;  %v5640_v14 = vpack.c.bf16 %v4407_v60, %v4405_v44  ;;  %v4438_v12 = vld [vmem:[%s8791_s10 + $0x4b0] sm:$0xff]  ;;  %v4441_v48 = vld [vmem:[%s8791_s10 + $0x4c8] sm:$0xff]  ;;  %v4443_v44 = vld [vmem:[%s8791_s10 + $0x4d8] sm:$0xff] }
 0xcc1   :  { %5615 = vmatpush1.bf16.msra.mxu1 %v5614_v20  ;;  %v4408_v20 = vld [vmem:[%s8791_s10 + $0x3c0] sm:$0xff] }
 0xcc2   :  { %5617 = vmatprep.subr.bf16.mxu1 %v5616_v17  ;;  %v5646_v29 = vpack.c.bf16 %v4410_v41, %v4408_v20  ;;  %v5648_v17 = vpack.c.bf16 %v4415_v28, %v4413_v21  ;;  %v4446_v20 = vld [vmem:[%s8791_s10 + $0x4f0] sm:$0xff]  ;;  %v4449_v41 = vld [vmem:[%s8791_s10 + $0x508] sm:$0xff]  ;;  %v4451_v21 = vld [vmem:[%s8791_s10 + $0x518] sm:$0xff] }
 0xcc5   :  { %5619 = vmatpush1.bf16.msra.mxu1 %v5618_v27  ;;  %v5652_v27 = vpack.c.bf16 %v4419_v4, %v4417_v59  ;;  %v4455_v59 = vld [vmem:[%s8791_s10 + $0x538] sm:$0xff] }
 0xcc6   :  { %5621 = vmatprep.subr.bf16.mxu1 %v5620_v19  ;;  %v4423_v19 = vld [vmem:[%s8791_s10 + $0x438] sm:$0xff] }
 0xcc7   :  { %v5656_v45 = vpack.c.bf16 %v4423_v19, %v4421_v42  ;;  %v4459_v42 = vld [vmem:[%s8791_s10 + $0x558] sm:$0xff] }
 0xcc9   :  { %5623 = vmatpush1.bf16.msra.mxu1 %v5622_v37  ;;  %v4427_v37 = vld [vmem:[%s8791_s10 + $0x458] sm:$0xff] }
 0xcca   :  { %5625 = vmatprep.subr.bf16.mxu1 %v5624_v36  ;;  %v5660_v36 = vpack.c.bf16 %v4427_v37, %v4425_v24 }
 0xccd   :  { %5627 = vmatpush1.bf16.msra.mxu1 %v5626_v49 }
 0xcce   :  { %5629 = vmatprep.subr.bf16.mxu1 %v5628_v35  ;;  %v4428_v35 = vld [vmem:[%s8791_s10 + $0x460] sm:$0xff] }
 0xccf   :  { %v5666_v40 = vpack.c.bf16 %v4430_v38, %v4428_v35  ;;  %v4469_v35 = vld [vmem:[%s8791_s10 + $0x5a8] sm:$0xff]  ;;  %v4471_v38 = vld [vmem:[%s8791_s10 + $0x5b8] sm:$0xff] }
 0xcd1   :  { %5631 = vmatpush1.bf16.msra.mxu1 %v5630_v31  ;;  %v5668_v31 = vpack.c.bf16 %v4435_v2, %v4433_v47  ;;  %v5704_v2 = vpack.c.bf16 %v4471_v38, %v4469_v35 }
 0xcd2   :  { %5633 = vmatprep.subr.bf16.mxu1 %v5632_v26  ;;  %v4432_v26 = vld [vmem:[%s8791_s10 + $0x480] sm:$0xff] }
 0xcd3   :  { %v5670_v55 = vpack.c.bf16 %v4434_v1, %v4432_v26  ;;  %v4473_v26 = vld [vmem:[%s8791_s10 + $0x5c8] sm:$0xff]  ;;  %v4475_v1 = vld [vmem:[%s8791_s10 + $0x5d8] sm:$0xff] }
 0xcd5   :  { %5635 = vmatpush1.bf16.msra.mxu1 %v5634_v5  ;;  %v5672_v5 = vpack.c.bf16 %v4439_v53, %v4437_v43  ;;  %v5708_v53 = vpack.c.bf16 %v4475_v1, %v4473_v26 }
 0xcd6   :  { %5637 = vmatprep.subr.bf16.mxu1 %v5636_v58  ;;  %v4436_v58 = vld [vmem:[%s8791_s10 + $0x4a0] sm:$0xff] }
 0xcd7   :  { %v5674_v60 = vpack.c.bf16 %v4438_v12, %v4436_v58  ;;  %v4477_v58 = vld [vmem:[%s8791_s10 + $0x5e8] sm:$0xff]  ;;  %v4479_v12 = vld [vmem:[%s8791_s10 + $0x5f8] sm:$0xff] }
 0xcd9   :  { %5639 = vmatpush1.bf16.msra.mxu1 %v5638_v15  ;;  %v5676_v15 = vpack.c.bf16 %v4443_v44, %v4441_v48  ;;  %v5712_v44 = vpack.c.bf16 %v4479_v12, %v4477_v58 }
 0xcda   :  { %5641 = vmatprep.subr.bf16.mxu1 %v5640_v14  ;;  %v4440_v14 = vld [vmem:[%s8791_s10 + $0x4c0] sm:$0xff] }
 0xcdb   :  { %v5678_v32 = vpack.c.bf16 %v4442_v51, %v4440_v14  ;;  %v4481_v14 = vld [vmem:[%s8791_s10 + $0x608] sm:$0xff]  ;;  %v4483_v51 = vld [vmem:[%s8791_s10 + $0x618] sm:$0xff] }
 0xcdd   :  { %5643 = vmatpush1.bf16.msra.mxu1 %v5642_v46  ;;  %v5680_v46 = vpack.c.bf16 %v4447_v54, %v4445_v9  ;;  %v5716_v54 = vpack.c.bf16 %v4483_v51, %v4481_v14 }
 0xcde   :  { %5645 = vmatprep.subr.bf16.mxu1 %v5644_v63  ;;  %v4444_v63 = vld [vmem:[%s8791_s10 + $0x4e0] sm:$0xff] }
 0xcdf   :  { %v5682_v28 = vpack.c.bf16 %v4446_v20, %v4444_v63  ;;  %v4515_v20 = vcombine.high %v8519_v7, %v8519_v7  ;;  %v4872_v7 = vld [vmem:[%s8793_s12 + $0x70] sm:$0xff] }
 0xce1   :  { %5647 = vmatpush1.bf16.msra.mxu1 %v5646_v29  ;;  %v5684_v29 = vpack.c.bf16 %v4451_v21, %v4449_v41  ;;  %v4529_v41 = vrot.slane %v4515_v20, %v6135_v18  ;;  %v4870_v21 = vld [vmem:[%s8793_s12 + $0x60] sm:$0xff]  ;;  %v4889_v18 = vld [vmem:[%s8793_s12 + $0xf8] sm:$0xff] }
 0xce2   :  { %5649 = vmatprep.subr.bf16.mxu1 %v5648_v17  ;;  %v4448_v17 = vld [vmem:[%s8791_s10 + $0x500] sm:$0xff] }
 0xce3   :  { %v5686_v4 = vpack.c.bf16 %v4450_v8, %v4448_v17  ;;  %v4873_v17 = vld [vmem:[%s8793_s12 + $0x78] sm:$0xff] }
 0xce4   :  { %v5750_v8 = vpack.c.bf16 %v4873_v17, %v4872_v7 }
 0xce5   :  { %5651 = vmatpush1.bf16.msra.mxu1 %v5650_v62  ;;  %v5688_v62 = vpack.c.bf16 %v4455_v59, %v4453_v39  ;;  %v4484_v39 = vld [vmem:[%s8792_s11] sm:$0x3]  ;;  %v5980_v59 = vmov 1966171168  }
 0xce6   :  { %5653 = vmatprep.subr.bf16.mxu1 %v5652_v27  ;;  %v4452_v27 = vld [vmem:[%s8791_s10 + $0x520] sm:$0xff] }
 0xce7   :  { %v5690_v19 = vpack.c.bf16 %v4454_v34, %v4452_v27  ;;  %v4493_v27 = vrot.slane %v4484_v39, %v6113_v11 }
 0xce8   :  { %4675 = vmatmul.mubr.f32.vlgmr.msra.gmra.mrb[26].mxu1 %v8257_v16  ;;  %v4431_v16 = vld [vmem:[%s8791_s10 + $0x478] sm:$0xff] }
 0xce9   :  { %5655 = vmatpush1.bf16.msra.mxu1 %v5654_v13  ;;  %4745 = vmatprep.mubr.f32.mxu1 %v4530_v57  ;;  %v5664_v49 = vpack.c.bf16 %v4431_v16, %v4429_v23  ;;  %v5692_v13 = vpack.c.bf16 %v4459_v42, %v4457_v25  ;;  %v4463_v57 = vld [vmem:[%s8791_s10 + $0x578] sm:$0xff]  ;;  %v5700_v16 = vpack.c.bf16 %v4467_v56, %v4465_v52 }
 0xcea   :  { %5657 = vmatprep.subr.bf16.mxu1 %v5656_v45  ;;  %v4456_v45 = vld [vmem:[%s8791_s10 + $0x540] sm:$0xff]  ;;  %v5696_v37 = vpack.c.bf16 %v4463_v57, %v4461_v33 }
 0xceb   :  { %v5694_v24 = vpack.c.bf16 %v4458_v61, %v4456_v45 }
 0xced   :  { %5659 = vmatpush1.bf16.msra.mxu1 %v5658_v30  ;;  %v4460_v30 = vld [vmem:[%s8791_s10 + $0x560] sm:$0xff] }
 0xcee   :  { %5661 = vmatprep.subr.bf16.mxu1 %v5660_v36  ;;  %v4462_v36 = vld [vmem:[%s8791_s10 + $0x570] sm:$0xff] }
 0xcef   :  { %v5698_v23 = vpack.c.bf16 %v4462_v36, %v4460_v30 }
 0xcf1   :  { %5663 = vmatpush1.bf16.msra.mxu1 %v5662_v50  ;;  %v4464_v50 = vld [vmem:[%s8791_s10 + $0x580] sm:$0xff] }
 0xcf2   :  { %5665 = vmatprep.subr.bf16.mxu1 %v5664_v49  ;;  %v4466_v49 = vld [vmem:[%s8791_s10 + $0x590] sm:$0xff] }
 0xcf3   :  { %v5702_v47 = vpack.c.bf16 %v4466_v49, %v4464_v50 }
 0xcf5   :  { %5667 = vmatpush1.bf16.msra.mxu1 %v5666_v40  ;;  %v4468_v40 = vld [vmem:[%s8791_s10 + $0x5a0] sm:$0xff] }
 0xcf6   :  { %5669 = vmatprep.subr.bf16.mxu1 %v5668_v31  ;;  %v4470_v31 = vld [vmem:[%s8791_s10 + $0x5b0] sm:$0xff] }
 0xcf7   :  { %v5706_v43 = vpack.c.bf16 %v4470_v31, %v4468_v40 }
 0xcf9   :  { %5671 = vmatpush1.bf16.msra.mxu1 %v5670_v55  ;;  %v4472_v55 = vld [vmem:[%s8791_s10 + $0x5c0] sm:$0xff] }
 0xcfa   :  { %5673 = vmatprep.subr.bf16.mxu1 %v5672_v5  ;;  %v4474_v5 = vld [vmem:[%s8791_s10 + $0x5d0] sm:$0xff] }
 0xcfb   :  { %v5710_v48 = vpack.c.bf16 %v4474_v5, %v4472_v55 }
 0xcfd   :  { %5675 = vmatpush1.bf16.msra.mxu1 %v5674_v60  ;;  %v4476_v60 = vld [vmem:[%s8791_s10 + $0x5e0] sm:$0xff] }
 0xcfe   :  { %5677 = vmatprep.subr.bf16.mxu1 %v5676_v15  ;;  %v4478_v15 = vld [vmem:[%s8791_s10 + $0x5f0] sm:$0xff] }
 0xcff   :  { %v5714_v9 = vpack.c.bf16 %v4478_v15, %v4476_v60 }
 0xd01   :  { %5679 = vmatpush1.bf16.msra.mxu1 %v5678_v32  ;;  %v4480_v32 = vld [vmem:[%s8791_s10 + $0x600] sm:$0xff] }
 0xd02   :  { %5681 = vmatprep.subr.bf16.mxu1 %v5680_v46  ;;  %v4482_v46 = vld [vmem:[%s8791_s10 + $0x610] sm:$0xff] }
 0xd03   :  { %v5718_v63 = vpack.c.bf16 %v4482_v46, %v4480_v32 }
 0xd05   :  { %5683 = vmatpush1.bf16.msra.mxu1 %v5682_v28  ;;  %v4871_v28 = vld [vmem:[%s8793_s12 + $0x68] sm:$0xff] }
 0xd06   :  { %5685 = vmatprep.subr.bf16.mxu1 %v5684_v29  ;;  %v5746_v29 = vpack.c.bf16 %v4871_v28, %v4870_v21 }
 0xd08   :  { %5747 = vmatpush3.bf16.msra.mxu0 %v5746_v29 }
 0xd09   :  { %5687 = vmatpush1.bf16.msra.mxu1 %v5686_v4  ;;  %v4829_v4 = vunpack.c.l.s4 %v5980_v59 }
 0xd0a   :  { %5689 = vmatprep.subr.bf16.mxu1 %v5688_v62  ;;  %v4489_v62 = vrot.slane %v4484_v39, %v6110_v10 }
 0xd0b   :  { %v4830_v25 = vunpack.c.0.s8 %v4829_v4 }
 0xd0d   :  { %5691 = vmatpush1.bf16.msra.mxu1 %v5690_v19  ;;  %v4833_v33 = vsub.s32 %v4830_v25, %v6101_v3  ;;  %v5066_v3 = vld [vmem:[%s8794_s13] ss:$0 sm:$0xff] }
 0xd0e   :  { %5693 = vmatprep.subr.bf16.mxu1 %v5692_v13 }
 0xd11   :  { %5695 = vmatpush1.bf16.msra.mxu1 %v5694_v24 }
 0xd12   :  { %5697 = vmatprep.subr.bf16.mxu1 %v5696_v37 }
 0xd15   :  { %5699 = vmatpush1.bf16.msra.mxu1 %v5698_v23 }
 0xd16   :  { %5701 = vmatprep.subr.bf16.mxu1 %v5700_v16 }
 0xd19   :  { %5703 = vmatpush1.bf16.msra.mxu1 %v5702_v47 }
 0xd1a   :  { %5705 = vmatprep.subr.bf16.mxu1 %v5704_v2 }
 0xd1d   :  { %5707 = vmatpush1.bf16.msra.mxu1 %v5706_v43 }
 0xd1e   :  { %5709 = vmatprep.subr.bf16.mxu1 %v5708_v53 }
 0xd21   :  { %5711 = vmatpush1.bf16.msra.mxu1 %v5710_v48 }
 0xd22   :  { %5713 = vmatprep.subr.bf16.mxu1 %v5712_v44 }
 0xd25   :  { %5715 = vmatpush1.bf16.msra.mxu1 %v5714_v9 }
 0xd26   :  { %5717 = vmatprep.subr.bf16.mxu1 %v5716_v54 }
 0xd28   :  { %4746 = vmatmul.mubr.f32.vlgmr.msra.gmra.mrb[26].mxu1 %v8529_v22 }
 0xd29   :  { %5719 = vmatpush1.bf16.msra.mxu1 %v5718_v63  ;;  %4816 = vmatprep.mubr.f32.mxu1 %v5936_v6  ;;  %v4888_v6 = vld [vmem:[%s8793_s12 + $0xf0] sm:$0xff] }
 0xd2a   :  { %v5748_v22 = vpack.c.bf16 %v4889_v18, %v4888_v6 }
 0xd2c   :  { %5749 = vmatprep.subr.bf16.mxu0 %v5748_v22 }
 0xd2d   :  { %5751 = vmatpush3.bf16.msra.mxu0 %v5750_v8 }
 0xd30   :  { %5065 = vmatmul.mubr.msk.f32.vlgmr.msra.gmra.mrb[26].mxu1 %vm8898_vm6, %v4529_v41 }
 0xe03   :  { %v4818_v34 = vpop.f32.mrb[26].mxu1 }
 0xe04   :  { %v5756_v42 = vadd.f32 %v4818_v34, %v4489_v62  ;;  %v4820_v19 = vpop.f32.mrb[27].mxu1 }
 0xe05   :  { %v5757_v13 = vadd.f32 %v4820_v19, %v4493_v27 }
 0xe06   :  { %v4823_v45 = vmax.f32 %v5756_v42, 0.0 }
 0xe07   :  { %v4824_v61 = vmax.f32 %v5757_v13, 0.0 }
 0xe09   :  { %v4827_v57 = vcombine.low %v4823_v45, %v4824_v61  ;;  %4961 = vmatprep.mubr.f32.mxu0 %v4824_v61 }
 0xe0a   :  { %4962 = vmatmul.mubr.f32.vlgmr.msra.gmra.mrb[24].mxu0 %v4823_v45 }
 0xe0b   :  { %v4834_v24 = vrot.slane %v4827_v57, %v4833_v33 }
 0xe0d   :  { %v4835_v37 = vcombine.high %v4834_v24, %v4834_v24  ;;  %v4842_v30 = vrot.slane %v4834_v24, %v4833_v33 }
 0xe0f   :  { %v4849_v10 = vrot.slane %v4835_v37, %v4833_v33  ;;  %4856 = vst.msk [vmem:[%s8800_s19] sm:$0x3] %vm4854_vm2, %v4842_v30 }
 0xe11   :  { %4857 = vst.msk [vmem:[%s8800_s19 + $0x2] sm:$0x3] %vm4854_vm2, %v4849_v10 }
 0xedd   :  { %v5122_v11 = vpop.f32.mrb[24].mxu0 }
 0xede   :  { %v5123_v36 = vpop.f32.mrb[25].mxu0 }
 0xedf   :  { %v5124_v52 = vadd.f32 %v5123_v36, %v5122_v11 }
 0xee1   :  { %v4964_v56 = vadd.f32 %v5124_v52, %v5066_v3 }
 0xee3   :  { %v4974_v0 = vrot.slane %v4964_v56, %v4833_v33 }
 0xee5   :  { %v4975_v23 = vcombine.high %v4974_v0, %v4974_v0  ;;  %v4982_v16 = vrot.slane %v4974_v0, %v4833_v33 }
 0xee7   :  { %v4989_v50 = vrot.slane %v4975_v23, %v4833_v33  ;;  %4993 = vst.msk [vmem:[#allocation14] sm:$0x1] %vm4992_vm5, %v4982_v16 }
 0xee9   :  { %4994 = vst.msk [vmem:[#allocation14 + $0x1] sm:$0x1] %vm4992_vm5, %v4989_v50 }
 0xeea   :  { %5916 = shalt.err (!%p5913_p12)
}
 0xeeb   :  { %s5917_s28 = scalar_lea.hbm %s8801_s20, 32 }
 0xeec   :  { %p5918_p13 = scmp.ne.s32.totalorder %s8801_s20, %s5917_s28  ;;  %p5921_p0 = scmp.lt.u32.totalorder %s5917_s28, %s8801_s20 }
 0xeee   :  { %p5923_p1 = pnand %p5921_p0, %p5918_p13 }
 0xef0   :  { %5926 = shalt.err (!%p5923_p1)
}
 0xef1   :  { %5014 = dma.vmem_to_hbm [thread:$0]  %s5009_s21, 32, %s8801_s20, [#allocation13], %s8863_s17, %s8863_s17, %s5958_s29  }
 0xef2   :  { %5929 = dma.done.wait [#allocation13], 32  }
 0xef3   :  { %5930 = vsyncadd [#allocation13], 4294967264 }
 0xef4   :  { %5026 = vsyncpa [#allocation12], 1 }
 0xef5   :  { %5027 = vsyncpa [#allocation13], 1 }

</bundles_post_ra>
